<compile_context>
chip_gen: v6e
topology: v6e:2x2x1
jax: 0.10.0
libtpu: 0.0.40
codegen_flags: <defaults>
</compile_context>

<pallas_src>
import jax
import jax.numpy as jnp
from jax import lax
from jax.experimental import pallas as pl
from jax.experimental.pallas import tpu as pltpu

# ----------------------------- config ---------------------------------------
B = 2                   # logical batch (small demo shape)
C = 3                   # image channels
IMG = 32                # spatial size (small, synthetic)
PATCH = 16              # patch size  -> P = (IMG//PATCH)**2 = 4 patches
HIDDEN = 1024           # CLIP vision hidden size (pooler_output dim)
HEAD_DIM = 512          # head intermediate dim
NUM_CLASSES = 961
NUM_CLASSES_PAD = 1024  # pad class dim to a multiple of 128 -> lane-dense stores
PATCH_DIM = C * PATCH * PATCH   # 768
P = (IMG // PATCH) ** 2         # 4
FLAT_DIM = P * PATCH_DIM        # 3072 (patches laid out contiguously on lanes)
LN_EPS = 1e-5                   # PyTorch nn.LayerNorm default
MAX_TILE_B = 128                # fill MXU M dim / amortize per-step overhead
SUBLANE_PACK = 16               # bf16 sublane group for batch padding

# rows of the packed (8, HIDDEN) f32 bias / LayerNorm-parameter slab
ROW_BP, ROW_GPOST, ROW_BPOST, ROW_B1, ROW_G1, ROW_BETA1 = range(6)


# ----------------------------- shared math -----------------------------------
def _layernorm(x, gamma, beta, eps=LN_EPS):
    mu = jnp.mean(x, axis=-1, keepdims=True)
    var = jnp.mean((x - mu) ** 2, axis=-1, keepdims=True)
    return (x - mu) * lax.rsqrt(var + eps) * gamma + beta


# ----------------------------- kernel ----------------------------------------
def tile_classifier_kernel(
    patches_ref,   # (tile_b, FLAT_DIM)        bf16  (streamed per batch tile)
    wp_ref,        # (PATCH_DIM, HIDDEN)       bf16  VMEM-resident
    w1_ref,        # (HIDDEN, HEAD_DIM)        bf16  VMEM-resident
    misc_ref,      # (8, HIDDEN)               f32   packed biases / LN params
    w2_ref,        # (HEAD_DIM, class_blk)     bf16
    b2_ref,        # (1, class_blk)            f32
    out_ref,       # (tile_b, class_blk)       f32
):
    x = patches_ref[...]                                         # bf16

    # --- synthetic encoder ---------------------------------------------------
    # Mean-pool over the P patches BEFORE the patch-embed matmul (exactly
    # equivalent while the stand-in encoder is linear between embedding and
    # pooling).  Patches are contiguous on the lane axis, so the mean is a
    # P-term sum of lane-aligned slices (no cross-sublane reduce, no 3-D block).
    # TODO(synk): CLIP transformer encoder layers + CLS-token pooling are not
    # re-implemented; revert this hoist if real attention blocks are added.
    pooled_patches = x[:, 0:PATCH_DIM].astype(jnp.float32)
    for p in range(1, P):
        pooled_patches = pooled_patches + x[:, p * PATCH_DIM:(p + 1) * PATCH_DIM].astype(jnp.float32)
    pooled_patches = pooled_patches * (1.0 / P)                   # (tile_b, 768) f32

    bp     = misc_ref[ROW_BP:ROW_BP + 1, :]                       # (1, HIDDEN)
    g_post = misc_ref[ROW_GPOST:ROW_GPOST + 1, :]
    b_post = misc_ref[ROW_BPOST:ROW_BPOST + 1, :]
    b1     = misc_ref[ROW_B1:ROW_B1 + 1, :HEAD_DIM]               # (1, HEAD_DIM)
    g1     = misc_ref[ROW_G1:ROW_G1 + 1, :HEAD_DIM]
    beta1  = misc_ref[ROW_BETA1:ROW_BETA1 + 1, :HEAD_DIM]

    emb = jnp.dot(pooled_patches.astype(jnp.bfloat16), wp_ref[...],
                  preferred_element_type=jnp.float32) + bp        # (tile_b, 1024)
    pooled = _layernorm(emb, g_post, b_post)                      # post_layernorm

    # --- head: Linear -> LayerNorm -> ReLU -> Dropout(identity) -> Linear ----
    h = jnp.dot(pooled.astype(jnp.bfloat16), w1_ref[...],
                preferred_element_type=jnp.float32) + b1          # (tile_b, 512)
    h = _layernorm(h, g1, beta1)
    h = jnp.maximum(h, 0.0)                                       # ReLU
    # Dropout(0.3) is identity at inference (model.eval()) -- no-op here.
    logits = jnp.dot(h.astype(jnp.bfloat16), w2_ref[...],
                     preferred_element_type=jnp.float32) + b2_ref[...]
    out_ref[...] = logits.astype(out_ref.dtype)


# ----------------------------- wrapper ----------------------------------------
def _to_flat_patches(pixel_values):
    """NCHW -> (B, P*C*ps*ps) bf16: im2col of the stride-PATCH patch-embed conv."""
    b, c, h, w = pixel_values.shape
    patches = pixel_values.reshape(b, c, h // PATCH, PATCH, w // PATCH, PATCH)
    patches = patches.transpose(0, 2, 4, 1, 3, 5).reshape(b, FLAT_DIM)
    return patches.astype(jnp.bfloat16)


def tile_classifier_forward(pixel_values, params, *, max_tile_b=MAX_TILE_B):
    """pixel_values: (B, C, IMG, IMG) NCHW f32 -> logits (B, NUM_CLASSES) f32."""
    b, c, h, w = pixel_values.shape
    assert (c, h, w) == (C, IMG, IMG)

    patches = _to_flat_patches(pixel_values)                      # (B, 3072) bf16

    # Pad batch to a full bf16 sublane group and tile up to 128 rows so the
    # MXU M dimension fills and per-step overhead amortizes.  Kernel math is
    # row-independent; pad rows are discarded below.
    b_grp = pl.cdiv(b, SUBLANE_PACK) * SUBLANE_PACK
    tile_b = min(max_tile_b, b_grp)
    b_pad = pl.cdiv(b_grp, tile_b) * tile_b
    if b_pad != b:
        patches = jnp.pad(patches, ((0, b_pad - b), (0, 0)))
    n_tiles = b_pad // tile_b

    # With a single batch tile, split the (padded) class dim into two 512-wide
    # column blocks so v7x's second TensorCore gets work (and half the w2 DMA).
    # With >= 2 batch tiles keep the class dim whole so w2 is fetched once.
    n_cls = 2 if n_tiles == 1 else 1
    class_blk = NUM_CLASSES_PAD // n_cls

    # Blocks that never change across the grid: single-buffered, VMEM-resident.
    def resident(shape):
        return pl.BlockSpec(shape, lambda i, j: (0,) * len(shape),
                            pipeline_mode=pl.Buffered(1))

    # w2/b2 are constant when the class dim is whole; double-buffer only when
    # the class axis actually iterates (so the second half can be prefetched).
    w2_mode = pl.Buffered(1 if n_cls == 1 else 2)

    grid_spec = pltpu.PrefetchScalarGridSpec(
        num_scalar_prefetch=0,
        grid=(n_tiles, n_cls),
        in_specs=[
            pl.BlockSpec((tile_b, FLAT_DIM), lambda i, j: (i, 0)),      # patches
            resident((PATCH_DIM, HIDDEN)),                              # wp
            resident((HIDDEN, HEAD_DIM)),                               # w1
            resident((8, HIDDEN)),                                      # packed biases/LN
            pl.BlockSpec((HEAD_DIM, class_blk), lambda i, j: (0, j),
                         pipeline_mode=w2_mode),                        # w2
            pl.BlockSpec((1, class_blk), lambda i, j: (0, j),
                         pipeline_mode=w2_mode),                        # b2
        ],
        out_specs=pl.BlockSpec((tile_b, class_blk), lambda i, j: (i, j)),
    )

    logits_pad = pl.pallas_call(
        tile_classifier_kernel,
        out_shape=jax.ShapeDtypeStruct((b_pad, NUM_CLASSES_PAD), jnp.float32),
        grid_spec=grid_spec,
        compiler_params=pltpu.CompilerParams(
            # batch tiles / class blocks are independent -> shard across v7x TCs
            dimension_semantics=("parallel", "parallel"),
            # ~6-7 MiB actual footprint at tile_b=128; 32 MiB leaves headroom on
            # v7x (64 MiB physical) and avoids the v5e 16 MiB scoped default.
            vmem_limit_bytes=32 << 20,
        ),
    )(
        patches,
        params["wp"], params["w1"], params["misc"],
        params["w2"], params["b2"],
    )

    return logits_pad[:b, :NUM_CLASSES]   # strip batch + class padding


# ----------------------------- pure-JAX reference ------------------------------
def reference_forward(pixel_values, params):
    patches = _to_flat_patches(pixel_values).astype(jnp.float32)          # (B, 3072)
    pooled_patches = patches.reshape(-1, P, PATCH_DIM).mean(axis=1)       # (B, 768)
    misc = params["misc"]
    bp, g_post, b_post = misc[ROW_BP], misc[ROW_GPOST], misc[ROW_BPOST]
    b1 = misc[ROW_B1, :HEAD_DIM]
    g1 = misc[ROW_G1, :HEAD_DIM]
    beta1 = misc[ROW_BETA1, :HEAD_DIM]

    emb = jnp.dot(pooled_patches.astype(jnp.bfloat16), params["wp"],
                  preferred_element_type=jnp.float32) + bp
    pooled = _layernorm(emb, g_post, b_post)
    h = jnp.dot(pooled.astype(jnp.bfloat16), params["w1"],
                preferred_element_type=jnp.float32) + b1
    h = _layernorm(h, g1, beta1)
    h = jnp.maximum(h, 0.0)
    logits = jnp.dot(h.astype(jnp.bfloat16), params["w2"],
                     preferred_element_type=jnp.float32) + params["b2"][0]
    return logits[:, :NUM_CLASSES]


# ----------------------------- params ----------------------------------------
def init_params(key):
    ks = jax.random.split(key, 9)
    # Weights stored bf16 (halves dominant HBM traffic); LN/bias params f32.
    wp = (jax.random.normal(ks[0], (PATCH_DIM, HIDDEN), jnp.float32) * 0.02
          ).astype(jnp.bfloat16)
    w1 = (jax.random.normal(ks[1], (HIDDEN, HEAD_DIM), jnp.float32) * 0.02
          ).astype(jnp.bfloat16)
    w2_real = jax.random.normal(ks[2], (HEAD_DIM, NUM_CLASSES), jnp.float32) * 0.02
    # zero-pad class dim to 1024 once at init (not per call) for lane-dense stores
    w2 = (jnp.zeros((HEAD_DIM, NUM_CLASSES_PAD), jnp.float32)
          .at[:, :NUM_CLASSES].set(w2_real).astype(jnp.bfloat16))
    b2 = (jnp.zeros((1, NUM_CLASSES_PAD), jnp.float32)
          .at[0, :NUM_CLASSES].set(jax.random.normal(ks[3], (NUM_CLASSES,)) * 0.02))

    # Packed (8, HIDDEN) f32 slab holding all tiny bias / LayerNorm parameters:
    # one DMA + one resident buffer instead of eight separate (1, N) inputs.
    misc = jnp.zeros((8, HIDDEN), jnp.float32)
    misc = misc.at[ROW_BP, :].set(jax.random.normal(ks[4], (HIDDEN,)) * 0.02)       # patch-embed bias
    misc = misc.at[ROW_GPOST, :].set(1.0 + jax.random.normal(ks[5], (HIDDEN,)) * 0.02)  # post-LN gamma
    misc = misc.at[ROW_BPOST, :].set(jax.random.normal(ks[6], (HIDDEN,)) * 0.02)    # post-LN beta
    misc = misc.at[ROW_B1, :HEAD_DIM].set(jax.random.normal(ks[7], (HEAD_DIM,)) * 0.02)  # head Linear-1 bias
    misc = misc.at[ROW_G1, :HEAD_DIM].set(1.0 + jax.random.normal(ks[8], (HEAD_DIM,)) * 0.02)  # head LN gamma
    # ROW_BETA1 stays zero (PyTorch LayerNorm beta default).

    return dict(wp=wp, w1=w1, w2=w2, b2=b2, misc=misc)


# ----------------------------- main -------------------------------------------
if __name__ == "__main__":
    key = jax.random.PRNGKey(0)
    k_x, k_p = jax.random.split(key)
    pixel_values = jax.random.normal(k_x, (B, C, IMG, IMG), jnp.float32)
    params = init_params(k_p)

    logits = tile_classifier_forward(pixel_values, params)
    logits = jax.block_until_ready(logits)
    assert logits.shape == (B, NUM_CLASSES), logits.shape
    assert bool(jnp.all(jnp.isfinite(logits)))

    ref = reference_forward(pixel_values, params)
    err = float(jnp.max(jnp.abs(logits - ref)))
    assert jnp.allclose(logits, ref, rtol=1e-2, atol=1e-2), err

    print("KERNEL_OK")
</pallas_src>

<mosaic_0001>
module attributes {stable_mosaic.version = 11 : i64} {
  func.func @tile_classifier_kernel(%arg0: i32, %arg1: i32, %arg2: memref<16x3072xbf16, #tpu.memory_space<vmem>>, %arg3: memref<768x1024xbf16, #tpu.memory_space<vmem>>, %arg4: memref<1024x512xbf16, #tpu.memory_space<vmem>>, %arg5: memref<8x1024xf32, #tpu.memory_space<vmem>>, %arg6: memref<512x512xbf16, #tpu.memory_space<vmem>>, %arg7: memref<1x512xf32, #tpu.memory_space<vmem>>, %arg8: memref<16x512xf32, #tpu.memory_space<vmem>>) attributes {dimension_semantics = [#tpu.dimension_semantics<parallel>, #tpu.dimension_semantics<parallel>], iteration_bounds = array<i64: 1, 2>, scalar_prefetch = 0 : i64, scratch_operands = 0 : i64, tpu.core_type = #tpu.core_type<tc>, window_params = [{transform_indices = @transform_0, window_bounds = array<i64: 16, 3072>}, {pipeline_mode = #tpu.pipeline_mode<synchronous>, transform_indices = @transform_1, window_bounds = array<i64: 768, 1024>}, {pipeline_mode = #tpu.pipeline_mode<synchronous>, transform_indices = @transform_2, window_bounds = array<i64: 1024, 512>}, {pipeline_mode = #tpu.pipeline_mode<synchronous>, transform_indices = @transform_3, window_bounds = array<i64: 8, 1024>}, {pipeline_mode = #tpu.pipeline_mode<double_buffered>, transform_indices = @transform_4, window_bounds = array<i64: 512, 512>}, {pipeline_mode = #tpu.pipeline_mode<double_buffered>, transform_indices = @transform_5, window_bounds = array<i64: 1, 512>}, {transform_indices = @transform_6, window_bounds = array<i64: 16, 512>}]} {
    %c0 = arith.constant 0 : index
    %c0_0 = arith.constant 0 : index
    %0 = vector.load %arg2[%c0, %c0_0] : memref<16x3072xbf16, #tpu.memory_space<vmem>>, vector<16x3072xbf16>
    %1 = vector.extract_strided_slice %0 {offsets = [0, 0], sizes = [16, 768], strides = [1, 1]} : vector<16x3072xbf16> to vector<16x768xbf16>
    %2 = arith.extf %1 : vector<16x768xbf16> to vector<16x768xf32>
    %3 = vector.extract_strided_slice %0 {offsets = [0, 768], sizes = [16, 768], strides = [1, 1]} : vector<16x3072xbf16> to vector<16x768xbf16>
    %4 = arith.extf %3 : vector<16x768xbf16> to vector<16x768xf32>
    %5 = arith.addf %2, %4 : vector<16x768xf32>
    %6 = vector.extract_strided_slice %0 {offsets = [0, 1536], sizes = [16, 768], strides = [1, 1]} : vector<16x3072xbf16> to vector<16x768xbf16>
    %7 = arith.extf %6 : vector<16x768xbf16> to vector<16x768xf32>
    %8 = arith.addf %5, %7 : vector<16x768xf32>
    %9 = vector.extract_strided_slice %0 {offsets = [0, 2304], sizes = [16, 768], strides = [1, 1]} : vector<16x3072xbf16> to vector<16x768xbf16>
    %10 = arith.extf %9 : vector<16x768xbf16> to vector<16x768xf32>
    %11 = arith.addf %8, %10 : vector<16x768xf32>
    %cst = arith.constant 2.500000e-01 : f32
    %12 = vector.broadcast %cst : f32 to vector<16x768xf32>
    %13 = arith.mulf %11, %12 : vector<16x768xf32>
    %c0_1 = arith.constant 0 : index
    %c0_2 = arith.constant 0 : index
    %14 = vector.load %arg5[%c0_1, %c0_2] : memref<8x1024xf32, #tpu.memory_space<vmem>>, vector<1x1024xf32>
    %c1 = arith.constant 1 : index
    %c0_3 = arith.constant 0 : index
    %15 = vector.load %arg5[%c1, %c0_3] : memref<8x1024xf32, #tpu.memory_space<vmem>>, vector<1x1024xf32>
    %c2 = arith.constant 2 : index
    %c0_4 = arith.constant 0 : index
    %16 = vector.load %arg5[%c2, %c0_4] : memref<8x1024xf32, #tpu.memory_space<vmem>>, vector<1x1024xf32>
    %c3 = arith.constant 3 : index
    %c0_5 = arith.constant 0 : index
    %17 = vector.load %arg5[%c3, %c0_5] : memref<8x1024xf32, #tpu.memory_space<vmem>>, vector<1x512xf32>
    %c4 = arith.constant 4 : index
    %c0_6 = arith.constant 0 : index
    %18 = vector.load %arg5[%c4, %c0_6] : memref<8x1024xf32, #tpu.memory_space<vmem>>, vector<1x512xf32>
    %c5 = arith.constant 5 : index
    %c0_7 = arith.constant 0 : index
    %19 = vector.load %arg5[%c5, %c0_7] : memref<8x1024xf32, #tpu.memory_space<vmem>>, vector<1x512xf32>
    %20 = arith.truncf %13 : vector<16x768xf32> to vector<16x768xbf16>
    %c0_8 = arith.constant 0 : index
    %c0_9 = arith.constant 0 : index
    %21 = vector.load %arg3[%c0_8, %c0_9] : memref<768x1024xbf16, #tpu.memory_space<vmem>>, vector<768x1024xbf16>
    %cst_10 = arith.constant dense<0.000000e+00> : vector<16x1024xf32>
    %22 = tpu.matmul %20, %21, %cst_10 {dimension_numbers = #tpu.dot_dimension_numbers<[1], [0], [0], [1], [0, 0, 1, 1], [], []>} : vector<16x768xbf16>, vector<768x1024xbf16>, vector<16x1024xf32> -> vector<16x1024xf32>
    %23 = vector.broadcast %14 : vector<1x1024xf32> to vector<16x1024xf32>
    %24 = arith.addf %22, %23 : vector<16x1024xf32>
    %cst_11 = arith.constant dense<0.000000e+00> : vector<16xf32>
    %25 = vector.multi_reduction <add>, %24, %cst_11 [1] : vector<16x1024xf32> to vector<16xf32>
    %26 = vector.shape_cast %25 : vector<16xf32> to vector<16x1xf32>
    %cst_12 = arith.constant 1.024000e+03 : f32
    %27 = vector.broadcast %cst_12 : f32 to vector<16x1xf32>
    %28 = arith.divf %26, %27 : vector<16x1xf32>
    %29 = vector.broadcast %28 : vector<16x1xf32> to vector<16x1024xf32>
    %30 = arith.subf %24, %29 : vector<16x1024xf32>
    %31 = arith.mulf %30, %30 : vector<16x1024xf32>
    %cst_13 = arith.constant dense<0.000000e+00> : vector<16xf32>
    %32 = vector.multi_reduction <add>, %31, %cst_13 [1] : vector<16x1024xf32> to vector<16xf32>
    %33 = vector.shape_cast %32 : vector<16xf32> to vector<16x1xf32>
    %cst_14 = arith.constant 1.024000e+03 : f32
    %34 = vector.broadcast %cst_14 : f32 to vector<16x1xf32>
    %35 = arith.divf %33, %34 : vector<16x1xf32>
    %36 = vector.broadcast %28 : vector<16x1xf32> to vector<16x1024xf32>
    %37 = arith.subf %24, %36 : vector<16x1024xf32>
    %cst_15 = arith.constant 9.99999974E-6 : f32
    %38 = vector.broadcast %cst_15 : f32 to vector<16x1xf32>
    %39 = arith.addf %35, %38 : vector<16x1xf32>
    %40 = math.rsqrt %39 : vector<16x1xf32>
    %41 = vector.broadcast %40 : vector<16x1xf32> to vector<16x1024xf32>
    %42 = arith.mulf %37, %41 : vector<16x1024xf32>
    %43 = vector.broadcast %15 : vector<1x1024xf32> to vector<16x1024xf32>
    %44 = arith.mulf %42, %43 : vector<16x1024xf32>
    %45 = vector.broadcast %16 : vector<1x1024xf32> to vector<16x1024xf32>
    %46 = arith.addf %44, %45 : vector<16x1024xf32>
    %47 = arith.truncf %46 : vector<16x1024xf32> to vector<16x1024xbf16>
    %c0_16 = arith.constant 0 : index
    %c0_17 = arith.constant 0 : index
    %48 = vector.load %arg4[%c0_16, %c0_17] : memref<1024x512xbf16, #tpu.memory_space<vmem>>, vector<1024x512xbf16>
    %cst_18 = arith.constant dense<0.000000e+00> : vector<16x512xf32>
    %49 = tpu.matmul %47, %48, %cst_18 {dimension_numbers = #tpu.dot_dimension_numbers<[1], [0], [0], [1], [0, 0, 1, 1], [], []>} : vector<16x1024xbf16>, vector<1024x512xbf16>, vector<16x512xf32> -> vector<16x512xf32>
    %50 = vector.broadcast %17 : vector<1x512xf32> to vector<16x512xf32>
    %51 = arith.addf %49, %50 : vector<16x512xf32>
    %cst_19 = arith.constant dense<0.000000e+00> : vector<16xf32>
    %52 = vector.multi_reduction <add>, %51, %cst_19 [1] : vector<16x512xf32> to vector<16xf32>
    %53 = vector.shape_cast %52 : vector<16xf32> to vector<16x1xf32>
    %cst_20 = arith.constant 5.120000e+02 : f32
    %54 = vector.broadcast %cst_20 : f32 to vector<16x1xf32>
    %55 = arith.divf %53, %54 : vector<16x1xf32>
    %56 = vector.broadcast %55 : vector<16x1xf32> to vector<16x512xf32>
    %57 = arith.subf %51, %56 : vector<16x512xf32>
    %58 = arith.mulf %57, %57 : vector<16x512xf32>
    %cst_21 = arith.constant dense<0.000000e+00> : vector<16xf32>
    %59 = vector.multi_reduction <add>, %58, %cst_21 [1] : vector<16x512xf32> to vector<16xf32>
    %60 = vector.shape_cast %59 : vector<16xf32> to vector<16x1xf32>
    %cst_22 = arith.constant 5.120000e+02 : f32
    %61 = vector.broadcast %cst_22 : f32 to vector<16x1xf32>
    %62 = arith.divf %60, %61 : vector<16x1xf32>
    %63 = vector.broadcast %55 : vector<16x1xf32> to vector<16x512xf32>
    %64 = arith.subf %51, %63 : vector<16x512xf32>
    %cst_23 = arith.constant 9.99999974E-6 : f32
    %65 = vector.broadcast %cst_23 : f32 to vector<16x1xf32>
    %66 = arith.addf %62, %65 : vector<16x1xf32>
    %67 = math.rsqrt %66 : vector<16x1xf32>
    %68 = vector.broadcast %67 : vector<16x1xf32> to vector<16x512xf32>
    %69 = arith.mulf %64, %68 : vector<16x512xf32>
    %70 = vector.broadcast %18 : vector<1x512xf32> to vector<16x512xf32>
    %71 = arith.mulf %69, %70 : vector<16x512xf32>
    %72 = vector.broadcast %19 : vector<1x512xf32> to vector<16x512xf32>
    %73 = arith.addf %71, %72 : vector<16x512xf32>
    %cst_24 = arith.constant 0.000000e+00 : f32
    %74 = vector.broadcast %cst_24 : f32 to vector<16x512xf32>
    %75 = arith.maximumf %73, %74 : vector<16x512xf32>
    %76 = arith.truncf %75 : vector<16x512xf32> to vector<16x512xbf16>
    %c0_25 = arith.constant 0 : index
    %c0_26 = arith.constant 0 : index
    %77 = vector.load %arg6[%c0_25, %c0_26] : memref<512x512xbf16, #tpu.memory_space<vmem>>, vector<512x512xbf16>
    %cst_27 = arith.constant dense<0.000000e+00> : vector<16x512xf32>
    %78 = tpu.matmul %76, %77, %cst_27 {dimension_numbers = #tpu.dot_dimension_numbers<[1], [0], [0], [1], [0, 0, 1, 1], [], []>} : vector<16x512xbf16>, vector<512x512xbf16>, vector<16x512xf32> -> vector<16x512xf32>
    %c0_28 = arith.constant 0 : index
    %c0_29 = arith.constant 0 : index
    %79 = vector.load %arg7[%c0_28, %c0_29] : memref<1x512xf32, #tpu.memory_space<vmem>>, vector<1x512xf32>
    %80 = vector.broadcast %79 : vector<1x512xf32> to vector<16x512xf32>
    %81 = arith.addf %78, %80 : vector<16x512xf32>
    %c0_30 = arith.constant 0 : index
    %c0_31 = arith.constant 0 : index
    %82 = vector.load %arg8[%c0_30, %c0_31] : memref<16x512xf32, #tpu.memory_space<vmem>>, vector<16x512xf32>
    tpu.vector_store %arg8[%c0_30, %c0_31], %81 {strides = array<i32>} : memref<16x512xf32, #tpu.memory_space<vmem>>, vector<16x512xf32>,
    return
  }
  func.func @transform_0(%arg0: i32, %arg1: i32) -> (i32, i32) {
    %c0_i32 = arith.constant 0 : i32
    %c0_i32_0 = arith.constant 0 : i32
    return %arg0, %c0_i32 : i32, i32
  }
  func.func @transform_1(%arg0: i32, %arg1: i32) -> (i32, i32) {
    %c0_i32 = arith.constant 0 : i32
    %c0_i32_0 = arith.constant 0 : i32
    %c0_i32_1 = arith.constant 0 : i32
    return %c0_i32, %c0_i32_0 : i32, i32
  }
  func.func @transform_2(%arg0: i32, %arg1: i32) -> (i32, i32) {
    %c0_i32 = arith.constant 0 : i32
    %c0_i32_0 = arith.constant 0 : i32
    %c0_i32_1 = arith.constant 0 : i32
    return %c0_i32, %c0_i32_0 : i32, i32
  }
  func.func @transform_3(%arg0: i32, %arg1: i32) -> (i32, i32) {
    %c0_i32 = arith.constant 0 : i32
    %c0_i32_0 = arith.constant 0 : i32
    %c0_i32_1 = arith.constant 0 : i32
    return %c0_i32, %c0_i32_0 : i32, i32
  }
  func.func @transform_4(%arg0: i32, %arg1: i32) -> (i32, i32) {
    %c0_i32 = arith.constant 0 : i32
    %c0_i32_0 = arith.constant 0 : i32
    return %c0_i32, %arg1 : i32, i32
  }
  func.func @transform_5(%arg0: i32, %arg1: i32) -> (i32, i32) {
    %c0_i32 = arith.constant 0 : i32
    %c0_i32_0 = arith.constant 0 : i32
    return %c0_i32, %arg1 : i32, i32
  }
  func.func @transform_6(%arg0: i32, %arg1: i32) -> (i32, i32) {
    %c0_i32 = arith.constant 0 : i32
    return %arg0, %arg1 : i32, i32
  }
}

</mosaic_0001>

<bundles_post_ra>
// kernel: tpu_custom_call.1
= control target key start
LH: loop header
LB: loop body
LE: loop exit
PB: predicated region body
PF: predicated region fallthrough
CT: control target
= control target key end

     0   :  { %s9459_s0 = inlined_call_operand.hbm [shape: bf16[16,3072], index: 0, kind: input, shape index: {}]   ;;  %s9460_s1 = inlined_call_operand.hbm [shape: bf16[768,1024], index: 1, kind: input, shape index: {}]   ;;  %s9461_s2 = inlined_call_operand.hbm [shape: bf16[1024,512], index: 2, kind: input, shape index: {}]   ;;  %s9462_s3 = inlined_call_operand.hbm [shape: f32[8,1024], index: 3, kind: input, shape index: {}]   ;;  %s9463_s4 = inlined_call_operand.hbm [shape: bf16[512,1024], index: 4, kind: input, shape index: {}]   ;;  %s9464_s5 = inlined_call_operand.hbm [shape: f32[1,1024], index: 5, kind: input, shape index: {}]   ;;  %s9465_s6 = inlined_call_operand.hbm [shape: f32[16,1024], index: 6, kind: output, shape index: {}]  }
   0x1   :  { %9473 = sst [smem:[#allocation20_spill]] %s9459_s0 }
   0x2   :  { %9474 = sst [smem:[#allocation21_spill]] %s9460_s1 }
   0x3   :  { %9475 = sst [smem:[#allocation22_spill]] %s9463_s4 }
   0x4   :  { %11 = vsyncpa [#allocation3], 0 }
   0x5   :  { %12 = vsyncpa [#allocation6], 0 }
   0x6   :  { %13 = vsyncpa [#allocation9], 0 }
   0x7   :  { %14 = vsyncpa [#allocation4], 0 }
   0x8   :  { %16 = vsyncpa [#allocation4 + $0x1], 0  ;;  %s8565_s21 = smov 0   ;;  %s8567_s22 = smov 0  }
   0x9   :  { %s8569_s23 = smov 0   ;;  %s8571_s24 = smov 0  }
   0xa   :  { %s8573_s25 = smov 0   ;;  %s8575_s26 = smov 0  }
   0xb LB: > { %9476 = sst [smem:[#allocation18_spill]] %s8492_s21  ;;  %s8596_s27 = sadd.s32 4294967295, %s8512_s26   ;;  %s8512_s26 = sphi %s8575_s26, %s22_s26   ;;  %s8508_s25 = sphi %s8573_s25, %s9507_s25   ;;  %s8504_s24 = sphi %s8571_s24, %s9506_s24   ;;  %s8500_s23 = sphi %s8569_s23, %s9505_s23   ;;  %s8496_s22 = sphi %s8567_s22, %s9504_s22   ;;  %s8492_s21 = sphi %s8565_s21, %s9503_s21  }
   0xc   : > { %s6762_s28 = sadd.s32 4294967294, %s8512_s26   ;;  %p137_p0 = scmp.ne.s32.totalorder %s8500_s23, %s8496_s22 }
   0xd   : > { %p138_p1 = scmp.eq.s32.totalorder %s8512_s26, 0  ;;  %p143_p2 = scmp.ne.s32.totalorder %s8496_s22, %s8492_s21 }
   0xe   : > { %p9466_p3 = scmp.eq.s32.totalorder %s8596_s27, 0  ;;  %p195_p4 = scmp.eq.s32.totalorder %s8596_s27, 1 }
   0xf   : > { %p8607_p5 = por %p138_p1, %p137_p0  ;;  %p201_p6 = scmp.eq.s32.totalorder %s6762_s28, 1 }
  0x10   : > { %p8613_p7 = por %p9466_p3, %p143_p2  ;;  %p8617_p8 = por %p195_p4, %p137_p0 }
  0x11   : > { %p8621_p9 = por %p201_p6, %p143_p2  ;;  %p6763_p10 = scmp.ge.s32.totalorder %s8512_s26, 1 }
  0x12   : > { %s9478_s7 = scalar_select %p8613_p7, 1, 0 }
  0x13   : > { %s9479_s8 = scalar_select %p8617_p8, 1, 0 }
  0x14   : > { %s9480_s9 = scalar_select %p8621_p9, 1, 0 }
  0x15   : > { %p208_p11 = scmp.lt.s32.totalorder %s8512_s26, 3  ;;  %s8514_s11 = smov [#allocation2]  }
  0x16   : > { %9481 = sst [smem:[#allocation19_spill]] %s9480_s9  ;;  %s224_s12 = sshll.u32 %s8514_s11, 4  ;;  %s225_s12 = int_to_ptr.vmem [resolvable:$true] %s224_s12 }
  0x17   : > { %p8627_p12 = pnand %p6763_p10, %p208_p11  ;;  %p7609_p1 = scmp.lt.s32.totalorder %s8512_s26, 2 }
  0x18   : > { %s8515_s14 = smov [#allocation5]   ;;  %s8271_s17 = scalar_lea.vmem %s225_s12, 3072 }
  0x19   : > { %p7581_p13 = pneg %p8627_p12  ;;  %s237_s15 = sshll.u32 %s8515_s14, 4  ;;  %s238_s15 = int_to_ptr.vmem [resolvable:$true] %s237_s15 }
  0x1a   : > { %p8643_p2 = pnand %p7609_p1, %p8607_p5  ;;  %p8272_p10 = scmp.ne.s32.totalorder %s225_s12, %s8271_s17 }
  0x1b   : > { %p8637_p4 = pnand %p7581_p13, %p9466_p3  ;;  %p8279_p0 = scmp.lt.s32.totalorder %s225_s12, %s225_s12 }
  0x1c   : > { %p8280_p3 = scmp.lt.s32.totalorder %s8271_s17, %s8271_s17 }
  0x1d   : > { %p8262_p6 = pneg %p8637_p4 }
  0x1e   : > { %p8281_p9 = por %p8280_p3, %p8279_p0 }
  0x1f   : > { %p8274_p11 = pnand %p8272_p10, %p8262_p6 }
  0x21   : > { %p8275_p13 = pneg %p8274_p11 }
  0x23   : > { %p8282_p8 = pnand %p8281_p9, %p8275_p13 }
  0x25   : > { %8285 = shalt.err (!%p8282_p8)
}
  0x26   : > { %s8516_s18 = smov 1536   ;;  %s8517_s19 = smov 96  }
  0x27   : > { %s9485_s0 = sld [smem:[#allocation20_spill]]  ;;  %s8297_s30 = scalar_lea.vmem %s238_s15, 49152 }
  0x28   : > { %p8298_p5 = scmp.ne.s32.totalorder %s238_s15, %s8297_s30  ;;  %p8305_p11 = scmp.lt.s32.totalorder %s238_s15, %s238_s15 }
  0x29   : > { %p8306_p7 = scmp.lt.s32.totalorder %s8297_s30, %s8297_s30 }
  0x2a   : > { %p8300_p1 = pnand %p8298_p5, %p8262_p6 }
  0x2b   : > { %p8307_p3 = por %p8306_p7, %p8305_p11 }
  0x2c   : > { %p8301_p10 = pneg %p8300_p1 }
  0x2d   : > { %7584 = dma.hbm_to_vmem [thread:$0]  (!%p8637_p4), %s9485_s0, 3072, %s225_s12, [#allocation3], %s8516_s18, %s8516_s18, %s8517_s19  }
  0x2e   : > { %p8308_p9 = pnand %p8307_p3, %p8301_p10 }
  0x30   : > { %8311 = shalt.err (!%p8308_p9)
}
  0x31   : > { %s9471_s11 = smov 512   ;;  %s8519_s12 = smov 32  }
  0x32   : > { %s9486_s1 = sld [smem:[#allocation21_spill]]  ;;  %s31_s18 = sadd.s32 1, %s8508_s25 }
  0x33   : > { %s275_s19 = sand.u32 1, %s8512_s26   ;;  %p32_p7 = scmp.ge.s32.totalorder %s31_s18, 2 }
  0x34   : > { %s9472_s20 = sand.u32 1, %s8500_s23   ;;  %s7556_s28 = sshll.u32 %s8508_s25, 8 }
  0x35   : > { %s9509_s18 = smov (%p32_p7, %s31_s18), 0  ;;  %s6769_s30 = sshll.u32 %s9472_s20, 10 }
  0x36   : > { %s9487_s4 = sld [smem:[#allocation22_spill]]  ;;  %s127_s21 = ssub.s32 %s8508_s25, %s9509_s18 }
  0x37   : > { %p128_p8 = scmp.eq.s32.totalorder %s127_s21, 0  ;;  %s279_s14 = scalar_lea.vmem [#allocation10], %s6769_s30 }
  0x38   : > { %7587 = dma.hbm_to_vmem [thread:$0]  (!%p8637_p4), %s9486_s1, 49152, %s238_s15, [#allocation6], %s9471_s11, %s9471_s11, %s8519_s12  }
  0x39   : > { %s286_s15 = sshll.u32 %s279_s14, 4  ;;  %s9488_s12 = sadd.s32 1, %s8500_s23  ;;  %s287_s15 = int_to_ptr.vmem [resolvable:$true] %s286_s15 }
  0x3a   : > { %s8683_s17 = scalar_select %p128_p8, %s8500_s23, %s9488_s12  }
  0x3b   : > { %s8685_s11 = scalar_lea.sflag [#allocation3], %s275_s19  ;;  %p8314_p0 = pneg %p8643_p2 }
  0x3c   : > { %s285_s9 = scalar_lea.hbm %s9487_s4, %s7556_s28  ;;  %s8325_s1 = scalar_lea.vmem %s287_s15, 16384 }
  0x3d   : > { %p8326_p13 = scmp.ne.s32.totalorder %s287_s15, %s8325_s1  ;;  %s8520_s0 = smov [#allocation10]  }
  0x3e   : > { %s8330_s29 = sshll.u32 %s8520_s0, 4  ;;  %s8331_s29 = int_to_ptr.vmem [resolvable:$false] %s8330_s29 }
  0x3f   : > { %p8328_p5 = pnand %p8326_p13, %p8314_p0  ;;  %s8332_s21 = scalar_lea.vmem %s8331_s29, 32768 }
  0x40   : > { %p8333_p10 = scmp.lt.s32.totalorder %s287_s15, %s8331_s29  ;;  %p8334_p11 = scmp.lt.s32.totalorder %s8332_s21, %s8325_s1 }
  0x41   : > { %p8329_p1 = pneg %p8328_p5 }
  0x42   : > { %p8335_p3 = por %p8334_p11, %p8333_p10 }
  0x44   : > { %p8336_p9 = pnand %p8335_p3, %p8329_p1 }
  0x46   : > { %8339 = shalt.err (!%p8336_p9)
}
  0x47   : > { %s8521_s28 = smov 256   ;;  %s8522_s19 = smov 16  }
  0x48   : > { %s9489_s30 = smov 512   ;;  %s8523_s14 = smov [#allocation7]  }
  0x49   : > { %7597 = dma.hbm_to_vmem [thread:$0]  (!%p8643_p2), %s285_s9, 16384, %s287_s15, %s8685_s11, %s9489_s30, %s8521_s28, %s8522_s19  }
  0x4a   : > { %s250_s12 = sshll.u32 %s8523_s14, 4  ;;  %s8524_s20 = smov [#allocation8]   ;;  %s251_s12 = int_to_ptr.vmem [resolvable:$true] %s250_s12 }
  0x4b   : > { %s264_s0 = sshll.u32 %s8524_s20, 4  ;;  %s8351_s4 = scalar_lea.vmem %s251_s12, 32768  ;;  %s265_s0 = int_to_ptr.vmem [resolvable:$true] %s264_s0 }
  0x4c   : > { %p8352_p7 = scmp.ne.s32.totalorder %s251_s12, %s8351_s4  ;;  %p8359_p5 = scmp.lt.s32.totalorder %s251_s12, %s251_s12 }
  0x4d   : > { %p8360_p1 = scmp.lt.s32.totalorder %s8351_s4, %s8351_s4 }
  0x4e   : > { %p8354_p8 = pnand %p8352_p7, %p8262_p6 }
  0x4f   : > { %p8361_p10 = por %p8360_p1, %p8359_p5 }
  0x50   : > { %p8355_p13 = pneg %p8354_p8 }
  0x52   : > { %p8362_p11 = pnand %p8361_p10, %p8355_p13 }
  0x54   : > { %8365 = shalt.err (!%p8362_p11)
}
  0x55   : > { %7590 = dma.hbm_to_vmem [thread:$0]  (!%p8637_p4), %s9461_s2, 32768, %s251_s12, [#allocation6], %s8521_s28, %s8521_s28, %s8522_s19  }
  0x56   : > { %s9490_s20 = sand.u32 1, %s8500_s23   ;;  %s8377_s29 = scalar_lea.vmem %s265_s0, 1024 }
  0x57   : > { %s6772_s15 = sshll.u32 %s9490_s20, 2  ;;  %p8378_p3 = scmp.ne.s32.totalorder %s265_s0, %s8377_s29 }
  0x58   : > { %p8385_p8 = scmp.lt.s32.totalorder %s265_s0, %s265_s0  ;;  %p8386_p13 = scmp.lt.s32.totalorder %s8377_s29, %s8377_s29 }
  0x59   : > { %p8380_p9 = pnand %p8378_p3, %p8262_p6 }
  0x5a   : > { %p8387_p5 = por %p8386_p13, %p8385_p8 }
  0x5b   : > { %p8381_p7 = pneg %p8380_p9 }
  0x5d   : > { %p8388_p1 = pnand %p8387_p5, %p8381_p7 }
  0x5f   : > { %8391 = shalt.err (!%p8388_p1)
}
  0x60   : > { %7593 = dma.hbm_to_vmem [thread:$0]  (!%p8637_p4), %s9462_s3, 1024, %s265_s0, [#allocation9]  }
  0x61   : > { %s7557_s28 = sshll.u32 %s8508_s25, 6  ;;  %s300_s12 = scalar_lea.vmem [#allocation11], %s6772_s15 }
  0x62   : > { %s306_s14 = scalar_lea.hbm %s9464_s5, %s7557_s28  ;;  %s308_s1 = sshll.u32 %s300_s12, 4  ;;  %s309_s1 = int_to_ptr.vmem [resolvable:$true] %s308_s1 }
  0x63   : > { %s8405_s9 = scalar_lea.vmem %s309_s1, 64  ;;  %s8525_s13 = smov [#allocation11]  }
  0x64   : > { %p8406_p6 = scmp.ne.s32.totalorder %s309_s1, %s8405_s9  ;;  %s8410_s20 = sshll.u32 %s8525_s13, 4  ;;  %s8411_s20 = int_to_ptr.vmem [resolvable:$false] %s8410_s20 }
  0x65   : > { %s8412_s29 = scalar_lea.vmem %s8411_s20, 128  ;;  %p8413_p3 = scmp.lt.s32.totalorder %s309_s1, %s8411_s20 }
  0x66   : > { %p8408_p10 = pnand %p8406_p6, %p8314_p0  ;;  %p8414_p4 = scmp.lt.s32.totalorder %s8412_s29, %s8405_s9 }
  0x68   : > { %p8409_p11 = pneg %p8408_p10  ;;  %p8415_p9 = por %p8414_p4, %p8413_p3 }
  0x6a   : > { %p8416_p7 = pnand %p8415_p9, %p8409_p11 }
  0x6c   : > { %8419 = shalt.err (!%p8416_p7)
}
  0x6d   : > { %7600 = dma.hbm_to_vmem [thread:$0]  (!%p8643_p2), %s306_s14, 64, %s309_s1, %s8685_s11  }
  0x6e   : > { %317 = sbr.rel (%p8627_p12) target bundleno = 2047 (0x7ff), region = 44  ;;  %p9491_p8 = scmp.eq.s32.totalorder (!%p8627_p12), %s8596_s27, 0 }
  0x73   : > { %8471 = dma.done.wait (%p9491_p8), [#allocation3], 3072   ;;  %p9492_p0 = pmov %p9491_p8 }
  0x75   : > { %8473 = vsyncadd (%p9492_p0), [#allocation3], 4294964224  ;;  %p9493_p13 = pmov %p9492_p0 }
  0x76   : > { %p9494_p5 = pmov %p9492_p0 }
  0x77   : > { %8475 = dma.done.wait (%p9493_p13), [#allocation6], 81920  }
  0x78   : > { %8477 = vsyncadd (%p9494_p5), [#allocation6], 4294885376  ;;  %p9495_p1 = pmov %p9492_p0 }
  0x79   : > { %p9496_p2 = pmov %p9492_p0 }
  0x7a   : > { %8479 = dma.done.wait (%p9495_p1), [#allocation9], 1024  }
  0x7b   : > { %8481 = vsyncadd (%p9496_p2), [#allocation9], 4294966272  ;;  %s335_s10 = sand.u32 1, %s8596_s27   ;;  %s8740_s16 = sand.u32 1, %s8496_s22  }
  0x7c   : > { %s6780_s11 = sshll.u32 %s8740_s16, 10  ;;  %s336_s0 = scalar_lea.sflag [#allocation3], %s335_s10 }
  0x7d   : > { %s8743_s15 = scalar_lea.vmem [#allocation10], %s6780_s11  ;;  %p9497_p12 = scmp.ne.s32.totalorder %s9478_s7, 0 }
  0x7f   : > { %8483 = dma.done.wait (%p9497_p12), %s336_s0, 16448  }
  0x80   : > { %8485 = vsyncadd (%p9497_p12), %s336_s0, 4294950848  ;;  %v586_v0 = vld [vmem:[#allocation5 + $0x1c0] sm:$0xff]  ;;  %v8771_v59 = vld [vmem:[#allocation2 + $0x18] sm:$0xff]  ;;  %s6781_s27 = sshll.u32 %s8740_s16, 2  ;;  %s6782_s4 = sshll.u32 %s8740_s16, 6 }
  0x81   : > { %v590_v1 = vld [vmem:[#allocation5 + $0x1e0] sm:$0xff]  ;;  %v8777_v62 = vld [vmem:[#allocation2 + $0x30] sm:$0xff]  ;;  %v8779_v63 = vld [vmem:[#allocation2 + $0x48] sm:$0xff]  ;;  %s348_s7 = scalar_lea.vmem [#allocation11], %s6781_s27  ;;  %s9392_s21 = scalar_lea.vmem [#allocation12], %s6782_s4 }
  0x82   : > { %v714_v2 = vld [vmem:[#allocation5 + $0x5c0] sm:$0xff]  ;;  %v6840_v3 = vcombine.high %v586_v0, %v590_v1  ;;  %v6839_v5 = vcombine.low %v586_v0, %v590_v1  ;;  %s6617_s28 = sshll.u32 %s9392_s21, 4  ;;  %s7558_s19 = sshll.u32 %s8504_s24, 9  ;;  %s9403_s28 = int_to_ptr.vmem [resolvable:$true] %s6617_s28 }
  0x83   : > { %v718_v4 = vld [vmem:[#allocation5 + $0x5e0] sm:$0xff]  ;;  %s9409_s12 = scalar_lea.hbm %s9465_s6, %s7558_s19  ;;  %s6601_s1 = scalar_lea.sflag [#allocation4], %s8740_s16 }
  0x84   : > { %v578_v6 = vld [vmem:[#allocation5 + $0x180] sm:$0xff]  ;;  %v6968_v8 = vcombine.high %v714_v2, %v718_v4  ;;  %v6967_v9 = vcombine.low %v714_v2, %v718_v4  ;;  %2875 = vmatprep.subr.bf16.mxu0 %v6840_v3  ;;  %v424_v2 = vunpack.c.h.bf16 %v8771_v59  ;;  %s8420_s24 = scalar_lea.vmem %s9403_s28, 1024  ;;  %p9498_p10 = scmp.ne.s32.totalorder %s9479_s8, 0 }
  0x85   : > { %v582_v7 = vld [vmem:[#allocation5 + $0x1a0] sm:$0xff]  ;;  %2876 = vmatpush1.bf16.msra.mxu0 %v6839_v5  ;;  %v8789_v5 = vld [vmem:[#allocation2 + $0x78] sm:$0xff]  ;;  %p8421_p6 = scmp.ne.s32.totalorder %s9403_s28, %s8420_s24  ;;  %s8526_s9 = smov [#allocation12]  }
  0x86   : > { %v6832_v10 = vcombine.high %v578_v6, %v582_v7  ;;  %v706_v11 = vld [vmem:[#allocation5 + $0x580] sm:$0xff]  ;;  %2918 = vmatprep.subr.bf16.mxu1 %v6968_v8  ;;  %v6831_v18 = vcombine.low %v578_v6, %v582_v7  ;;  %v8791_v6 = vld [vmem:[#allocation2 + $0x90] sm:$0xff]  ;;  %v8793_v7 = vld [vmem:[#allocation2 + $0xa8] sm:$0xff]  ;;  %s8424_s13 = sshll.u32 %s8526_s9, 4  ;;  %s8425_s13 = int_to_ptr.vmem [resolvable:$false] %s8424_s13 }
  0x87   : > { %v710_v12 = vld [vmem:[#allocation5 + $0x5a0] sm:$0xff]  ;;  %2919 = vmatpush1.bf16.msra.mxu1 %v6967_v9  ;;  %v448_v9 = vunpack.c.h.bf16 %v8777_v62  ;;  %p8422_p11 = pnand %p8421_p6, %p9498_p10  ;;  %s8426_s20 = scalar_lea.vmem %s8425_s13, 2048 }
  0x88   : > { %v570_v13 = vld [vmem:[#allocation5 + $0x140] sm:$0xff]  ;;  %v6960_v14 = vcombine.high %v706_v11, %v710_v12  ;;  %2877 = vmatprep.subr.bf16.mxu0 %v6832_v10  ;;  %v6959_v19 = vcombine.low %v706_v11, %v710_v12  ;;  %v430_v11 = vunpack.c.h.bf16 %v8789_v5  ;;  %p8427_p4 = scmp.lt.s32.totalorder %s9403_s28, %s8425_s13  ;;  %p8428_p9 = scmp.lt.s32.totalorder %s8426_s20, %s8420_s24 }
  0x89   : > { %v574_v15 = vld [vmem:[#allocation5 + $0x160] sm:$0xff]  ;;  %2878 = vmatpush1.bf16.msra.mxu0 %v6831_v18  ;;  %v478_v18 = vunpack.c.h.bf16 %v8793_v7  ;;  %p8423_p3 = pneg %p8422_p11 }
  0x8a   : > { %v698_v16 = vld [vmem:[#allocation5 + $0x540] sm:$0xff]  ;;  %v6824_v20 = vcombine.high %v570_v13, %v574_v15  ;;  %2920 = vmatprep.subr.bf16.mxu1 %v6960_v14  ;;  %v6823_v26 = vcombine.low %v570_v13, %v574_v15  ;;  %v454_v13 = vunpack.c.h.bf16 %v8791_v6  ;;  %v472_v14 = vunpack.c.h.bf16 %v8779_v63  ;;  %v8802_v15 = vld [vmem:[#allocation2 + $0x8] sm:$0xff]  ;;  %p8429_p7 = por %p8428_p9, %p8427_p4 }
  0x8b   : > { %v702_v17 = vld [vmem:[#allocation5 + $0x560] sm:$0xff]  ;;  %2921 = vmatpush1.bf16.msra.mxu1 %v6959_v19  ;;  %v8809_v19 = vld [vmem:[#allocation2 + $0x50] sm:$0xff] }
  0x8c   : > { %v6952_v21 = vcombine.high %v698_v16, %v702_v17  ;;  %v562_v22 = vld [vmem:[#allocation5 + $0x100] sm:$0xff]  ;;  %2879 = vmatprep.subr.bf16.mxu0 %v6824_v20  ;;  %v6951_v27 = vcombine.low %v698_v16, %v702_v17  ;;  %v8806_v17 = vld [vmem:[#allocation2 + $0x38] sm:$0xff]  ;;  %v8811_v20 = vld [vmem:[#allocation2 + $0x68] sm:$0xff]  ;;  %p8430_p8 = pnand %p8429_p7, %p8423_p3 }
  0x8d   : > { %v566_v23 = vld [vmem:[#allocation5 + $0x120] sm:$0xff]  ;;  %2880 = vmatpush1.bf16.msra.mxu0 %v6823_v26 }
  0x8e   : > { %v690_v24 = vld [vmem:[#allocation5 + $0x500] sm:$0xff]  ;;  %v6816_v28 = vcombine.high %v562_v22, %v566_v23  ;;  %2922 = vmatprep.subr.bf16.mxu1 %v6952_v21  ;;  %v6815_v34 = vcombine.low %v562_v22, %v566_v23  ;;  %v414_v22 = vunpack.c.h.bf16 %v8802_v15 }
  0x8f   : > { %v694_v25 = vld [vmem:[#allocation5 + $0x520] sm:$0xff]  ;;  %2923 = vmatpush1.bf16.msra.mxu1 %v6951_v27 }
  0x90   : > { %v6944_v29 = vcombine.high %v690_v24, %v694_v25  ;;  %v554_v30 = vld [vmem:[#allocation5 + $0xc0] sm:$0xff]  ;;  %2881 = vmatprep.subr.bf16.mxu0 %v6816_v28  ;;  %v6943_v35 = vcombine.low %v690_v24, %v694_v25  ;;  %v450_v24 = vunpack.c.h.bf16 %v8806_v17  ;;  %v8818_v28 = vld [vmem:[#allocation2 + $0x98] sm:$0xff] }
  0x91   : > { %v558_v31 = vld [vmem:[#allocation5 + $0xe0] sm:$0xff]  ;;  %2882 = vmatpush1.bf16.msra.mxu0 %v6815_v34 }
  0x92   : > { %v682_v32 = vld [vmem:[#allocation5 + $0x4c0] sm:$0xff]  ;;  %v6808_v36 = vcombine.high %v554_v30, %v558_v31  ;;  %2924 = vmatprep.subr.bf16.mxu1 %v6944_v29  ;;  %v6807_v42 = vcombine.low %v554_v30, %v558_v31  ;;  %v8820_v29 = vld [vmem:[#allocation2 + $0xb0] sm:$0xff]  ;;  %v420_v30 = vunpack.c.h.bf16 %v8811_v20 }
  0x93   : > { %v686_v33 = vld [vmem:[#allocation5 + $0x4e0] sm:$0xff]  ;;  %2925 = vmatpush1.bf16.msra.mxu1 %v6943_v35 }
  0x94   : > { %v6936_v37 = vcombine.high %v682_v32, %v686_v33  ;;  %v546_v38 = vld [vmem:[#allocation5 + $0x80] sm:$0xff]  ;;  %2883 = vmatprep.subr.bf16.mxu0 %v6808_v36  ;;  %v6935_v43 = vcombine.low %v682_v32, %v686_v33  ;;  %v456_v36 = vunpack.c.h.bf16 %v8818_v28 }
  0x95   : > { %v550_v39 = vld [vmem:[#allocation5 + $0xa0] sm:$0xff]  ;;  %2884 = vmatpush1.bf16.msra.mxu0 %v6807_v42 }
  0x96   : > { %v674_v40 = vld [vmem:[#allocation5 + $0x480] sm:$0xff]  ;;  %v6800_v44 = vcombine.high %v546_v38, %v550_v39  ;;  %2926 = vmatprep.subr.bf16.mxu1 %v6936_v37  ;;  %v6799_v51 = vcombine.low %v546_v38, %v550_v39  ;;  %v474_v37 = vunpack.c.h.bf16 %v8809_v19 }
  0x97   : > { %v678_v41 = vld [vmem:[#allocation5 + $0x4a0] sm:$0xff]  ;;  %2927 = vmatpush1.bf16.msra.mxu1 %v6935_v43 }
  0x98   : > { %v6928_v45 = vcombine.high %v674_v40, %v678_v41  ;;  %v8749_v46 = vld [vmem:[#allocation5 + $0x40] sm:$0xff]  ;;  %2885 = vmatprep.subr.bf16.mxu0 %v6800_v44  ;;  %v6927_v55 = vcombine.low %v674_v40, %v678_v41  ;;  %v480_v41 = vunpack.c.h.bf16 %v8820_v29 }
  0x99   : > { %v8751_v47 = vld [vmem:[#allocation5 + $0x60] sm:$0xff]  ;;  %2886 = vmatpush1.bf16.msra.mxu0 %v6799_v51 }
  0x9a   : > { %v8753_v48 = vld [vmem:[#allocation5 + $0x440] sm:$0xff]  ;;  %v6792_v56 = vcombine.high %v8749_v46, %v8751_v47  ;;  %v6791_v57 = vcombine.low %v8749_v46, %v8751_v47  ;;  %2928 = vmatprep.subr.bf16.mxu1 %v6928_v45 }
  0x9b   : > { %v8755_v49 = vld [vmem:[#allocation5 + $0x460] sm:$0xff]  ;;  %2929 = vmatpush1.bf16.msra.mxu1 %v6927_v55 }
  0x9c   : > { %v8757_v50 = vld [vmem:[#allocation5] sm:$0xff]  ;;  %v6920_v60 = vcombine.high %v8753_v48, %v8755_v49  ;;  %v6919_v61 = vcombine.low %v8753_v48, %v8755_v49  ;;  %2887 = vmatprep.subr.bf16.mxu0 %v6792_v56 }
  0x9d   : > { %v8759_v52 = vld [vmem:[#allocation5 + $0x20] sm:$0xff]  ;;  %2888 = vmatpush1.bf16.msra.mxu0 %v6791_v57 }
  0x9e   : > { %v8761_v53 = vld [vmem:[#allocation5 + $0x400] sm:$0xff]  ;;  %v6784_v3 = vcombine.high %v8757_v50, %v8759_v52  ;;  %2930 = vmatprep.subr.bf16.mxu1 %v6920_v60  ;;  %v6783_v32 = vcombine.low %v8757_v50, %v8759_v52 }
  0x9f   : > { %v8763_v54 = vld [vmem:[#allocation5 + $0x420] sm:$0xff]  ;;  %2931 = vmatpush1.bf16.msra.mxu1 %v6919_v61 }
  0xa0   : > { %v8769_v58 = vld [vmem:[#allocation2] sm:$0xff]  ;;  %v6912_v4 = vcombine.high %v8761_v53, %v8763_v54  ;;  %2889 = vmatprep.subr.bf16.mxu0 %v6784_v3  ;;  %v6911_v42 = vcombine.low %v8761_v53, %v8763_v54 }
  0xa1   : > { %v8781_v0 = vld [vmem:[#allocation2 + $0x60] sm:$0xff]  ;;  %v412_v1 = vunpack.c.h.bf16 %v8769_v58  ;;  %2890 = vmatpush1.bf16.msra.mxu0 %v6783_v32 }
  0xa2   : > { %v418_v8 = vunpack.c.h.bf16 %v8781_v0  ;;  %v8797_v10 = vld [vmem:[#allocation5 + $0x3c0] sm:$0xff]  ;;  %2932 = vmatprep.subr.bf16.mxu1 %v6912_v4 }
  0xa3   : > { %v436_v12 = vadd.f32 %v424_v2, %v412_v1  ;;  %v8804_v16 = vld [vmem:[#allocation2 + $0x20] sm:$0xff]  ;;  %2933 = vmatpush1.bf16.msra.mxu1 %v6911_v42  ;;  %v419_v42 = vunpack.c.l.bf16 %v8811_v20  ;;  %v453_v20 = vunpack.c.l.bf16 %v8791_v6 }
  0xa4   : > { %v8813_v21 = vld [vmem:[#allocation2 + $0x80] sm:$0xff]  ;;  %v426_v23 = vunpack.c.h.bf16 %v8804_v16  ;;  %v442_v26 = vadd.f32 %v430_v11, %v418_v8 }
  0xa5   : > { %v654_v25 = vld [vmem:[#allocation5 + $0x3e0] sm:$0xff]  ;;  %v460_v27 = vadd.f32 %v448_v9, %v436_v12  ;;  %v432_v31 = vunpack.c.h.bf16 %v8813_v21 }
  0xa6   : > { %v778_v33 = vld [vmem:[#allocation5 + $0x7c0] sm:$0xff]  ;;  %v438_v35 = vadd.f32 %v426_v23, %v414_v22  ;;  %v466_v38 = vadd.f32 %v454_v13, %v442_v26  ;;  %v6904_v43 = vcombine.high %v8797_v10, %v654_v25  ;;  %v6903_v56 = vcombine.low %v8797_v10, %v654_v25 }
  0xa7   : > { %v782_v34 = vld [vmem:[#allocation5 + $0x7e0] sm:$0xff]  ;;  %v484_v39 = vadd.f32 %v472_v14, %v460_v27  ;;  %v444_v40 = vadd.f32 %v432_v31, %v420_v30 }
  0xa8   : > { %v462_v44 = vadd.f32 %v450_v24, %v438_v35  ;;  %v7032_v45 = vcombine.high %v778_v33, %v782_v34  ;;  %v642_v46 = vld [vmem:[#allocation5 + $0x380] sm:$0xff]  ;;  %v490_v48 = vadd.f32 %v478_v18, %v466_v38  ;;  %2891 = vmatprep.subr.bf16.mxu0 %v6904_v43  ;;  %v7031_v53 = vcombine.low %v778_v33, %v782_v34 }
  0xa9   : > { %v646_v47 = vld [vmem:[#allocation5 + $0x3a0] sm:$0xff]  ;;  %v496_v49 = vmul.f32 0.25, %v484_v39  ;;  %v468_v50 = vadd.f32 %v456_v36, %v444_v40  ;;  %2892 = vmatpush2.bf16.msra.mxu0 %v6903_v56  ;;  %v417_v38 = vunpack.c.l.bf16 %v8781_v0  ;;  %v423_v39 = vunpack.c.l.bf16 %v8771_v59 }
  0xaa   : > { %v770_v51 = vld [vmem:[#allocation5 + $0x780] sm:$0xff]  ;;  %v486_v55 = vadd.f32 %v474_v37, %v462_v44  ;;  %v502_v57 = vmul.f32 0.25, %v490_v48  ;;  %v6896_v54 = vcombine.high %v642_v46, %v646_v47  ;;  %2934 = vmatprep.subr.bf16.mxu1 %v7032_v45  ;;  %v6895_v12 = vcombine.low %v642_v46, %v646_v47 }
  0xab   : > { %v774_v52 = vld [vmem:[#allocation5 + $0x7a0] sm:$0xff]  ;;  %v492_v60 = vadd.f32 %v480_v41, %v468_v50  ;;  %2935 = vmatpush2.bf16.msra.mxu1 %v7031_v53  ;;  %v411_v37 = vunpack.c.l.bf16 %v8769_v58  ;;  %v429_v40 = vunpack.c.l.bf16 %v8789_v5  ;;  %v413_v41 = vunpack.c.l.bf16 %v8802_v15 }
  0xac   : > { %v498_v61 = vmul.f32 0.25, %v486_v55  ;;  %v7024_v1 = vcombine.high %v770_v51, %v774_v52  ;;  %v634_v2 = vld [vmem:[#allocation5 + $0x340] sm:$0xff]  ;;  %v8833_v4 = vpack.c.bf16 %v502_v57, %v496_v49  ;;  %2893 = vmatprep.subr.bf16.mxu0 %v6896_v54  ;;  %v7023_v13 = vcombine.low %v770_v51, %v774_v52 }
  0xad   : > { %v638_v3 = vld [vmem:[#allocation5 + $0x360] sm:$0xff]  ;;  %v504_v8 = vmul.f32 0.25, %v492_v60  ;;  %2894 = vmatpush2.bf16.msra.mxu0 %v6895_v12  ;;  %v425_v43 = vunpack.c.l.bf16 %v8804_v16  ;;  %v431_v44 = vunpack.c.l.bf16 %v8813_v21  ;;  %v435_v49 = vadd.f32 %v423_v39, %v411_v37 }
  0xae   : > { %v762_v9 = vld [vmem:[#allocation5 + $0x740] sm:$0xff]  ;;  %2907 = vmatprep.mubr.bf16.mxu0 %v8833_v4  ;;  %v6888_v14 = vcombine.high %v634_v2, %v638_v3  ;;  %2936 = vmatprep.subr.bf16.mxu1 %v7024_v1  ;;  %v6887_v26 = vcombine.low %v634_v2, %v638_v3  ;;  %v441_v50 = vadd.f32 %v429_v40, %v417_v38  ;;  %v447_v15 = vunpack.c.l.bf16 %v8777_v62  ;;  %v8855_v3 = vld [vmem:[#allocation2 + $0x10] sm:$0xff] }
  0xaf   : > { %v766_v11 = vld [vmem:[#allocation5 + $0x760] sm:$0xff]  ;;  %v8836_v10 = vpack.c.bf16 %v504_v8, %v498_v61  ;;  %2937 = vmatpush2.bf16.msra.mxu1 %v7023_v13  ;;  %v437_v16 = vadd.f32 %v425_v43, %v413_v41  ;;  %v443_v21 = vadd.f32 %v431_v44, %v419_v42  ;;  %v449_v51 = vunpack.c.l.bf16 %v8806_v17 }
  0xb0   : > { %v7016_v18 = vcombine.high %v762_v9, %v766_v11  ;;  %v626_v22 = vld [vmem:[#allocation5 + $0x300] sm:$0xff]  ;;  %2895 = vmatprep.subr.bf16.mxu0 %v6888_v14  ;;  %v7015_v27 = vcombine.low %v762_v9, %v766_v11  ;;  %v455_v52 = vunpack.c.l.bf16 %v8818_v28  ;;  %v459_v6 = vadd.f32 %v447_v15, %v435_v49  ;;  %v8857_v28 = vld [vmem:[#allocation2 + $0x70] sm:$0xff]  ;;  %v587_v49 = vld [vmem:[#allocation5 + $0x1c8] sm:$0xff] }
  0xb1   : > { %v630_v23 = vld [vmem:[#allocation5 + $0x320] sm:$0xff]  ;;  %2950 = vmatprep.mubr.bf16.mxu1 %v8836_v10  ;;  %2896 = vmatpush2.bf16.msra.mxu0 %v6887_v26  ;;  %v465_v1 = vadd.f32 %v453_v20, %v441_v50  ;;  %v471_v2 = vunpack.c.l.bf16 %v8779_v63  ;;  %v477_v17 = vunpack.c.l.bf16 %v8793_v7  ;;  %v461_v11 = vadd.f32 %v449_v51, %v437_v16  ;;  %v591_v50 = vld [vmem:[#allocation5 + $0x1e8] sm:$0xff] }
  0xb2   : > { %v754_v24 = vld [vmem:[#allocation5 + $0x700] sm:$0xff]  ;;  %v6880_v30 = vcombine.high %v626_v22, %v630_v23  ;;  %2938 = vmatprep.subr.bf16.mxu1 %v7016_v18  ;;  %v6879_v32 = vcombine.low %v626_v22, %v630_v23  ;;  %v467_v12 = vadd.f32 %v455_v52, %v443_v21  ;;  %v473_v13 = vunpack.c.l.bf16 %v8809_v19  ;;  %v8865_v22 = vld [vmem:[#allocation2 + $0x28] sm:$0xff] }
  0xb3   : > { %v758_v25 = vld [vmem:[#allocation5 + $0x720] sm:$0xff]  ;;  %2939 = vmatpush2.bf16.msra.mxu1 %v7015_v27  ;;  %v479_v14 = vunpack.c.l.bf16 %v8820_v29  ;;  %v8867_v23 = vld [vmem:[#allocation2 + $0x88] sm:$0xff]  ;;  %v416_v19 = vunpack.c.h.bf16 %v8855_v3  ;;  %v422_v29 = vunpack.c.h.bf16 %v8857_v28  ;;  %v428_v38 = vunpack.c.h.bf16 %v8865_v22 }
  0xb4   : > { %v7008_v31 = vcombine.high %v754_v24, %v758_v25  ;;  %v618_v33 = vld [vmem:[#allocation5 + $0x2c0] sm:$0xff]  ;;  %2897 = vmatprep.subr.bf16.mxu0 %v6880_v30  ;;  %v7007_v45 = vcombine.low %v754_v24, %v758_v25  ;;  %v434_v39 = vunpack.c.h.bf16 %v8867_v23 }
  0xb5   : > { %v622_v34 = vld [vmem:[#allocation5 + $0x2e0] sm:$0xff]  ;;  %2898 = vmatpush2.bf16.msra.mxu0 %v6879_v32  ;;  %v483_v32 = vadd.f32 %v471_v2, %v459_v6  ;;  %v491_v37 = vadd.f32 %v479_v14, %v467_v12 }
  0xb6   : > { %v746_v35 = vld [vmem:[#allocation5 + $0x6c0] sm:$0xff]  ;;  %v6872_v46 = vcombine.high %v618_v33, %v622_v34  ;;  %2940 = vmatprep.subr.bf16.mxu1 %v7008_v31  ;;  %v6871_v0 = vcombine.low %v618_v33, %v622_v34  ;;  %v489_v33 = vadd.f32 %v477_v17, %v465_v1  ;;  %v8877_v34 = vld [vmem:[#allocation2 + $0x58] sm:$0xff] }
  0xb7   : > { %v750_v36 = vld [vmem:[#allocation5 + $0x6e0] sm:$0xff]  ;;  %2941 = vmatpush2.bf16.msra.mxu1 %v7007_v45  ;;  %v503_v20 = vmul.f32 0.25, %v491_v37 }
  0xb8   : > { %v7000_v58 = vcombine.high %v746_v35, %v750_v36  ;;  %v610_v47 = vld [vmem:[#allocation5 + $0x280] sm:$0xff]  ;;  %2899 = vmatprep.subr.bf16.mxu0 %v6872_v46  ;;  %v6999_v55 = vcombine.low %v746_v35, %v750_v36  ;;  %v8879_v35 = vld [vmem:[#allocation2 + $0xb8] sm:$0xff]  ;;  %v485_v36 = vadd.f32 %v473_v13, %v461_v11  ;;  %v440_v46 = vadd.f32 %v428_v38, %v416_v19 }
  0xb9   : > { %v614_v59 = vld [vmem:[#allocation5 + $0x2a0] sm:$0xff]  ;;  %2900 = vmatpush2.bf16.msra.mxu0 %v6871_v0  ;;  %v476_v0 = vunpack.c.h.bf16 %v8877_v34 }
  0xba   : > { %v738_v48 = vld [vmem:[#allocation5 + $0x680] sm:$0xff]  ;;  %v6864_v56 = vcombine.high %v610_v47, %v614_v59  ;;  %2942 = vmatprep.subr.bf16.mxu1 %v7000_v58  ;;  %v6863_v60 = vcombine.low %v610_v47, %v614_v59  ;;  %v446_v58 = vadd.f32 %v434_v39, %v422_v29  ;;  %v482_v47 = vunpack.c.h.bf16 %v8879_v35 }
  0xbb   : > { %v742_v5 = vld [vmem:[#allocation5 + $0x6a0] sm:$0xff]  ;;  %2943 = vmatpush2.bf16.msra.mxu1 %v6999_v55  ;;  %v497_v15 = vmul.f32 0.25, %v485_v36  ;;  %v6842_v55 = vcombine.high %v587_v49, %v591_v50 }
  0xbc   : > { %v6992_v57 = vcombine.high %v738_v48, %v742_v5  ;;  %v602_v53 = vld [vmem:[#allocation5 + $0x240] sm:$0xff]  ;;  %2901 = vmatprep.subr.bf16.mxu0 %v6864_v56  ;;  %v6991_v63 = vcombine.low %v738_v48, %v742_v5  ;;  %v495_v48 = vmul.f32 0.25, %v483_v32  ;;  %v501_v5 = vmul.f32 0.25, %v489_v33  ;;  %v567_v32 = vld [vmem:[#allocation5 + $0x128] sm:$0xff] }
  0xbd   : > { %v606_v54 = vld [vmem:[#allocation5 + $0x260] sm:$0xff]  ;;  %2902 = vmatpush2.bf16.msra.mxu0 %v6863_v60  ;;  %v8893_v6 = vpack.c.bf16 %v503_v20, %v497_v15  ;;  %v539_v20 = vld [vmem:[#allocation5 + $0x48] sm:$0xff] }
  0xbe   : > { %v8851_v61 = vld [vmem:[#allocation5 + $0x640] sm:$0xff]  ;;  %v6856_v18 = vcombine.high %v602_v53, %v606_v54  ;;  %2944 = vmatprep.subr.bf16.mxu1 %v6992_v57  ;;  %v6855_v30 = vcombine.low %v602_v53, %v606_v54  ;;  %v8891_v54 = vpack.c.bf16 %v501_v5, %v495_v48 }
  0xbf   : > { %v734_v62 = vld [vmem:[#allocation5 + $0x660] sm:$0xff]  ;;  %2945 = vmatpush2.bf16.msra.mxu1 %v6991_v63  ;;  %v571_v63 = vld [vmem:[#allocation5 + $0x148] sm:$0xff] }
  0xc0   : > { %v8859_v8 = vld [vmem:[#allocation5 + $0x200] sm:$0xff]  ;;  %v6984_v24 = vcombine.high %v8851_v61, %v734_v62  ;;  %v6983_v31 = vcombine.low %v8851_v61, %v734_v62  ;;  %2903 = vmatprep.subr.bf16.mxu0 %v6856_v18  ;;  %v579_v61 = vld [vmem:[#allocation5 + $0x188] sm:$0xff] }
  0xc1   : > { %v8861_v9 = vld [vmem:[#allocation5 + $0x220] sm:$0xff]  ;;  %2904 = vmatpush2.bf16.msra.mxu0 %v6855_v30  ;;  %v583_v62 = vld [vmem:[#allocation5 + $0x1a8] sm:$0xff] }
  0xc2   : > { %v722_v7 = vld [vmem:[#allocation5 + $0x600] sm:$0xff]  ;;  %v6848_v40 = vcombine.high %v8859_v8, %v8861_v9  ;;  %2946 = vmatprep.subr.bf16.mxu1 %v6984_v24  ;;  %v6847_v59 = vcombine.low %v8859_v8, %v8861_v9  ;;  %v6841_v8 = vcombine.low %v587_v49, %v591_v50  ;;  %v6834_v11 = vcombine.high %v579_v61, %v583_v62  ;;  %v575_v18 = vld [vmem:[#allocation5 + $0x168] sm:$0xff] }
  0xc3   : > { %v726_v25 = vld [vmem:[#allocation5 + $0x620] sm:$0xff]  ;;  %2947 = vmatpush2.bf16.msra.mxu1 %v6983_v31  ;;  %v6833_v24 = vcombine.low %v579_v61, %v583_v62  ;;  %v6826_v19 = vcombine.high %v571_v63, %v575_v18  ;;  %v563_v31 = vld [vmem:[#allocation5 + $0x108] sm:$0xff]  ;;  %v6825_v36 = vcombine.low %v571_v63, %v575_v18 }
  0xc4   : > { %v8870_v26 = vld [vmem:[#allocation2 + $0x40] sm:$0xff]  ;;  %v6976_v41 = vcombine.high %v722_v7, %v726_v25  ;;  %2905 = vmatprep.subr.bf16.mxu0 %v6848_v40  ;;  %v6975_v51 = vcombine.low %v722_v7, %v726_v25  ;;  %v6818_v38 = vcombine.high %v563_v31, %v567_v32  ;;  %v535_v61 = vld [vmem:[#allocation5 + $0x28] sm:$0xff] }
  0xc5   : > { %v8872_v27 = vld [vmem:[#allocation2 + $0xa0] sm:$0xff]  ;;  %v452_v42 = vunpack.c.h.bf16 %v8870_v26  ;;  %2906 = vmatpush2.bf16.msra.mxu0 %v6847_v59  ;;  %v551_v59 = vld [vmem:[#allocation5 + $0xa8] sm:$0xff] }
  0xc6   : > { %v458_v43 = vunpack.c.h.bf16 %v8872_v27  ;;  %v842_v44 = vld [vmem:[#allocation5 + $0x9c0] sm:$0xff]  ;;  %2948 = vmatprep.subr.bf16.mxu1 %v6976_v41  ;;  %v555_v41 = vld [vmem:[#allocation5 + $0xc8] sm:$0xff] }
  0xc7   : > { %v846_v45 = vld [vmem:[#allocation5 + $0x9e0] sm:$0xff]  ;;  %v464_v16 = vadd.f32 %v452_v42, %v440_v46  ;;  %2949 = vmatpush2.bf16.msra.mxu1 %v6975_v51  ;;  %v559_v42 = vld [vmem:[#allocation5 + $0xe8] sm:$0xff] }
  0xc8   : > { %v470_v21 = vadd.f32 %v458_v43, %v446_v58  ;;  %v7096_v52 = vcombine.high %v842_v44, %v846_v45  ;;  %v834_v56 = vld [vmem:[#allocation5 + $0x980] sm:$0xff]  ;;  %v7095_v1 = vcombine.low %v842_v44, %v846_v45  ;;  %3004 = vmatprep.subr.bf16.mxu1 %v6842_v55  ;;  %2908 = vmatmul.mubr.bf16.vlgmr.msra.gmra.mxu0 %v8891_v54 }
  0xc9   : > { %v838_v57 = vld [vmem:[#allocation5 + $0x9a0] sm:$0xff]  ;;  %v488_v60 = vadd.f32 %v476_v0, %v464_v16  ;;  %v6817_v44 = vcombine.low %v563_v31, %v567_v32  ;;  %v547_v0 = vld [vmem:[#allocation5 + $0x88] sm:$0xff]  ;;  %v6809_v5 = vcombine.low %v555_v41, %v559_v42 }
  0xca   : > { %v494_v53 = vadd.f32 %v482_v47, %v470_v21  ;;  %2961 = vmatprep.subr.bf16.mxu0 %v7096_v52  ;;  %v7088_v9 = vcombine.high %v834_v56, %v838_v57  ;;  %v826_v12 = vld [vmem:[#allocation5 + $0x940] sm:$0xff]  ;;  %2951 = vmatmul.mubr.bf16.vlgmr.msra.gmra.mxu1 %v8893_v6  ;;  %v7087_v7 = vcombine.low %v834_v56, %v838_v57  ;;  %v543_v21 = vld [vmem:[#allocation5 + $0x68] sm:$0xff] }
  0xcb   : > { %v500_v2 = vmul.f32 0.25, %v488_v60  ;;  %v830_v13 = vld [vmem:[#allocation5 + $0x960] sm:$0xff]  ;;  %2962 = vmatpush1.bf16.msra.mxu0 %v7095_v1  ;;  %3005 = vmatpush1.bf16.msra.mxu1 %v6841_v8  ;;  %v6810_v47 = vcombine.high %v555_v41, %v559_v42  ;;  %v6802_v16 = vcombine.high %v547_v0, %v551_v59  ;;  %v6801_v52 = vcombine.low %v547_v0, %v551_v59  ;;  %v531_v60 = vld [vmem:[#allocation5 + $0x8] sm:$0xff] }
  0xcc   : > { %v506_v17 = vmul.f32 0.25, %v494_v53  ;;  %2963 = vmatprep.subr.bf16.mxu0 %v7088_v9  ;;  %v7080_v25 = vcombine.high %v826_v12, %v830_v13  ;;  %3006 = vmatprep.subr.bf16.mxu1 %v6834_v11  ;;  %v818_v29 = vld [vmem:[#allocation5 + $0x900] sm:$0xff]  ;;  %v7079_v33 = vcombine.low %v826_v12, %v830_v13  ;;  %v6794_v53 = vcombine.high %v539_v20, %v543_v21  ;;  %v651_v9 = vld [vmem:[#allocation5 + $0x3c8] sm:$0xff] }
  0xcd   : > { %v822_v30 = vld [vmem:[#allocation5 + $0x920] sm:$0xff]  ;;  %3036 = vmatprep.mubr.bf16.mxu1 %v8833_v4  ;;  %v6793_v1 = vcombine.low %v539_v20, %v543_v21  ;;  %v6786_v11 = vcombine.high %v531_v60, %v535_v61  ;;  %v655_v12 = vld [vmem:[#allocation5 + $0x3e8] sm:$0xff]  ;;  %v6785_v63 = vcombine.low %v531_v60, %v535_v61  ;;  %v415_v20 = vunpack.c.l.bf16 %v8855_v3 }
  0xce   : > { %v8895_v14 = vpack.c.bf16 %v506_v17, %v500_v2  ;;  %v7072_v37 = vcombine.high %v818_v29, %v822_v30  ;;  %v810_v39 = vld [vmem:[#allocation5 + $0x8c0] sm:$0xff]  ;;  %v7071_v43 = vcombine.low %v818_v29, %v822_v30  ;;  %v647_v29 = vld [vmem:[#allocation5 + $0x3a8] sm:$0xff]  ;;  %v6905_v31 = vcombine.low %v651_v9, %v655_v12 }
  0xcf   : > { %2964 = vmatpush1.bf16.msra.mxu0 %v7087_v7  ;;  %3007 = vmatpush1.bf16.msra.mxu1 %v6833_v24  ;;  %v814_v40 = vld [vmem:[#allocation5 + $0x8e0] sm:$0xff]  ;;  %v427_v21 = vunpack.c.l.bf16 %v8865_v22  ;;  %v457_v22 = vunpack.c.l.bf16 %v8872_v27 }
  0xd0   : > { %2993 = vmatprep.mubr.bf16.mxu0 %v8895_v14  ;;  %2965 = vmatprep.subr.bf16.mxu0 %v7080_v25  ;;  %v7064_v45 = vcombine.high %v810_v39, %v814_v40  ;;  %v802_v46 = vld [vmem:[#allocation5 + $0x880] sm:$0xff]  ;;  %v7063_v48 = vcombine.low %v810_v39, %v814_v40  ;;  %v643_v25 = vld [vmem:[#allocation5 + $0x388] sm:$0xff] }
  0xd1   : > { %3008 = vmatprep.subr.bf16.mxu1 %v6826_v19  ;;  %v806_v58 = vld [vmem:[#allocation5 + $0x8a0] sm:$0xff]  ;;  %v6906_v19 = vcombine.high %v651_v9, %v655_v12  ;;  %v639_v39 = vld [vmem:[#allocation5 + $0x368] sm:$0xff]  ;;  %v6897_v41 = vcombine.low %v643_v25, %v647_v29 }
  0xd2   : > { %v7056_v49 = vcombine.high %v802_v46, %v806_v58  ;;  %v794_v50 = vld [vmem:[#allocation5 + $0x840] sm:$0xff]  ;;  %v7055_v51 = vcombine.low %v802_v46, %v806_v58  ;;  %v631_v58 = vld [vmem:[#allocation5 + $0x328] sm:$0xff] }
  0xd3   : > { %2966 = vmatpush1.bf16.msra.mxu0 %v7079_v33  ;;  %3009 = vmatpush1.bf16.msra.mxu1 %v6825_v36  ;;  %v798_v15 = vld [vmem:[#allocation5 + $0x860] sm:$0xff] }
  0xd4   : > { %2967 = vmatprep.subr.bf16.mxu0 %v7072_v37  ;;  %3010 = vmatprep.subr.bf16.mxu1 %v6818_v38  ;;  %v7048_v55 = vcombine.high %v794_v50, %v798_v15  ;;  %v786_v56 = vld [vmem:[#allocation5 + $0x800] sm:$0xff]  ;;  %v7047_v62 = vcombine.low %v794_v50, %v798_v15  ;;  %v635_v37 = vld [vmem:[#allocation5 + $0x348] sm:$0xff]  ;;  %v6898_v38 = vcombine.high %v643_v25, %v647_v29 }
  0xd5   : > { %v790_v57 = vld [vmem:[#allocation5 + $0x820] sm:$0xff]  ;;  %v6890_v46 = vcombine.high %v635_v37, %v639_v39  ;;  %v623_v15 = vld [vmem:[#allocation5 + $0x2e8] sm:$0xff] }
  0xd6   : > { %v7040_v2 = vcombine.high %v786_v56, %v790_v57  ;;  %v906_v17 = vld [vmem:[#allocation5 + $0xbc0] sm:$0xff]  ;;  %v7039_v13 = vcombine.low %v786_v56, %v790_v57 }
  0xd7   : > { %2968 = vmatpush1.bf16.msra.mxu0 %v7071_v43  ;;  %3011 = vmatpush1.bf16.msra.mxu1 %v6817_v44  ;;  %v910_v8 = vld [vmem:[#allocation5 + $0xbe0] sm:$0xff] }
  0xd8   : > { %2969 = vmatprep.subr.bf16.mxu0 %v7064_v45  ;;  %3012 = vmatprep.subr.bf16.mxu1 %v6810_v47  ;;  %v7160_v18 = vcombine.high %v906_v17, %v910_v8  ;;  %v898_v7 = vld [vmem:[#allocation5 + $0xb80] sm:$0xff]  ;;  %v7159_v30 = vcombine.low %v906_v17, %v910_v8  ;;  %v627_v45 = vld [vmem:[#allocation5 + $0x308] sm:$0xff]  ;;  %v6889_v47 = vcombine.low %v635_v37, %v639_v39 }
  0xd9   : > { %v902_v24 = vld [vmem:[#allocation5 + $0xba0] sm:$0xff]  ;;  %v6882_v50 = vcombine.high %v627_v45, %v631_v58  ;;  %v719_v39 = vld [vmem:[#allocation5 + $0x5e8] sm:$0xff] }
  0xda   : > { %v7152_v32 = vcombine.high %v898_v7, %v902_v24  ;;  %v890_v33 = vld [vmem:[#allocation5 + $0xb40] sm:$0xff]  ;;  %v7151_v40 = vcombine.low %v898_v7, %v902_v24  ;;  %v475_v7 = vunpack.c.l.bf16 %v8877_v34 }
  0xdb   : > { %2970 = vmatpush1.bf16.msra.mxu0 %v7063_v48  ;;  %3013 = vmatpush1.bf16.msra.mxu1 %v6809_v5  ;;  %v894_v36 = vld [vmem:[#allocation5 + $0xb60] sm:$0xff] }
  0xdc   : > { %2971 = vmatprep.subr.bf16.mxu0 %v7056_v49  ;;  %3014 = vmatprep.subr.bf16.mxu1 %v6802_v16  ;;  %v7144_v42 = vcombine.high %v890_v33, %v894_v36  ;;  %v882_v43 = vld [vmem:[#allocation5 + $0xb00] sm:$0xff]  ;;  %v7143_v0 = vcombine.low %v890_v33, %v894_v36  ;;  %v619_v49 = vld [vmem:[#allocation5 + $0x2c8] sm:$0xff]  ;;  %v421_v16 = vunpack.c.l.bf16 %v8857_v28  ;;  %v451_v28 = vunpack.c.l.bf16 %v8870_v26 }
  0xdd   : > { %v886_v44 = vld [vmem:[#allocation5 + $0xb20] sm:$0xff]  ;;  %v6874_v61 = vcombine.high %v619_v49, %v623_v15  ;;  %v481_v26 = vunpack.c.l.bf16 %v8879_v35 }
  0xde   : > { %v7136_v59 = vcombine.high %v882_v43, %v886_v44  ;;  %v874_v48 = vld [vmem:[#allocation5 + $0xac0] sm:$0xff] }
  0xdf   : > { %2972 = vmatpush1.bf16.msra.mxu0 %v7055_v51  ;;  %3015 = vmatpush1.bf16.msra.mxu1 %v6801_v52  ;;  %v878_v5 = vld [vmem:[#allocation5 + $0xae0] sm:$0xff]  ;;  %v433_v51 = vunpack.c.l.bf16 %v8867_v23  ;;  %v7135_v52 = vcombine.low %v882_v43, %v886_v44 }
  0xe0   : > { %2973 = vmatprep.subr.bf16.mxu0 %v7048_v55  ;;  %3016 = vmatprep.subr.bf16.mxu1 %v6794_v53  ;;  %v6881_v55 = vcombine.low %v627_v45, %v631_v58  ;;  %v7128_v56 = vcombine.high %v874_v48, %v878_v5  ;;  %v866_v57 = vld [vmem:[#allocation5 + $0xa80] sm:$0xff]  ;;  %v611_v53 = vld [vmem:[#allocation5 + $0x288] sm:$0xff]  ;;  %v7127_v23 = vcombine.low %v874_v48, %v878_v5 }
  0xe1   : > { %v870_v60 = vld [vmem:[#allocation5 + $0xaa0] sm:$0xff]  ;;  %v445_v3 = vadd.f32 %v433_v51, %v421_v16  ;;  %v839_v5 = vld [vmem:[#allocation5 + $0x9a8] sm:$0xff] }
  0xe2   : > { %v7120_v17 = vcombine.high %v866_v57, %v870_v60  ;;  %v858_v8 = vld [vmem:[#allocation5 + $0xa40] sm:$0xff]  ;;  %v7119_v27 = vcombine.low %v866_v57, %v870_v60  ;;  %v703_v51 = vld [vmem:[#allocation5 + $0x568] sm:$0xff] }
  0xe3   : > { %2974 = vmatpush1.bf16.msra.mxu0 %v7047_v62  ;;  %3017 = vmatpush1.bf16.msra.mxu1 %v6793_v1  ;;  %v615_v62 = vld [vmem:[#allocation5 + $0x2a8] sm:$0xff]  ;;  %v439_v1 = vadd.f32 %v427_v21, %v415_v20  ;;  %v862_v9 = vld [vmem:[#allocation5 + $0xa60] sm:$0xff] }
  0xe4   : > { %2975 = vmatprep.subr.bf16.mxu0 %v7040_v2  ;;  %3018 = vmatprep.subr.bf16.mxu1 %v6786_v11  ;;  %v6873_v2 = vcombine.low %v619_v49, %v623_v15  ;;  %v603_v11 = vld [vmem:[#allocation5 + $0x248] sm:$0xff]  ;;  %v6866_v12 = vcombine.high %v611_v53, %v615_v62  ;;  %v6865_v24 = vcombine.low %v611_v53, %v615_v62  ;;  %v854_v29 = vld [vmem:[#allocation5 + $0xa20] sm:$0xff] }
  0xe5   : > { %v7112_v25 = vcombine.high %v858_v8, %v862_v9  ;;  %v7111_v37 = vcombine.low %v858_v8, %v862_v9  ;;  %v699_v21 = vld [vmem:[#allocation5 + $0x548] sm:$0xff] }
  0xe6   : > { %v6954_v60 = vcombine.high %v699_v21, %v703_v51  ;;  %v691_v53 = vld [vmem:[#allocation5 + $0x508] sm:$0xff] }
  0xe7   : > { %2976 = vmatpush1.bf16.msra.mxu0 %v7039_v13  ;;  %3019 = vmatpush1.bf16.msra.mxu1 %v6785_v63  ;;  %v607_v13 = vld [vmem:[#allocation5 + $0x268] sm:$0xff]  ;;  %v463_v63 = vadd.f32 %v451_v28, %v439_v1  ;;  %v6953_v28 = vcombine.low %v699_v21, %v703_v51 }
  0xe8   : > { %2977 = vmatprep.subr.bf16.mxu0 %v7160_v18  ;;  %3020 = vmatprep.subr.bf16.mxu1 %v6906_v19  ;;  %v469_v18 = vadd.f32 %v457_v22, %v445_v3  ;;  %v850_v19 = vld [vmem:[#allocation5 + $0xa00] sm:$0xff]  ;;  %v6857_v34 = vcombine.low %v603_v11, %v607_v13  ;;  %v819_v62 = vld [vmem:[#allocation5 + $0x908] sm:$0xff] }
  0xe9   : > { %v487_v33 = vadd.f32 %v475_v7, %v463_v63  ;;  %v7104_v35 = vcombine.high %v850_v19, %v854_v29  ;;  %v7103_v45 = vcombine.low %v850_v19, %v854_v29  ;;  %v823_v3 = vld [vmem:[#allocation5 + $0x928] sm:$0xff] }
  0xea   : > { %v493_v36 = vadd.f32 %v481_v26, %v469_v18  ;;  %v811_v8 = vld [vmem:[#allocation5 + $0x8c8] sm:$0xff]  ;;  %v7074_v9 = vcombine.high %v819_v62, %v823_v3 }
  0xeb   : > { %2978 = vmatpush2.bf16.msra.mxu0 %v7159_v30  ;;  %3021 = vmatpush2.bf16.msra.mxu1 %v6905_v31  ;;  %v595_v30 = vld [vmem:[#allocation5 + $0x208] sm:$0xff]  ;;  %v6858_v31 = vcombine.high %v603_v11, %v607_v13  ;;  %v499_v43 = vmul.f32 0.25, %v487_v33  ;;  %v7073_v13 = vcombine.low %v819_v62, %v823_v3 }
  0xec   : > { %2979 = vmatprep.subr.bf16.mxu0 %v7152_v32  ;;  %3022 = vmatprep.subr.bf16.mxu1 %v6898_v38  ;;  %v599_v32 = vld [vmem:[#allocation5 + $0x228] sm:$0xff]  ;;  %v505_v44 = vmul.f32 0.25, %v493_v36 }
  0xed   : > { %v715_v38 = vld [vmem:[#allocation5 + $0x5c8] sm:$0xff] }
  0xee   : > { %v6970_v58 = vcombine.high %v715_v38, %v719_v39  ;;  %v8909_v49 = vpack.c.bf16 %v505_v44, %v499_v43  ;;  %v815_v11 = vld [vmem:[#allocation5 + $0x8e8] sm:$0xff] }
  0xef   : > { %2980 = vmatpush2.bf16.msra.mxu0 %v7151_v40  ;;  %3023 = vmatpush2.bf16.msra.mxu1 %v6897_v41  ;;  %v843_v40 = vld [vmem:[#allocation5 + $0x9c8] sm:$0xff]  ;;  %v6850_v41 = vcombine.high %v595_v30, %v599_v32  ;;  %v7065_v19 = vcombine.low %v811_v8, %v815_v11 }
  0xf0   : > { %2981 = vmatprep.subr.bf16.mxu0 %v7144_v42  ;;  %3024 = vmatprep.subr.bf16.mxu1 %v6890_v46  ;;  %v847_v42 = vld [vmem:[#allocation5 + $0x9e8] sm:$0xff]  ;;  %v6849_v46 = vcombine.low %v595_v30, %v599_v32 }
  0xf1   : > { %v7098_v48 = vcombine.high %v843_v40, %v847_v42  ;;  %v7097_v15 = vcombine.low %v843_v40, %v847_v42  ;;  %v675_v18 = vld [vmem:[#allocation5 + $0x488] sm:$0xff] }
  0xf2   : > { %v679_v7 = vld [vmem:[#allocation5 + $0x4a8] sm:$0xff] }
  0xf3   : > { %2982 = vmatpush2.bf16.msra.mxu0 %v7143_v0  ;;  %3025 = vmatpush2.bf16.msra.mxu1 %v6889_v47  ;;  %v707_v0 = vld [vmem:[#allocation5 + $0x588] sm:$0xff]  ;;  %v6930_v29 = vcombine.high %v675_v18, %v679_v7 }
  0xf4   : > { %2983 = vmatprep.subr.bf16.mxu0 %v7136_v59  ;;  %3026 = vmatprep.subr.bf16.mxu1 %v6882_v50  ;;  %v711_v47 = vld [vmem:[#allocation5 + $0x5a8] sm:$0xff]  ;;  %v6969_v50 = vcombine.low %v715_v38, %v719_v39 }
  0xf5   : > { %v835_v59 = vld [vmem:[#allocation5 + $0x988] sm:$0xff]  ;;  %v6962_v20 = vcombine.high %v707_v0, %v711_v47 }
  0xf6   : > { %v7090_v16 = vcombine.high %v835_v59, %v839_v5  ;;  %v7089_v57 = vcombine.low %v835_v59, %v839_v5  ;;  %v803_v26 = vld [vmem:[#allocation5 + $0x888] sm:$0xff] }
  0xf7   : > { %2984 = vmatpush2.bf16.msra.mxu0 %v7135_v52  ;;  %3027 = vmatpush2.bf16.msra.mxu1 %v6881_v55  ;;  %v827_v52 = vld [vmem:[#allocation5 + $0x948] sm:$0xff] }
  0xf8   : > { %2985 = vmatprep.subr.bf16.mxu0 %v7128_v56  ;;  %3028 = vmatprep.subr.bf16.mxu1 %v6874_v61  ;;  %v831_v55 = vld [vmem:[#allocation5 + $0x968] sm:$0xff]  ;;  %v6961_v56 = vcombine.low %v707_v0, %v711_v47 }
  0xf9   : > { %v695_v61 = vld [vmem:[#allocation5 + $0x528] sm:$0xff]  ;;  %v7082_v1 = vcombine.high %v827_v52, %v831_v55  ;;  %v7081_v22 = vcombine.low %v827_v52, %v831_v55 }
  0xfa   : > { %v667_v30 = vld [vmem:[#allocation5 + $0x448] sm:$0xff] }
  0xfb   : > { %2986 = vmatpush2.bf16.msra.mxu0 %v7127_v23  ;;  %3029 = vmatpush2.bf16.msra.mxu1 %v6873_v2  ;;  %v6946_v23 = vcombine.high %v691_v53, %v695_v61  ;;  %v683_v2 = vld [vmem:[#allocation5 + $0x4c8] sm:$0xff] }
  0xfc   : > { %2987 = vmatprep.subr.bf16.mxu0 %v7120_v17  ;;  %3030 = vmatprep.subr.bf16.mxu1 %v6866_v12  ;;  %v687_v17 = vld [vmem:[#allocation5 + $0x4e8] sm:$0xff]  ;;  %v6945_v12 = vcombine.low %v691_v53, %v695_v61 }
  0xfd   : > { %v6938_v63 = vcombine.high %v683_v2, %v687_v17  ;;  %v795_v32 = vld [vmem:[#allocation5 + $0x848] sm:$0xff] }
  0xfe   : > { %v799_v36 = vld [vmem:[#allocation5 + $0x868] sm:$0xff] }
  0xff   : > { %2988 = vmatpush2.bf16.msra.mxu0 %v7119_v27  ;;  %3031 = vmatpush2.bf16.msra.mxu1 %v6865_v24  ;;  %v7066_v27 = vcombine.high %v811_v8, %v815_v11  ;;  %v807_v24 = vld [vmem:[#allocation5 + $0x8a8] sm:$0xff]  ;;  %v7049_v44 = vcombine.low %v795_v32, %v799_v36 }
 0x100   : > { %2989 = vmatprep.subr.bf16.mxu0 %v7112_v25  ;;  %3032 = vmatprep.subr.bf16.mxu1 %v6858_v31  ;;  %v6937_v25 = vcombine.low %v683_v2, %v687_v17  ;;  %v671_v31 = vld [vmem:[#allocation5 + $0x468] sm:$0xff]  ;;  %v7058_v33 = vcombine.high %v803_v26, %v807_v24 }
 0x101   : > { %v659_v38 = vld [vmem:[#allocation5 + $0x408] sm:$0xff]  ;;  %v6921_v43 = vcombine.low %v667_v30, %v671_v31 }
 0x102   : > { %v663_v39 = vld [vmem:[#allocation5 + $0x428] sm:$0xff] }
 0x103   : > { %2990 = vmatpush2.bf16.msra.mxu0 %v7111_v37  ;;  %3033 = vmatpush2.bf16.msra.mxu1 %v6857_v34  ;;  %v6929_v37 = vcombine.low %v675_v18, %v679_v7  ;;  %v7057_v34 = vcombine.low %v803_v26, %v807_v24  ;;  %v787_v40 = vld [vmem:[#allocation5 + $0x808] sm:$0xff] }
 0x104   : > { %2991 = vmatprep.subr.bf16.mxu0 %v7104_v35  ;;  %3034 = vmatprep.subr.bf16.mxu1 %v6850_v41  ;;  %v6922_v35 = vcombine.high %v667_v30, %v671_v31  ;;  %v7050_v41 = vcombine.high %v795_v32, %v799_v36  ;;  %v791_v42 = vld [vmem:[#allocation5 + $0x828] sm:$0xff] }
 0x105   : > { %v907_v0 = vld [vmem:[#allocation5 + $0xbc8] sm:$0xff]  ;;  %v7042_v47 = vcombine.high %v787_v40, %v791_v42  ;;  %v7041_v5 = vcombine.low %v787_v40, %v791_v42 }
 0x106   : > { %v911_v59 = vld [vmem:[#allocation5 + $0xbe8] sm:$0xff] }
 0x107   : > { %2992 = vmatpush2.bf16.msra.mxu0 %v7103_v45  ;;  %3035 = vmatpush2.bf16.msra.mxu1 %v6849_v46  ;;  %v6914_v45 = vcombine.high %v659_v38, %v663_v39  ;;  %v779_v46 = vld [vmem:[#allocation5 + $0x7c8] sm:$0xff]  ;;  %v7162_v21 = vcombine.high %v907_v0, %v911_v59  ;;  %v7161_v55 = vcombine.low %v907_v0, %v911_v59 }
 0x108   : > { %3047 = vmatprep.subr.bf16.mxu0 %v6970_v58  ;;  %3090 = vmatprep.subr.bf16.mxu1 %v7098_v48  ;;  %v783_v58 = vld [vmem:[#allocation5 + $0x7e8] sm:$0xff]  ;;  %v6913_v48 = vcombine.low %v659_v38, %v663_v39 }
 0x109   : > { %v903_v51 = vld [vmem:[#allocation5 + $0xba8] sm:$0xff]  ;;  %v7033_v52 = vcombine.low %v779_v46, %v783_v58 }
 0x10a   : > { %2994 = vmatmul.mubr.bf16.vlgmr.msra.gmra.mxu0 %v8909_v49  ;;  %3037 = vmatmul.mubr.bf16.vlgmr.msra.gmra.mxu1 %v8891_v54  ;;  %v891_v53 = vld [vmem:[#allocation5 + $0xb48] sm:$0xff] }
 0x10b   : > { %3048 = vmatpush1.bf16.msra.mxu0 %v6969_v50  ;;  %3091 = vmatpush1.bf16.msra.mxu1 %v7097_v15  ;;  %v7034_v50 = vcombine.high %v779_v46, %v783_v58  ;;  %v771_v15 = vld [vmem:[#allocation5 + $0x788] sm:$0xff] }
 0x10c   : > { %3049 = vmatprep.subr.bf16.mxu0 %v6962_v20  ;;  %3092 = vmatprep.subr.bf16.mxu1 %v7090_v16  ;;  %v775_v20 = vld [vmem:[#allocation5 + $0x7a8] sm:$0xff] }
 0x10d   : > { %3079 = vmatprep.mubr.bf16.mxu0 %v8836_v10  ;;  %3122 = vmatprep.mubr.bf16.mxu1 %v8895_v14  ;;  %v899_v16 = vld [vmem:[#allocation5 + $0xb88] sm:$0xff] }
 0x10e   : > { %v7154_v61 = vcombine.high %v899_v16, %v903_v51  ;;  %v895_v62 = vld [vmem:[#allocation5 + $0xb68] sm:$0xff]  ;;  %v7153_v3 = vcombine.low %v899_v16, %v903_v51  ;;  %v720_v16 = vld [vmem:[#allocation5 + $0x5f0] sm:$0xff] }
 0x10f   : > { %3050 = vmatpush1.bf16.msra.mxu0 %v6961_v56  ;;  %3093 = vmatpush1.bf16.msra.mxu1 %v7089_v57  ;;  %v7026_v56 = vcombine.high %v771_v15, %v775_v20  ;;  %v763_v57 = vld [vmem:[#allocation5 + $0x748] sm:$0xff]  ;;  %v7146_v17 = vcombine.high %v891_v53, %v895_v62  ;;  %v7145_v11 = vcombine.low %v891_v53, %v895_v62  ;;  %v712_v53 = vld [vmem:[#allocation5 + $0x5b0] sm:$0xff] }
 0x110   : > { %3051 = vmatprep.subr.bf16.mxu0 %v6954_v60  ;;  %3094 = vmatprep.subr.bf16.mxu1 %v7082_v1  ;;  %v767_v60 = vld [vmem:[#allocation5 + $0x768] sm:$0xff]  ;;  %v7025_v1 = vcombine.low %v771_v15, %v775_v20  ;;  %v716_v15 = vld [vmem:[#allocation5 + $0x5d0] sm:$0xff] }
 0x111   : > { %v883_v2 = vld [vmem:[#allocation5 + $0xb08] sm:$0xff]  ;;  %v6971_v62 = vcombine.low %v716_v15, %v720_v16 }
 0x112   : > { %v887_v8 = vld [vmem:[#allocation5 + $0xb28] sm:$0xff] }
 0x113   : > { %3052 = vmatpush1.bf16.msra.mxu0 %v6953_v28  ;;  %3095 = vmatpush1.bf16.msra.mxu1 %v7081_v22  ;;  %v7018_v28 = vcombine.high %v763_v57, %v767_v60  ;;  %v755_v22 = vld [vmem:[#allocation5 + $0x708] sm:$0xff]  ;;  %v7138_v7 = vcombine.high %v883_v2, %v887_v8  ;;  %v7137_v24 = vcombine.low %v883_v2, %v887_v8  ;;  %v704_v2 = vld [vmem:[#allocation5 + $0x570] sm:$0xff] }
 0x114   : > { %3053 = vmatprep.subr.bf16.mxu0 %v6946_v23  ;;  %3096 = vmatprep.subr.bf16.mxu1 %v7074_v9  ;;  %v759_v23 = vld [vmem:[#allocation5 + $0x728] sm:$0xff]  ;;  %v7017_v9 = vcombine.low %v763_v57, %v767_v60  ;;  %v708_v57 = vld [vmem:[#allocation5 + $0x590] sm:$0xff]  ;;  %v6972_v60 = vcombine.high %v716_v15, %v720_v16 }
 0x115   : > { %v875_v18 = vld [vmem:[#allocation5 + $0xac8] sm:$0xff]  ;;  %v6963_v8 = vcombine.low %v708_v57, %v712_v53  ;;  %v664_v15 = vld [vmem:[#allocation5 + $0x430] sm:$0xff] }
 0x116   : > { %v879_v26 = vld [vmem:[#allocation5 + $0xae8] sm:$0xff] }
 0x117   : > { %3054 = vmatpush1.bf16.msra.mxu0 %v6945_v12  ;;  %3097 = vmatpush1.bf16.msra.mxu1 %v7073_v13  ;;  %v7010_v12 = vcombine.high %v755_v22, %v759_v23  ;;  %v747_v13 = vld [vmem:[#allocation5 + $0x6c8] sm:$0xff]  ;;  %v7130_v31 = vcombine.high %v875_v18, %v879_v26  ;;  %v7129_v36 = vcombine.low %v875_v18, %v879_v26  ;;  %v696_v18 = vld [vmem:[#allocation5 + $0x530] sm:$0xff] }
 0x118   : > { %3055 = vmatprep.subr.bf16.mxu0 %v6938_v63  ;;  %3098 = vmatprep.subr.bf16.mxu1 %v7066_v27  ;;  %v751_v63 = vld [vmem:[#allocation5 + $0x6e8] sm:$0xff]  ;;  %v7009_v27 = vcombine.low %v755_v22, %v759_v23  ;;  %v700_v22 = vld [vmem:[#allocation5 + $0x550] sm:$0xff]  ;;  %v6964_v23 = vcombine.high %v708_v57, %v712_v53 }
 0x119   : > { %v867_v30 = vld [vmem:[#allocation5 + $0xa88] sm:$0xff]  ;;  %v6955_v26 = vcombine.low %v700_v22, %v704_v2  ;;  %v784_v57 = vld [vmem:[#allocation5 + $0x7f0] sm:$0xff] }
 0x11a   : > { %v871_v32 = vld [vmem:[#allocation5 + $0xaa8] sm:$0xff] }
 0x11b   : > { %3056 = vmatpush1.bf16.msra.mxu0 %v6937_v25  ;;  %3099 = vmatpush1.bf16.msra.mxu1 %v7065_v19  ;;  %v7002_v25 = vcombine.high %v747_v13, %v751_v63  ;;  %v739_v19 = vld [vmem:[#allocation5 + $0x688] sm:$0xff]  ;;  %v7122_v39 = vcombine.high %v867_v30, %v871_v32  ;;  %v7121_v42 = vcombine.low %v867_v30, %v871_v32  ;;  %v688_v30 = vld [vmem:[#allocation5 + $0x4f0] sm:$0xff] }
 0x11c   : > { %3057 = vmatprep.subr.bf16.mxu0 %v6930_v29  ;;  %3100 = vmatprep.subr.bf16.mxu1 %v7058_v33  ;;  %v743_v29 = vld [vmem:[#allocation5 + $0x6a8] sm:$0xff]  ;;  %v7001_v33 = vcombine.low %v747_v13, %v751_v63  ;;  %v692_v13 = vld [vmem:[#allocation5 + $0x510] sm:$0xff]  ;;  %v6956_v63 = vcombine.high %v700_v22, %v704_v2 }
 0x11d   : > { %v859_v38 = vld [vmem:[#allocation5 + $0xa48] sm:$0xff]  ;;  %v6947_v32 = vcombine.low %v692_v13, %v696_v18  ;;  %v776_v22 = vld [vmem:[#allocation5 + $0x7b0] sm:$0xff] }
 0x11e   : > { %v863_v40 = vld [vmem:[#allocation5 + $0xa68] sm:$0xff] }
 0x11f   : > { %3058 = vmatpush1.bf16.msra.mxu0 %v6929_v37  ;;  %3101 = vmatpush1.bf16.msra.mxu1 %v7057_v34  ;;  %v6994_v37 = vcombine.high %v739_v19, %v743_v29  ;;  %v731_v34 = vld [vmem:[#allocation5 + $0x648] sm:$0xff]  ;;  %v7114_v58 = vcombine.high %v859_v38, %v863_v40  ;;  %v7113_v59 = vcombine.low %v859_v38, %v863_v40  ;;  %v680_v38 = vld [vmem:[#allocation5 + $0x4b0] sm:$0xff] }
 0x120   : > { %3059 = vmatprep.subr.bf16.mxu0 %v6922_v35  ;;  %3102 = vmatprep.subr.bf16.mxu1 %v7050_v41  ;;  %v735_v35 = vld [vmem:[#allocation5 + $0x668] sm:$0xff]  ;;  %v6993_v41 = vcombine.low %v739_v19, %v743_v29  ;;  %v684_v19 = vld [vmem:[#allocation5 + $0x4d0] sm:$0xff]  ;;  %v6948_v29 = vcombine.high %v692_v13, %v696_v18 }
 0x121   : > { %v851_v46 = vld [vmem:[#allocation5 + $0xa08] sm:$0xff]  ;;  %v6939_v40 = vcombine.low %v684_v19, %v688_v30  ;;  %v768_v13 = vld [vmem:[#allocation5 + $0x770] sm:$0xff] }
 0x122   : > { %v855_v0 = vld [vmem:[#allocation5 + $0xa28] sm:$0xff] }
 0x123   : > { %3060 = vmatpush1.bf16.msra.mxu0 %v6921_v43  ;;  %3103 = vmatpush1.bf16.msra.mxu1 %v7049_v44  ;;  %v6986_v43 = vcombine.high %v731_v34, %v735_v35  ;;  %v723_v44 = vld [vmem:[#allocation5 + $0x608] sm:$0xff]  ;;  %v7106_v20 = vcombine.high %v851_v46, %v855_v0  ;;  %v7105_v51 = vcombine.low %v851_v46, %v855_v0  ;;  %v672_v46 = vld [vmem:[#allocation5 + $0x470] sm:$0xff] }
 0x124   : > { %3061 = vmatprep.subr.bf16.mxu0 %v6914_v45  ;;  %3104 = vmatprep.subr.bf16.mxu1 %v7042_v47  ;;  %v727_v45 = vld [vmem:[#allocation5 + $0x628] sm:$0xff]  ;;  %v6985_v47 = vcombine.low %v731_v34, %v735_v35  ;;  %v676_v34 = vld [vmem:[#allocation5 + $0x490] sm:$0xff]  ;;  %v6940_v35 = vcombine.high %v684_v19, %v688_v30 }
 0x125   : > { %v6931_v0 = vcombine.low %v676_v34, %v680_v38  ;;  %v760_v19 = vld [vmem:[#allocation5 + $0x730] sm:$0xff] }
 0x127   : > { %3062 = vmatpush1.bf16.msra.mxu0 %v6913_v48  ;;  %3105 = vmatpush1.bf16.msra.mxu1 %v7041_v5  ;;  %v6978_v48 = vcombine.high %v723_v44, %v727_v45  ;;  %v588_v5 = vld [vmem:[#allocation5 + $0x1d0] sm:$0xff] }
 0x128   : > { %3063 = vmatprep.subr.bf16.mxu0 %v7034_v50  ;;  %3106 = vmatprep.subr.bf16.mxu1 %v7162_v21  ;;  %v592_v50 = vld [vmem:[#allocation5 + $0x1f0] sm:$0xff]  ;;  %v6977_v21 = vcombine.low %v723_v44, %v727_v45  ;;  %v6932_v45 = vcombine.high %v676_v34, %v680_v38 }
 0x129   : > { %v668_v44 = vld [vmem:[#allocation5 + $0x450] sm:$0xff] }
 0x12a   : > { %v6923_v16 = vcombine.low %v668_v44, %v672_v46  ;;  %v752_v34 = vld [vmem:[#allocation5 + $0x6f0] sm:$0xff] }
 0x12b   : > { %3064 = vmatpush2.bf16.msra.mxu0 %v7033_v52  ;;  %3107 = vmatpush2.bf16.msra.mxu1 %v7161_v55  ;;  %v6844_v52 = vcombine.high %v588_v5, %v592_v50  ;;  %v580_v55 = vld [vmem:[#allocation5 + $0x190] sm:$0xff] }
 0x12c   : > { %3065 = vmatprep.subr.bf16.mxu0 %v7026_v56  ;;  %3108 = vmatprep.subr.bf16.mxu1 %v7154_v61  ;;  %v584_v56 = vld [vmem:[#allocation5 + $0x1b0] sm:$0xff]  ;;  %v6843_v61 = vcombine.low %v588_v5, %v592_v50  ;;  %v6924_v50 = vcombine.high %v668_v44, %v672_v46 }
 0x12d   : > { %v660_v5 = vld [vmem:[#allocation5 + $0x410] sm:$0xff] }
 0x12e   : > { %v6915_v53 = vcombine.low %v660_v5, %v664_v15  ;;  %v744_v44 = vld [vmem:[#allocation5 + $0x6b0] sm:$0xff] }
 0x12f   : > { %3066 = vmatpush2.bf16.msra.mxu0 %v7025_v1  ;;  %3109 = vmatpush2.bf16.msra.mxu1 %v7153_v3  ;;  %v6836_v1 = vcombine.high %v580_v55, %v584_v56  ;;  %v572_v3 = vld [vmem:[#allocation5 + $0x150] sm:$0xff] }
 0x130   : > { %3067 = vmatprep.subr.bf16.mxu0 %v7018_v28  ;;  %3110 = vmatprep.subr.bf16.mxu1 %v7146_v17  ;;  %v576_v28 = vld [vmem:[#allocation5 + $0x170] sm:$0xff]  ;;  %v6835_v17 = vcombine.low %v580_v55, %v584_v56  ;;  %v6916_v56 = vcombine.high %v660_v5, %v664_v15 }
 0x131   : > { %v780_v55 = vld [vmem:[#allocation5 + $0x7d0] sm:$0xff] }
 0x132   : > { %v7035_v2 = vcombine.low %v780_v55, %v784_v57  ;;  %v736_v5 = vld [vmem:[#allocation5 + $0x670] sm:$0xff] }
 0x133   : > { %3068 = vmatpush2.bf16.msra.mxu0 %v7017_v9  ;;  %3111 = vmatpush2.bf16.msra.mxu1 %v7145_v11  ;;  %v6828_v9 = vcombine.high %v572_v3, %v576_v28  ;;  %v564_v11 = vld [vmem:[#allocation5 + $0x110] sm:$0xff] }
 0x134   : > { %3069 = vmatprep.subr.bf16.mxu0 %v7010_v12  ;;  %3112 = vmatprep.subr.bf16.mxu1 %v7138_v7  ;;  %v568_v12 = vld [vmem:[#allocation5 + $0x130] sm:$0xff]  ;;  %v6827_v7 = vcombine.low %v572_v3, %v576_v28  ;;  %v7036_v28 = vcombine.high %v780_v55, %v784_v57 }
 0x135   : > { %v772_v3 = vld [vmem:[#allocation5 + $0x790] sm:$0xff] }
 0x136   : > { %v7027_v18 = vcombine.low %v772_v3, %v776_v22  ;;  %v728_v55 = vld [vmem:[#allocation5 + $0x630] sm:$0xff] }
 0x137   : > { %3070 = vmatpush2.bf16.msra.mxu0 %v7009_v27  ;;  %3113 = vmatpush2.bf16.msra.mxu1 %v7137_v24  ;;  %v6820_v27 = vcombine.high %v564_v11, %v568_v12  ;;  %v556_v24 = vld [vmem:[#allocation5 + $0xd0] sm:$0xff] }
 0x138   : > { %3071 = vmatprep.subr.bf16.mxu0 %v7002_v25  ;;  %3114 = vmatprep.subr.bf16.mxu1 %v7130_v31  ;;  %v560_v25 = vld [vmem:[#allocation5 + $0xf0] sm:$0xff]  ;;  %v6819_v31 = vcombine.low %v564_v11, %v568_v12  ;;  %v7028_v12 = vcombine.high %v772_v3, %v776_v22  ;;  %v593_v3 = vld [vmem:[#allocation5 + $0x1f8] sm:$0xff] }
 0x139   : > { %v764_v11 = vld [vmem:[#allocation5 + $0x750] sm:$0xff] }
 0x13a   : > { %v7019_v30 = vcombine.low %v764_v11, %v768_v13 }
 0x13b   : > { %3072 = vmatpush2.bf16.msra.mxu0 %v7001_v33  ;;  %3115 = vmatpush2.bf16.msra.mxu1 %v7129_v36  ;;  %v6812_v33 = vcombine.high %v556_v24, %v560_v25  ;;  %v548_v36 = vld [vmem:[#allocation5 + $0x90] sm:$0xff] }
 0x13c   : > { %3073 = vmatprep.subr.bf16.mxu0 %v6994_v37  ;;  %3116 = vmatprep.subr.bf16.mxu1 %v7122_v39  ;;  %v552_v37 = vld [vmem:[#allocation5 + $0xb0] sm:$0xff]  ;;  %v6811_v39 = vcombine.low %v556_v24, %v560_v25  ;;  %v7020_v25 = vcombine.high %v764_v11, %v768_v13  ;;  %v585_v11 = vld [vmem:[#allocation5 + $0x1b8] sm:$0xff] }
 0x13d   : > { %v756_v24 = vld [vmem:[#allocation5 + $0x710] sm:$0xff] }
 0x13e   : > { %v7011_v38 = vcombine.low %v756_v24, %v760_v19  ;;  %v828_v13 = vld [vmem:[#allocation5 + $0x950] sm:$0xff] }
 0x13f   : > { %3074 = vmatpush2.bf16.msra.mxu0 %v6993_v41  ;;  %3117 = vmatpush2.bf16.msra.mxu1 %v7121_v42  ;;  %v6804_v41 = vcombine.high %v548_v36, %v552_v37  ;;  %v540_v42 = vld [vmem:[#allocation5 + $0x50] sm:$0xff] }
 0x140   : > { %3075 = vmatprep.subr.bf16.mxu0 %v6986_v43  ;;  %3118 = vmatprep.subr.bf16.mxu1 %v7114_v58  ;;  %v544_v43 = vld [vmem:[#allocation5 + $0x70] sm:$0xff]  ;;  %v6803_v58 = vcombine.low %v548_v36, %v552_v37  ;;  %v7012_v37 = vcombine.high %v756_v24, %v760_v19 }
 0x141   : > { %v748_v36 = vld [vmem:[#allocation5 + $0x6d0] sm:$0xff] }
 0x142   : > { %v7003_v46 = vcombine.low %v748_v36, %v752_v34  ;;  %v820_v19 = vld [vmem:[#allocation5 + $0x910] sm:$0xff] }
 0x143   : > { %3076 = vmatpush2.bf16.msra.mxu0 %v6985_v47  ;;  %3119 = vmatpush2.bf16.msra.mxu1 %v7113_v59  ;;  %v6796_v47 = vcombine.high %v540_v42, %v544_v43  ;;  %v532_v59 = vld [vmem:[#allocation5 + $0x10] sm:$0xff] }
 0x144   : > { %3077 = vmatprep.subr.bf16.mxu0 %v6978_v48  ;;  %3120 = vmatprep.subr.bf16.mxu1 %v7106_v20  ;;  %v536_v48 = vld [vmem:[#allocation5 + $0x30] sm:$0xff]  ;;  %v6795_v20 = vcombine.low %v540_v42, %v544_v43  ;;  %v7004_v43 = vcombine.high %v748_v36, %v752_v34 }
 0x145   : > { %v740_v42 = vld [vmem:[#allocation5 + $0x690] sm:$0xff] }
 0x146   : > { %v6995_v15 = vcombine.low %v740_v42, %v744_v44 }
 0x147   : > { %3078 = vmatpush2.bf16.msra.mxu0 %v6977_v21  ;;  %3121 = vmatpush2.bf16.msra.mxu1 %v7105_v51  ;;  %v6788_v21 = vcombine.high %v532_v59, %v536_v48  ;;  %v652_v51 = vld [vmem:[#allocation5 + $0x3d0] sm:$0xff] }
 0x148   : > { %3133 = vmatprep.subr.bf16.mxu0 %v6844_v52  ;;  %3176 = vmatprep.subr.bf16.mxu1 %v6972_v60  ;;  %v656_v52 = vld [vmem:[#allocation5 + $0x3f0] sm:$0xff]  ;;  %v6787_v60 = vcombine.low %v532_v59, %v536_v48  ;;  %v6996_v48 = vcombine.high %v740_v42, %v744_v44  ;;  %v561_v42 = vld [vmem:[#allocation5 + $0xf8] sm:$0xff] }
 0x149   : > { %v732_v59 = vld [vmem:[#allocation5 + $0x650] sm:$0xff] }
 0x14a   : > { %3080 = vmatmul.mubr.bf16.vlgmr.msra.gmra.mxu0 %v8893_v6  ;;  %3123 = vmatmul.mubr.bf16.vlgmr.msra.gmra.mxu1 %v8909_v49  ;;  %v6987_v57 = vcombine.low %v732_v59, %v736_v5 }
 0x14b   : > { %3134 = vmatpush1.bf16.msra.mxu0 %v6843_v61  ;;  %3177 = vmatpush1.bf16.msra.mxu1 %v6971_v62  ;;  %v6908_v61 = vcombine.high %v652_v51, %v656_v52  ;;  %v644_v62 = vld [vmem:[#allocation5 + $0x390] sm:$0xff] }
 0x14c   : > { %3135 = vmatprep.subr.bf16.mxu0 %v6836_v1  ;;  %3178 = vmatprep.subr.bf16.mxu1 %v6964_v23  ;;  %v648_v1 = vld [vmem:[#allocation5 + $0x3b0] sm:$0xff]  ;;  %v6907_v23 = vcombine.low %v652_v51, %v656_v52  ;;  %v6988_v52 = vcombine.high %v732_v59, %v736_v5 }
 0x14d   : > { %3165 = vmatprep.mubr.bf16.mxu0 %v8833_v4  ;;  %3208 = vmatprep.mubr.bf16.mxu1 %v8836_v10  ;;  %v724_v51 = vld [vmem:[#allocation5 + $0x610] sm:$0xff] }
 0x14e   : > { %v6979_v22 = vcombine.low %v724_v51, %v728_v55 }
 0x14f   : > { %3136 = vmatpush1.bf16.msra.mxu0 %v6835_v17  ;;  %3179 = vmatpush1.bf16.msra.mxu1 %v6963_v8  ;;  %v6900_v17 = vcombine.high %v644_v62, %v648_v1  ;;  %v636_v8 = vld [vmem:[#allocation5 + $0x350] sm:$0xff] }
 0x150   : > { %3137 = vmatprep.subr.bf16.mxu0 %v6828_v9  ;;  %3180 = vmatprep.subr.bf16.mxu1 %v6956_v63  ;;  %v640_v9 = vld [vmem:[#allocation5 + $0x370] sm:$0xff]  ;;  %v6899_v63 = vcombine.low %v644_v62, %v648_v1  ;;  %v589_v62 = vld [vmem:[#allocation5 + $0x1d8] sm:$0xff]  ;;  %v6980_v1 = vcombine.high %v724_v51, %v728_v55 }
 0x153   : > { %3138 = vmatpush1.bf16.msra.mxu0 %v6827_v7  ;;  %3181 = vmatpush1.bf16.msra.mxu1 %v6955_v26  ;;  %v6892_v7 = vcombine.high %v636_v8, %v640_v9  ;;  %v628_v26 = vld [vmem:[#allocation5 + $0x310] sm:$0xff] }
 0x154   : > { %3139 = vmatprep.subr.bf16.mxu0 %v6820_v27  ;;  %3182 = vmatprep.subr.bf16.mxu1 %v6948_v29  ;;  %v632_v27 = vld [vmem:[#allocation5 + $0x330] sm:$0xff]  ;;  %v6891_v29 = vcombine.low %v636_v8, %v640_v9  ;;  %v581_v8 = vld [vmem:[#allocation5 + $0x198] sm:$0xff]  ;;  %v6846_v9 = vcombine.high %v589_v62, %v593_v3 }
 0x155   : > { %v6838_v24 = vcombine.high %v581_v8, %v585_v11 }
 0x157   : > { %3140 = vmatpush1.bf16.msra.mxu0 %v6819_v31  ;;  %3183 = vmatpush1.bf16.msra.mxu1 %v6947_v32  ;;  %v6884_v31 = vcombine.high %v628_v26, %v632_v27  ;;  %v620_v32 = vld [vmem:[#allocation5 + $0x2d0] sm:$0xff] }
 0x158   : > { %3141 = vmatprep.subr.bf16.mxu0 %v6812_v33  ;;  %3184 = vmatprep.subr.bf16.mxu1 %v6940_v35  ;;  %v624_v33 = vld [vmem:[#allocation5 + $0x2f0] sm:$0xff]  ;;  %v6883_v35 = vcombine.low %v628_v26, %v632_v27  ;;  %v573_v26 = vld [vmem:[#allocation5 + $0x158] sm:$0xff] }
 0x159   : > { %v577_v27 = vld [vmem:[#allocation5 + $0x178] sm:$0xff] }
 0x15a   : > { %v6830_v36 = vcombine.high %v573_v26, %v577_v27  ;;  %v6829_v34 = vcombine.low %v573_v26, %v577_v27 }
 0x15b   : > { %3142 = vmatpush1.bf16.msra.mxu0 %v6811_v39  ;;  %3185 = vmatpush1.bf16.msra.mxu1 %v6939_v40  ;;  %v6876_v39 = vcombine.high %v620_v32, %v624_v33  ;;  %v612_v40 = vld [vmem:[#allocation5 + $0x290] sm:$0xff] }
 0x15c   : > { %3143 = vmatprep.subr.bf16.mxu0 %v6804_v41  ;;  %3186 = vmatprep.subr.bf16.mxu1 %v6932_v45  ;;  %v616_v41 = vld [vmem:[#allocation5 + $0x2b0] sm:$0xff]  ;;  %v6875_v45 = vcombine.low %v620_v32, %v624_v33  ;;  %v565_v32 = vld [vmem:[#allocation5 + $0x118] sm:$0xff] }
 0x15d   : > { %v569_v33 = vld [vmem:[#allocation5 + $0x138] sm:$0xff] }
 0x15e   : > { %v6821_v44 = vcombine.low %v565_v32, %v569_v33 }
 0x15f   : > { %3144 = vmatpush1.bf16.msra.mxu0 %v6803_v58  ;;  %3187 = vmatpush1.bf16.msra.mxu1 %v6931_v0  ;;  %v6868_v58 = vcombine.high %v612_v40, %v616_v41  ;;  %v604_v0 = vld [vmem:[#allocation5 + $0x250] sm:$0xff] }
 0x160   : > { %3145 = vmatprep.subr.bf16.mxu0 %v6796_v47  ;;  %3188 = vmatprep.subr.bf16.mxu1 %v6924_v50  ;;  %v608_v47 = vld [vmem:[#allocation5 + $0x270] sm:$0xff]  ;;  %v6867_v50 = vcombine.low %v612_v40, %v616_v41  ;;  %v557_v41 = vld [vmem:[#allocation5 + $0xd8] sm:$0xff] }
 0x161   : > { %v816_v40 = vld [vmem:[#allocation5 + $0x8f0] sm:$0xff] }
 0x163   : > { %3146 = vmatpush1.bf16.msra.mxu0 %v6795_v20  ;;  %3189 = vmatpush1.bf16.msra.mxu1 %v6923_v16  ;;  %v6860_v20 = vcombine.high %v604_v0, %v608_v47  ;;  %v596_v16 = vld [vmem:[#allocation5 + $0x210] sm:$0xff] }
 0x164   : > { %3147 = vmatprep.subr.bf16.mxu0 %v6788_v21  ;;  %3190 = vmatprep.subr.bf16.mxu1 %v6916_v56  ;;  %v600_v21 = vld [vmem:[#allocation5 + $0x230] sm:$0xff]  ;;  %v6859_v56 = vcombine.low %v604_v0, %v608_v47  ;;  %v549_v0 = vld [vmem:[#allocation5 + $0x98] sm:$0xff] }
 0x165   : > { %v553_v47 = vld [vmem:[#allocation5 + $0xb8] sm:$0xff] }
 0x167   : > { %3148 = vmatpush1.bf16.msra.mxu0 %v6787_v60  ;;  %3191 = vmatpush1.bf16.msra.mxu1 %v6915_v53  ;;  %v6852_v60 = vcombine.high %v596_v16, %v600_v21  ;;  %v844_v53 = vld [vmem:[#allocation5 + $0x9d0] sm:$0xff] }
 0x168   : > { %3149 = vmatprep.subr.bf16.mxu0 %v6908_v61  ;;  %3192 = vmatprep.subr.bf16.mxu1 %v7036_v28  ;;  %v848_v61 = vld [vmem:[#allocation5 + $0x9f0] sm:$0xff]  ;;  %v6851_v28 = vcombine.low %v596_v16, %v600_v21  ;;  %v541_v16 = vld [vmem:[#allocation5 + $0x58] sm:$0xff] }
 0x169   : > { %v545_v21 = vld [vmem:[#allocation5 + $0x78] sm:$0xff] }
 0x16b   : > { %3150 = vmatpush2.bf16.msra.mxu0 %v6907_v23  ;;  %3193 = vmatpush2.bf16.msra.mxu1 %v7035_v2  ;;  %v7100_v23 = vcombine.high %v844_v53, %v848_v61  ;;  %v836_v2 = vld [vmem:[#allocation5 + $0x990] sm:$0xff] }
 0x16c   : > { %3151 = vmatprep.subr.bf16.mxu0 %v6900_v17  ;;  %3194 = vmatprep.subr.bf16.mxu1 %v7028_v12  ;;  %v840_v17 = vld [vmem:[#allocation5 + $0x9b0] sm:$0xff]  ;;  %v7099_v12 = vcombine.low %v844_v53, %v848_v61  ;;  %v533_v53 = vld [vmem:[#allocation5 + $0x18] sm:$0xff] }
 0x16d   : > { %v537_v61 = vld [vmem:[#allocation5 + $0x38] sm:$0xff] }
 0x16f   : > { %3152 = vmatpush2.bf16.msra.mxu0 %v6899_v63  ;;  %3195 = vmatpush2.bf16.msra.mxu1 %v7027_v18  ;;  %v832_v63 = vld [vmem:[#allocation5 + $0x970] sm:$0xff]  ;;  %v6845_v18 = vcombine.low %v589_v62, %v593_v3 }
 0x170   : > { %3153 = vmatprep.subr.bf16.mxu0 %v6892_v7  ;;  %3196 = vmatprep.subr.bf16.mxu1 %v7020_v25  ;;  %v7092_v7 = vcombine.high %v836_v2, %v840_v17  ;;  %v7091_v25 = vcombine.low %v836_v2, %v840_v17  ;;  %v653_v2 = vld [vmem:[#allocation5 + $0x3d8] sm:$0xff] }
 0x171   : > { %v657_v17 = vld [vmem:[#allocation5 + $0x3f8] sm:$0xff] }
 0x172   : > { %v6909_v27 = vcombine.low %v653_v2, %v657_v17 }
 0x173   : > { %3154 = vmatpush2.bf16.msra.mxu0 %v6891_v29  ;;  %3197 = vmatpush2.bf16.msra.mxu1 %v7019_v30  ;;  %v824_v29 = vld [vmem:[#allocation5 + $0x930] sm:$0xff]  ;;  %v6837_v30 = vcombine.low %v581_v8, %v585_v11 }
 0x174   : > { %3155 = vmatprep.subr.bf16.mxu0 %v6884_v31  ;;  %3198 = vmatprep.subr.bf16.mxu1 %v7012_v37  ;;  %v7084_v31 = vcombine.high %v828_v13, %v832_v63  ;;  %v7083_v37 = vcombine.low %v828_v13, %v832_v63  ;;  %v900_v13 = vld [vmem:[#allocation5 + $0xb90] sm:$0xff] }
 0x175   : > { %v904_v63 = vld [vmem:[#allocation5 + $0xbb0] sm:$0xff] }
 0x177   : > { %3156 = vmatpush2.bf16.msra.mxu0 %v6883_v35  ;;  %3199 = vmatpush2.bf16.msra.mxu1 %v7011_v38  ;;  %v7076_v35 = vcombine.high %v820_v19, %v824_v29  ;;  %v6822_v38 = vcombine.high %v565_v32, %v569_v33  ;;  %v7155_v32 = vcombine.low %v900_v13, %v904_v63 }
 0x178   : > { %3157 = vmatprep.subr.bf16.mxu0 %v6876_v39  ;;  %3200 = vmatprep.subr.bf16.mxu1 %v7004_v43  ;;  %v812_v39 = vld [vmem:[#allocation5 + $0x8d0] sm:$0xff]  ;;  %v7075_v43 = vcombine.low %v820_v19, %v824_v29 }
 0x179   : > { %v7067_v59 = vcombine.low %v812_v39, %v816_v40  ;;  %v892_v19 = vld [vmem:[#allocation5 + $0xb50] sm:$0xff] }
 0x17a   : > { %v896_v29 = vld [vmem:[#allocation5 + $0xb70] sm:$0xff] }
 0x17b   : > { %3158 = vmatpush2.bf16.msra.mxu0 %v6875_v45  ;;  %3201 = vmatpush2.bf16.msra.mxu1 %v7003_v46  ;;  %v7068_v45 = vcombine.high %v812_v39, %v816_v40  ;;  %v804_v46 = vld [vmem:[#allocation5 + $0x890] sm:$0xff]  ;;  %v633_v39 = vld [vmem:[#allocation5 + $0x338] sm:$0xff]  ;;  %v7147_v40 = vcombine.low %v892_v19, %v896_v29 }
 0x17c   : > { %3159 = vmatprep.subr.bf16.mxu0 %v6868_v58  ;;  %3202 = vmatprep.subr.bf16.mxu1 %v6996_v48  ;;  %v808_v58 = vld [vmem:[#allocation5 + $0x8b0] sm:$0xff]  ;;  %v6813_v48 = vcombine.low %v557_v41, %v561_v42 }
 0x17d   : > { %v7060_v5 = vcombine.high %v804_v46, %v808_v58  ;;  %v7059_v51 = vcombine.low %v804_v46, %v808_v58  ;;  %v625_v46 = vld [vmem:[#allocation5 + $0x2f8] sm:$0xff] }
 0x17f   : > { %3160 = vmatpush2.bf16.msra.mxu0 %v6867_v50  ;;  %3203 = vmatpush2.bf16.msra.mxu1 %v6995_v15  ;;  %v6806_v50 = vcombine.high %v549_v0, %v553_v47  ;;  %v796_v15 = vld [vmem:[#allocation5 + $0x850] sm:$0xff] }
 0x180   : > { %3161 = vmatprep.subr.bf16.mxu0 %v6860_v20  ;;  %3204 = vmatprep.subr.bf16.mxu1 %v6988_v52  ;;  %v800_v20 = vld [vmem:[#allocation5 + $0x870] sm:$0xff]  ;;  %v6805_v52 = vcombine.low %v549_v0, %v553_v47 }
 0x181   : > { %v7052_v55 = vcombine.high %v796_v15, %v800_v20  ;;  %v7051_v62 = vcombine.low %v796_v15, %v800_v20  ;;  %v617_v15 = vld [vmem:[#allocation5 + $0x2b8] sm:$0xff] }
 0x183   : > { %3162 = vmatpush2.bf16.msra.mxu0 %v6859_v56  ;;  %3205 = vmatpush2.bf16.msra.mxu1 %v6987_v57  ;;  %v6798_v56 = vcombine.high %v541_v16, %v545_v21  ;;  %v788_v57 = vld [vmem:[#allocation5 + $0x810] sm:$0xff] }
 0x184   : > { %3163 = vmatprep.subr.bf16.mxu0 %v6852_v60  ;;  %3206 = vmatprep.subr.bf16.mxu1 %v6980_v1  ;;  %v792_v60 = vld [vmem:[#allocation5 + $0x830] sm:$0xff]  ;;  %v6797_v1 = vcombine.low %v541_v16, %v545_v21 }
 0x185   : > { %v7044_v3 = vcombine.high %v788_v57, %v792_v60  ;;  %v7043_v8 = vcombine.low %v788_v57, %v792_v60  ;;  %v609_v57 = vld [vmem:[#allocation5 + $0x278] sm:$0xff] }
 0x187   : > { %3164 = vmatpush2.bf16.msra.mxu0 %v6851_v28  ;;  %3207 = vmatpush2.bf16.msra.mxu1 %v6979_v22  ;;  %v6790_v28 = vcombine.high %v533_v53, %v537_v61  ;;  %v908_v22 = vld [vmem:[#allocation5 + $0xbd0] sm:$0xff] }
 0x188   : > { %3219 = vmatprep.subr.bf16.mxu0 %v7100_v23  ;;  %3262 = vmatprep.subr.bf16.mxu1 %v6846_v9  ;;  %v912_v23 = vld [vmem:[#allocation5 + $0xbf0] sm:$0xff]  ;;  %v6789_v9 = vcombine.low %v533_v53, %v537_v61 }
 0x189   : > { %v7164_v11 = vcombine.high %v908_v22, %v912_v23  ;;  %v7163_v26 = vcombine.low %v908_v22, %v912_v23  ;;  %v601_v22 = vld [vmem:[#allocation5 + $0x238] sm:$0xff] }
 0x18a   : > { %3166 = vmatmul.mubr.bf16.vlgmr.msra.gmra.mxu0 %v8891_v54  ;;  %3209 = vmatmul.mubr.bf16.vlgmr.msra.gmra.mxu1 %v8893_v6 }
 0x18b   : > { %3220 = vmatpush1.bf16.msra.mxu0 %v7099_v12  ;;  %3263 = vmatpush1.bf16.msra.mxu1 %v6845_v18  ;;  %v6910_v12 = vcombine.high %v653_v2, %v657_v17  ;;  %v645_v18 = vld [vmem:[#allocation5 + $0x398] sm:$0xff] }
 0x18c   : > { %3221 = vmatprep.subr.bf16.mxu0 %v7092_v7  ;;  %3264 = vmatprep.subr.bf16.mxu1 %v6838_v24  ;;  %v649_v7 = vld [vmem:[#allocation5 + $0x3b8] sm:$0xff]  ;;  %v7156_v24 = vcombine.high %v900_v13, %v904_v63 }
 0x18d   : > { %3251 = vmatprep.mubr.bf16.mxu0 %v8895_v14  ;;  %3294 = vmatprep.mubr.bf16.mxu1 %v8833_v4  ;;  %v6814_v4 = vcombine.high %v557_v41, %v561_v42  ;;  %v6901_v33 = vcombine.low %v645_v18, %v649_v7  ;;  %v849_v13 = vld [vmem:[#allocation5 + $0x9f8] sm:$0xff] }
 0x18f   : > { %3222 = vmatpush1.bf16.msra.mxu0 %v7091_v25  ;;  %3265 = vmatpush1.bf16.msra.mxu1 %v6837_v30  ;;  %v6902_v25 = vcombine.high %v645_v18, %v649_v7  ;;  %v637_v30 = vld [vmem:[#allocation5 + $0x358] sm:$0xff] }
 0x190   : > { %3223 = vmatprep.subr.bf16.mxu0 %v7084_v31  ;;  %3266 = vmatprep.subr.bf16.mxu1 %v6830_v36  ;;  %v641_v31 = vld [vmem:[#allocation5 + $0x378] sm:$0xff]  ;;  %v7148_v36 = vcombine.high %v892_v19, %v896_v29 }
 0x191   : > { %v6893_v41 = vcombine.low %v637_v30, %v641_v31  ;;  %v841_v19 = vld [vmem:[#allocation5 + $0x9b8] sm:$0xff] }
 0x193   : > { %3224 = vmatpush1.bf16.msra.mxu0 %v7083_v37  ;;  %3267 = vmatpush1.bf16.msra.mxu1 %v6829_v34  ;;  %v6894_v37 = vcombine.high %v637_v30, %v641_v31  ;;  %v884_v34 = vld [vmem:[#allocation5 + $0xb10] sm:$0xff] }
 0x194   : > { %3225 = vmatprep.subr.bf16.mxu0 %v7076_v35  ;;  %3268 = vmatprep.subr.bf16.mxu1 %v6822_v38  ;;  %v888_v35 = vld [vmem:[#allocation5 + $0xb30] sm:$0xff]  ;;  %v629_v38 = vld [vmem:[#allocation5 + $0x318] sm:$0xff] }
 0x195   : > { %v7140_v42 = vcombine.high %v884_v34, %v888_v35  ;;  %v7139_v58 = vcombine.low %v884_v34, %v888_v35  ;;  %v6885_v0 = vcombine.low %v629_v38, %v633_v39  ;;  %v833_v34 = vld [vmem:[#allocation5 + $0x978] sm:$0xff] }
 0x197   : > { %3226 = vmatpush1.bf16.msra.mxu0 %v7075_v43  ;;  %3269 = vmatpush1.bf16.msra.mxu1 %v6821_v44  ;;  %v6886_v43 = vcombine.high %v629_v38, %v633_v39  ;;  %v876_v44 = vld [vmem:[#allocation5 + $0xad0] sm:$0xff] }
 0x198   : > { %3227 = vmatprep.subr.bf16.mxu0 %v7068_v45  ;;  %3270 = vmatprep.subr.bf16.mxu1 %v6814_v4  ;;  %v880_v45 = vld [vmem:[#allocation5 + $0xaf0] sm:$0xff]  ;;  %v621_v4 = vld [vmem:[#allocation5 + $0x2d8] sm:$0xff] }
 0x199   : > { %v7132_v47 = vcombine.high %v876_v44, %v880_v45  ;;  %v7131_v20 = vcombine.low %v876_v44, %v880_v45  ;;  %v6877_v16 = vcombine.low %v621_v4, %v625_v46  ;;  %v825_v44 = vld [vmem:[#allocation5 + $0x938] sm:$0xff] }
 0x19b   : > { %3228 = vmatpush1.bf16.msra.mxu0 %v7067_v59  ;;  %3271 = vmatpush1.bf16.msra.mxu1 %v6813_v48  ;;  %v6878_v59 = vcombine.high %v621_v4, %v625_v46  ;;  %v868_v48 = vld [vmem:[#allocation5 + $0xa90] sm:$0xff] }
 0x19c   : > { %3229 = vmatprep.subr.bf16.mxu0 %v7060_v5  ;;  %3272 = vmatprep.subr.bf16.mxu1 %v6806_v50  ;;  %v872_v5 = vld [vmem:[#allocation5 + $0xab0] sm:$0xff]  ;;  %v613_v50 = vld [vmem:[#allocation5 + $0x298] sm:$0xff] }
 0x19d   : > { %v7124_v21 = vcombine.high %v868_v48, %v872_v5  ;;  %v7123_v60 = vcombine.low %v868_v48, %v872_v5  ;;  %v6869_v53 = vcombine.low %v613_v50, %v617_v15 }
 0x19f   : > { %3230 = vmatpush1.bf16.msra.mxu0 %v7059_v51  ;;  %3273 = vmatpush1.bf16.msra.mxu1 %v6805_v52  ;;  %v6870_v51 = vcombine.high %v613_v50, %v617_v15  ;;  %v860_v52 = vld [vmem:[#allocation5 + $0xa50] sm:$0xff]  ;;  %v677_v50 = vld [vmem:[#allocation5 + $0x498] sm:$0xff] }
 0x1a0   : > { %3231 = vmatprep.subr.bf16.mxu0 %v7052_v55  ;;  %3274 = vmatprep.subr.bf16.mxu1 %v6798_v56  ;;  %v864_v55 = vld [vmem:[#allocation5 + $0xa70] sm:$0xff]  ;;  %v605_v56 = vld [vmem:[#allocation5 + $0x258] sm:$0xff] }
 0x1a1   : > { %v7116_v61 = vcombine.high %v860_v52, %v864_v55  ;;  %v7115_v23 = vcombine.low %v860_v52, %v864_v55  ;;  %v6861_v2 = vcombine.low %v605_v56, %v609_v57  ;;  %v681_v15 = vld [vmem:[#allocation5 + $0x4b8] sm:$0xff] }
 0x1a2   : > { %v6934_v52 = vcombine.high %v677_v50, %v681_v15 }
 0x1a3   : > { %3232 = vmatpush1.bf16.msra.mxu0 %v7051_v62  ;;  %3275 = vmatpush1.bf16.msra.mxu1 %v6797_v1  ;;  %v6862_v62 = vcombine.high %v605_v56, %v609_v57  ;;  %v852_v1 = vld [vmem:[#allocation5 + $0xa10] sm:$0xff]  ;;  %v669_v56 = vld [vmem:[#allocation5 + $0x458] sm:$0xff] }
 0x1a4   : > { %3233 = vmatprep.subr.bf16.mxu0 %v7044_v3  ;;  %3276 = vmatprep.subr.bf16.mxu1 %v6790_v28  ;;  %v856_v3 = vld [vmem:[#allocation5 + $0xa30] sm:$0xff]  ;;  %v597_v28 = vld [vmem:[#allocation5 + $0x218] sm:$0xff] }
 0x1a5   : > { %v7108_v17 = vcombine.high %v852_v1, %v856_v3  ;;  %v7107_v63 = vcombine.low %v852_v1, %v856_v3  ;;  %v6853_v18 = vcombine.low %v597_v28, %v601_v22  ;;  %v673_v57 = vld [vmem:[#allocation5 + $0x478] sm:$0xff] }
 0x1a6   : > { %v6926_v1 = vcombine.high %v669_v56, %v673_v57 }
 0x1a7   : > { %3234 = vmatpush1.bf16.msra.mxu0 %v7043_v8  ;;  %3277 = vmatpush1.bf16.msra.mxu1 %v6789_v9  ;;  %v6854_v8 = vcombine.high %v597_v28, %v601_v22  ;;  %v717_v9 = vld [vmem:[#allocation5 + $0x5d8] sm:$0xff] }
 0x1a8   : > { %3235 = vmatprep.subr.bf16.mxu0 %v7164_v11  ;;  %3278 = vmatprep.subr.bf16.mxu1 %v6910_v12  ;;  %v721_v11 = vld [vmem:[#allocation5 + $0x5f8] sm:$0xff] }
 0x1a9   : > { %v845_v12 = vld [vmem:[#allocation5 + $0x9d8] sm:$0xff]  ;;  %v6974_v7 = vcombine.high %v717_v9, %v721_v11  ;;  %v6973_v29 = vcombine.low %v717_v9, %v721_v11 }
 0x1aa   : > { %v7101_v30 = vcombine.low %v845_v12, %v849_v13  ;;  %v661_v28 = vld [vmem:[#allocation5 + $0x418] sm:$0xff] }
 0x1ab   : > { %3236 = vmatpush2.bf16.msra.mxu0 %v7163_v26  ;;  %3279 = vmatpush2.bf16.msra.mxu1 %v6909_v27  ;;  %v7102_v26 = vcombine.high %v845_v12, %v849_v13  ;;  %v709_v27 = vld [vmem:[#allocation5 + $0x598] sm:$0xff] }
 0x1ac   : > { %3237 = vmatprep.subr.bf16.mxu0 %v7156_v24  ;;  %3280 = vmatprep.subr.bf16.mxu1 %v6902_v25  ;;  %v713_v24 = vld [vmem:[#allocation5 + $0x5b8] sm:$0xff] }
 0x1ad   : > { %v837_v25 = vld [vmem:[#allocation5 + $0x998] sm:$0xff]  ;;  %v6966_v31 = vcombine.high %v709_v27, %v713_v24  ;;  %v6965_v35 = vcombine.low %v709_v27, %v713_v24 }
 0x1ae   : > { %v7093_v38 = vcombine.low %v837_v25, %v841_v19  ;;  %v665_v22 = vld [vmem:[#allocation5 + $0x438] sm:$0xff] }
 0x1af   : > { %3238 = vmatpush2.bf16.msra.mxu0 %v7155_v32  ;;  %3281 = vmatpush2.bf16.msra.mxu1 %v6901_v33  ;;  %v7094_v32 = vcombine.high %v837_v25, %v841_v19  ;;  %v701_v33 = vld [vmem:[#allocation5 + $0x558] sm:$0xff]  ;;  %v6918_v9 = vcombine.high %v661_v28, %v665_v22 }
 0x1b0   : > { %3239 = vmatprep.subr.bf16.mxu0 %v7148_v36  ;;  %3282 = vmatprep.subr.bf16.mxu1 %v6894_v37  ;;  %v705_v36 = vld [vmem:[#allocation5 + $0x578] sm:$0xff] }
 0x1b1   : > { %v829_v37 = vld [vmem:[#allocation5 + $0x958] sm:$0xff]  ;;  %v6958_v39 = vcombine.high %v701_v33, %v705_v36  ;;  %v6957_v45 = vcombine.low %v701_v33, %v705_v36 }
 0x1b2   : > { %v781_v12 = vld [vmem:[#allocation5 + $0x7d8] sm:$0xff] }
 0x1b3   : > { %3240 = vmatpush2.bf16.msra.mxu0 %v7147_v40  ;;  %3283 = vmatpush2.bf16.msra.mxu1 %v6893_v41  ;;  %v7086_v40 = vcombine.high %v829_v37, %v833_v34  ;;  %v693_v41 = vld [vmem:[#allocation5 + $0x518] sm:$0xff] }
 0x1b4   : > { %3241 = vmatprep.subr.bf16.mxu0 %v7140_v42  ;;  %3284 = vmatprep.subr.bf16.mxu1 %v6886_v43  ;;  %v697_v42 = vld [vmem:[#allocation5 + $0x538] sm:$0xff] }
 0x1b5   : > { %v821_v43 = vld [vmem:[#allocation5 + $0x918] sm:$0xff]  ;;  %v6950_v4 = vcombine.high %v693_v41, %v697_v42  ;;  %v6949_v48 = vcombine.low %v693_v41, %v697_v42 }
 0x1b6   : > { %v7078_v46 = vcombine.high %v821_v43, %v825_v44  ;;  %v785_v13 = vld [vmem:[#allocation5 + $0x7f8] sm:$0xff] }
 0x1b7   : > { %3242 = vmatpush2.bf16.msra.mxu0 %v7139_v58  ;;  %3285 = vmatpush2.bf16.msra.mxu1 %v6885_v0  ;;  %v685_v58 = vld [vmem:[#allocation5 + $0x4d8] sm:$0xff]  ;;  %v7038_v27 = vcombine.high %v781_v12, %v785_v13 }
 0x1b8   : > { %3243 = vmatprep.subr.bf16.mxu0 %v7132_v47  ;;  %3286 = vmatprep.subr.bf16.mxu1 %v6878_v59  ;;  %v689_v0 = vld [vmem:[#allocation5 + $0x4f8] sm:$0xff] }
 0x1b9   : > { %v813_v47 = vld [vmem:[#allocation5 + $0x8d8] sm:$0xff]  ;;  %v6942_v5 = vcombine.high %v685_v58, %v689_v0 }
 0x1ba   : > { %v817_v59 = vld [vmem:[#allocation5 + $0x8f8] sm:$0xff] }
 0x1bb   : > { %3244 = vmatpush2.bf16.msra.mxu0 %v7131_v20  ;;  %3287 = vmatpush2.bf16.msra.mxu1 %v6877_v16  ;;  %v805_v20 = vld [vmem:[#allocation5 + $0x898] sm:$0xff] }
 0x1bc   : > { %3245 = vmatprep.subr.bf16.mxu0 %v7124_v21  ;;  %3288 = vmatprep.subr.bf16.mxu1 %v6870_v51  ;;  %v809_v16 = vld [vmem:[#allocation5 + $0x8b8] sm:$0xff]  ;;  %v6941_v21 = vcombine.low %v685_v58, %v689_v0  ;;  %v7069_v51 = vcombine.low %v813_v47, %v817_v59 }
 0x1bd   : > { %v7062_v55 = vcombine.high %v805_v20, %v809_v16  ;;  %v773_v25 = vld [vmem:[#allocation5 + $0x798] sm:$0xff] }
 0x1be   : > { %v777_v19 = vld [vmem:[#allocation5 + $0x7b8] sm:$0xff] }
 0x1bf   : > { %3246 = vmatpush2.bf16.msra.mxu0 %v7123_v60  ;;  %3289 = vmatpush2.bf16.msra.mxu1 %v6869_v53  ;;  %v797_v60 = vld [vmem:[#allocation5 + $0x858] sm:$0xff]  ;;  %v7030_v33 = vcombine.high %v773_v25, %v777_v19 }
 0x1c0   : > { %3247 = vmatprep.subr.bf16.mxu0 %v7116_v61  ;;  %3290 = vmatprep.subr.bf16.mxu1 %v6862_v62  ;;  %v801_v53 = vld [vmem:[#allocation5 + $0x878] sm:$0xff]  ;;  %v6933_v61 = vcombine.low %v677_v50, %v681_v15  ;;  %v7061_v62 = vcombine.low %v805_v20, %v809_v16 }
 0x1c1   : > { %v7054_v3 = vcombine.high %v797_v60, %v801_v53  ;;  %v741_v20 = vld [vmem:[#allocation5 + $0x698] sm:$0xff] }
 0x1c2   : > { %v745_v16 = vld [vmem:[#allocation5 + $0x6b8] sm:$0xff] }
 0x1c3   : > { %3248 = vmatpush2.bf16.msra.mxu0 %v7115_v23  ;;  %3291 = vmatpush2.bf16.msra.mxu1 %v6861_v2  ;;  %v789_v23 = vld [vmem:[#allocation5 + $0x818] sm:$0xff] }
 0x1c4   : > { %3249 = vmatprep.subr.bf16.mxu0 %v7108_v17  ;;  %3292 = vmatprep.subr.bf16.mxu1 %v6854_v8  ;;  %v793_v2 = vld [vmem:[#allocation5 + $0x838] sm:$0xff]  ;;  %v6925_v17 = vcombine.low %v669_v56, %v673_v57  ;;  %v7053_v8 = vcombine.low %v797_v60, %v801_v53  ;;  %v6998_v56 = vcombine.high %v741_v20, %v745_v16 }
 0x1c5   : > { %v7046_v11 = vcombine.high %v789_v23, %v793_v2  ;;  %v733_v60 = vld [vmem:[#allocation5 + $0x658] sm:$0xff] }
 0x1c6   : > { %v737_v53 = vld [vmem:[#allocation5 + $0x678] sm:$0xff] }
 0x1c7   : > { %3250 = vmatpush2.bf16.msra.mxu0 %v7107_v63  ;;  %3293 = vmatpush2.bf16.msra.mxu1 %v6853_v18  ;;  %v909_v63 = vld [vmem:[#allocation5 + $0xbd8] sm:$0xff] }
 0x1c8   : > { %3305 = vmatprep.subr.bf16.mxu0 %v6974_v7  ;;  %3348 = vmatprep.subr.bf16.mxu1 %v7102_v26  ;;  %v913_v18 = vld [vmem:[#allocation5 + $0xbf8] sm:$0xff]  ;;  %v6917_v7 = vcombine.low %v661_v28, %v665_v22  ;;  %v7045_v26 = vcombine.low %v789_v23, %v793_v2  ;;  %v6990_v28 = vcombine.high %v733_v60, %v737_v53 }
 0x1c9   : > { %v7166_v24 = vcombine.high %v909_v63, %v913_v18  ;;  %v725_v23 = vld [vmem:[#allocation5 + $0x618] sm:$0xff] }
 0x1ca   : > { %3252 = vmatmul.mubr.bf16.vlgmr.msra.gmra.mxu0 %v8909_v49  ;;  %3295 = vmatmul.mubr.bf16.vlgmr.msra.gmra.mxu1 %v8891_v54  ;;  %v7085_v54 = vcombine.low %v829_v37, %v833_v34  ;;  %v765_v37 = vld [vmem:[#allocation5 + $0x758] sm:$0xff] }
 0x1cb   : > { %3306 = vmatpush1.bf16.msra.mxu0 %v6973_v29  ;;  %3349 = vmatpush1.bf16.msra.mxu1 %v7101_v30  ;;  %v901_v29 = vld [vmem:[#allocation5 + $0xb98] sm:$0xff] }
 0x1cc   : > { %3307 = vmatprep.subr.bf16.mxu0 %v6966_v31  ;;  %3350 = vmatprep.subr.bf16.mxu1 %v7094_v32  ;;  %v905_v30 = vld [vmem:[#allocation5 + $0xbb8] sm:$0xff]  ;;  %v7037_v31 = vcombine.low %v781_v12, %v785_v13  ;;  %v7165_v32 = vcombine.low %v909_v63, %v913_v18 }
 0x1cd   : > { %3337 = vmatprep.mubr.bf16.mxu0 %v8836_v10  ;;  %3380 = vmatprep.mubr.bf16.mxu1 %v8895_v14  ;;  %v7077_v10 = vcombine.low %v821_v43, %v825_v44  ;;  %v7070_v14 = vcombine.high %v813_v47, %v817_v59  ;;  %v7158_v36 = vcombine.high %v901_v29, %v905_v30  ;;  %v769_v34 = vld [vmem:[#allocation5 + $0x778] sm:$0xff] }
 0x1ce   : > { %v7022_v41 = vcombine.high %v765_v37, %v769_v34  ;;  %v757_v43 = vld [vmem:[#allocation5 + $0x718] sm:$0xff] }
 0x1cf   : > { %3308 = vmatpush1.bf16.msra.mxu0 %v6965_v35  ;;  %3351 = vmatpush1.bf16.msra.mxu1 %v7093_v38  ;;  %v893_v35 = vld [vmem:[#allocation5 + $0xb58] sm:$0xff] }
 0x1d0   : > { %3309 = vmatprep.subr.bf16.mxu0 %v6958_v39  ;;  %3352 = vmatprep.subr.bf16.mxu1 %v7086_v40  ;;  %v897_v38 = vld [vmem:[#allocation5 + $0xb78] sm:$0xff]  ;;  %v7029_v39 = vcombine.low %v773_v25, %v777_v19  ;;  %v7157_v40 = vcombine.low %v901_v29, %v905_v30 }
 0x1d1   : > { %v7150_v42 = vcombine.high %v893_v35, %v897_v38  ;;  %v761_v44 = vld [vmem:[#allocation5 + $0x738] sm:$0xff] }
 0x1d2   : > { %v7014_v58 = vcombine.high %v757_v43, %v761_v44  ;;  %v749_v47 = vld [vmem:[#allocation5 + $0x6d8] sm:$0xff] }
 0x1d3   : > { %3310 = vmatpush1.bf16.msra.mxu0 %v6957_v45  ;;  %3353 = vmatpush1.bf16.msra.mxu1 %v7085_v54  ;;  %v885_v45 = vld [vmem:[#allocation5 + $0xb18] sm:$0xff] }
 0x1d4   : > { %3311 = vmatprep.subr.bf16.mxu0 %v6950_v4  ;;  %3354 = vmatprep.subr.bf16.mxu1 %v7078_v46  ;;  %v889_v54 = vld [vmem:[#allocation5 + $0xb38] sm:$0xff]  ;;  %v7021_v4 = vcombine.low %v765_v37, %v769_v34  ;;  %v7149_v46 = vcombine.low %v893_v35, %v897_v38 }
 0x1d5   : > { %v7142_v0 = vcombine.high %v885_v45, %v889_v54  ;;  %v753_v59 = vld [vmem:[#allocation5 + $0x6f8] sm:$0xff] }
 0x1d6   : > { %v7006_v50 = vcombine.high %v749_v47, %v753_v59  ;;  %v729_v2 = vld [vmem:[#allocation5 + $0x638] sm:$0xff] }
 0x1d7   : > { %3312 = vmatpush1.bf16.msra.mxu0 %v6949_v48  ;;  %3355 = vmatpush1.bf16.msra.mxu1 %v7077_v10  ;;  %v877_v48 = vld [vmem:[#allocation5 + $0xad8] sm:$0xff]  ;;  %v6982_v12 = vcombine.high %v725_v23, %v729_v2  ;;  %v6981_v63 = vcombine.low %v725_v23, %v729_v2 }
 0x1d8   : > { %3313 = vmatprep.subr.bf16.mxu0 %v6942_v5  ;;  %3356 = vmatprep.subr.bf16.mxu1 %v7070_v14  ;;  %v881_v10 = vld [vmem:[#allocation5 + $0xaf8] sm:$0xff]  ;;  %v7013_v5 = vcombine.low %v757_v43, %v761_v44  ;;  %v7141_v14 = vcombine.low %v885_v45, %v889_v54 }
 0x1d9   : > { %v7134_v15 = vcombine.high %v877_v48, %v881_v10  ;;  %v507_v45 = vld [vmem:[#allocation8] ss:$8 sm:$0xf] }
 0x1da   : > { %v508_v54 = vld [vmem:[#allocation8] ss:$8 sm:$0xf0] }
 0x1db   : > { %3314 = vmatpush1.bf16.msra.mxu0 %v6941_v21  ;;  %3357 = vmatpush1.bf16.msra.mxu1 %v7069_v51  ;;  %v869_v21 = vld [vmem:[#allocation5 + $0xa98] sm:$0xff] }
 0x1dc   : > { %3315 = vmatprep.subr.bf16.mxu0 %v6934_v52  ;;  %3358 = vmatprep.subr.bf16.mxu1 %v7062_v55  ;;  %v873_v51 = vld [vmem:[#allocation5 + $0xab8] sm:$0xff]  ;;  %v7005_v52 = vcombine.low %v749_v47, %v753_v59  ;;  %v7133_v55 = vcombine.low %v877_v48, %v881_v10 }
 0x1dd   : > { %v7126_v57 = vcombine.high %v869_v21, %v873_v51 }
 0x1df   : > { %3316 = vmatpush1.bf16.msra.mxu0 %v6933_v61  ;;  %3359 = vmatpush1.bf16.msra.mxu1 %v7061_v62  ;;  %v861_v61 = vld [vmem:[#allocation5 + $0xa58] sm:$0xff] }
 0x1e0   : > { %3317 = vmatprep.subr.bf16.mxu0 %v6926_v1  ;;  %3360 = vmatprep.subr.bf16.mxu1 %v7054_v3  ;;  %v865_v62 = vld [vmem:[#allocation5 + $0xa78] sm:$0xff]  ;;  %v6997_v1 = vcombine.low %v741_v20, %v745_v16  ;;  %v7125_v3 = vcombine.low %v869_v21, %v873_v51 }
 0x1e1   : > { %v7118_v22 = vcombine.high %v861_v61, %v865_v62 }
 0x1e3   : > { %3318 = vmatpush1.bf16.msra.mxu0 %v6925_v17  ;;  %3361 = vmatpush1.bf16.msra.mxu1 %v7053_v8  ;;  %v853_v17 = vld [vmem:[#allocation5 + $0xa18] sm:$0xff] }
 0x1e4   : > { %3319 = vmatprep.subr.bf16.mxu0 %v6918_v9  ;;  %3362 = vmatprep.subr.bf16.mxu1 %v7046_v11  ;;  %v857_v8 = vld [vmem:[#allocation5 + $0xa38] sm:$0xff]  ;;  %v6989_v9 = vcombine.low %v733_v60, %v737_v53  ;;  %v7117_v11 = vcombine.low %v861_v61, %v865_v62 }
 0x1e5   : > { %v7110_v13 = vcombine.high %v853_v17, %v857_v8  ;;  %v7109_v18 = vcombine.low %v853_v17, %v857_v8 }
 0x1e7   : > { %3320 = vmatpush1.bf16.msra.mxu0 %v6917_v7  ;;  %3363 = vmatpush1.bf16.msra.mxu1 %v7045_v26  ;;  %v2909_v7 = vpop.f32.mrf.mxu0  ;;  %v2952_v26 = vpop.f32.mrf.mxu1 }
 0x1e8   : > { %3321 = vmatprep.subr.bf16.mxu0 %v7038_v27  ;;  %3364 = vmatprep.subr.bf16.mxu1 %v7166_v24 }
 0x1e9   : > { %v2911_v27 = vpop.f32.mrf.mxu0  ;;  %v2954_v24 = vpop.f32.mrf.mxu1 }
 0x1eb   : > { %3322 = vmatpush2.bf16.msra.mxu0 %v7037_v31  ;;  %3365 = vmatpush2.bf16.msra.mxu1 %v7165_v32  ;;  %v2913_v25 = vpop.f32.mrf.mxu0  ;;  %v8929_v19 = vpop.f32.mrf.mxu1 }
 0x1ec   : > { %3323 = vmatprep.subr.bf16.mxu0 %v7030_v33  ;;  %3366 = vmatprep.subr.bf16.mxu1 %v7158_v36 }
 0x1ed   : > { %v2915_v29 = vpop.f32.mrf.mxu0  ;;  %v2958_v30 = vpop.f32.mrf.mxu1 }
 0x1ef   : > { %3324 = vmatpush2.bf16.msra.mxu0 %v7029_v39  ;;  %3367 = vmatpush2.bf16.msra.mxu1 %v7157_v40  ;;  %v2995_v31 = vpop.f32.mrf.mxu0  ;;  %v3038_v32 = vpop.f32.mrf.mxu1 }
 0x1f0   : > { %3325 = vmatprep.subr.bf16.mxu0 %v7022_v41  ;;  %3368 = vmatprep.subr.bf16.mxu1 %v7150_v42  ;;  %v915_v41 = vlaneseq }
 0x1f1   : > { %v2997_v33 = vpop.f32.mrf.mxu0  ;;  %v3040_v36 = vpop.f32.mrf.mxu1 }
 0x1f2   : > { %v916_v44 = vshrl.u32 %v915_v41, 7 }
 0x1f3   : > { %3326 = vmatpush2.bf16.msra.mxu0 %v7021_v4  ;;  %3369 = vmatpush2.bf16.msra.mxu1 %v7149_v46  ;;  %v8931_v37 = vpop.f32.mrf.mxu0  ;;  %v3042_v34 = vpop.f32.mrf.mxu1 }
 0x1f4   : > { %3327 = vmatprep.subr.bf16.mxu0 %v7014_v58  ;;  %3370 = vmatprep.subr.bf16.mxu1 %v7142_v0  ;;  %v8935_v58 = vor.u32 %v508_v54, %v507_v45  ;;  %v8937_v0 = vsub.s32 1, %v916_v44  ;;  %v8939_v59 = vsub.s32 0, %v916_v44  ;;  %v8941_v10 = vsub.s32 2, %v916_v44 }
 0x1f5   : > { %v3001_v35 = vpop.f32.mrf.mxu0  ;;  %v8949_v16 = vsub.s32 3, %v916_v44  ;;  %v8951_v51 = vsub.s32 4, %v916_v44 }
 0x1f6   : > { %v926_v20 = vrot.slane %v8935_v58, %v8941_v10 }
 0x1f7   : > { %3328 = vmatpush2.bf16.msra.mxu0 %v7013_v5  ;;  %3371 = vmatpush2.bf16.msra.mxu1 %v7141_v14  ;;  %v922_v5 = vrot.slane %v8935_v58, %v8937_v0  ;;  %v930_v60 = vrot.slane %v8935_v58, %v8949_v16  ;;  %v934_v62 = vrot.slane %v8935_v58, %v8951_v51 }
 0x1f8   : > { %3329 = vmatprep.subr.bf16.mxu0 %v7006_v50  ;;  %3372 = vmatprep.subr.bf16.mxu1 %v7134_v15  ;;  %v918_v50 = vrot.slane %v8935_v58, %v8939_v59 }
 0x1f9   : > { %v2912_v21 = vadd.f32 %v2911_v27, %v922_v5  ;;  %v3041_v8 = vadd.f32 %v3040_v36, %v930_v60  ;;  %v8972_v36 = vsub.s32 6, %v916_v44 }
 0x1fa   : > { %v2914_v2 = vadd.f32 %v2913_v25, %v918_v50 }
 0x1fb   : > { %3330 = vmatpush2.bf16.msra.mxu0 %v7005_v52  ;;  %3373 = vmatpush2.bf16.msra.mxu1 %v7133_v55  ;;  %v2910_v55 = vadd.f32 %v2909_v7, %v918_v50  ;;  %v2955_v53 = vadd.f32 %v2954_v24, %v2912_v21 }
 0x1fc   : > { %3331 = vmatprep.subr.bf16.mxu0 %v6998_v56  ;;  %3374 = vmatprep.subr.bf16.mxu1 %v7126_v57  ;;  %v3039_v57 = vadd.f32 %v3038_v32, %v926_v20 }
 0x1fd   : > { %v8959_v17 = vadd.f32 %v2997_v33, %v2955_v53 }
 0x1ff   : > { %3332 = vmatpush2.bf16.msra.mxu0 %v6997_v1  ;;  %3375 = vmatpush2.bf16.msra.mxu1 %v7125_v3  ;;  %v8957_v1 = vsub.s32 5, %v916_v44 }
 0x200   : > { %3333 = vmatprep.subr.bf16.mxu0 %v6990_v28  ;;  %3376 = vmatprep.subr.bf16.mxu1 %v7118_v22  ;;  %v2953_v28 = vadd.f32 %v2952_v26, %v2910_v55  ;;  %v2916_v22 = vadd.f32 %v2915_v29, %v922_v5  ;;  %v2957_v29 = vadd.f32 %v8929_v19, %v2914_v2 }
 0x201   : > { %v938_v27 = vrot.slane %v8935_v58, %v8957_v1 }
 0x202   : > { %v2959_v24 = vadd.f32 %v2958_v30, %v2916_v22  ;;  %v8980_v19 = vadd.f32 %v8931_v37, %v2957_v29 }
 0x203   : > { %3334 = vmatpush2.bf16.msra.mxu0 %v6989_v9  ;;  %3377 = vmatpush2.bf16.msra.mxu1 %v7117_v11  ;;  %v8961_v11 = vadd.f32 %v2995_v31, %v2953_v28 }
 0x204   : > { %3335 = vmatprep.subr.bf16.mxu0 %v6982_v12  ;;  %3378 = vmatprep.subr.bf16.mxu1 %v7110_v13  ;;  %v3043_v12 = vadd.f32 %v3042_v34, %v926_v20  ;;  %v8970_v33 = vadd.f32 %v3001_v35, %v2959_v24  ;;  %v8974_v34 = vsub.s32 7, %v916_v44 }
 0x205   : > { %v3391_v25 = vadd.f32 %v8959_v17, %v8961_v11 }
 0x206   : > { %v3400_v44 = vadd.f32 %v8970_v33, %v8980_v19  ;;  %v946_v37 = vrot.slane %v8935_v58, %v8974_v34 }
 0x207   : > { %3336 = vmatpush2.bf16.msra.mxu0 %v6981_v63  ;;  %3379 = vmatpush2.bf16.msra.mxu1 %v7109_v18 }
 0x20a   : > { %3338 = vmatmul.mubr.bf16.vlgmr.msra.gmra.mxu0 %v8893_v6  ;;  %3381 = vmatmul.mubr.bf16.vlgmr.msra.gmra.mxu1 %v8909_v49  ;;  %v3044_v6 = vpop.f32.mrf.mxu1  ;;  %v3081_v38 = vpop.f32.mrf.mxu0 }
 0x20b   : > { %v3082_v61 = vadd.f32 %v3081_v38, %v3039_v57  ;;  %v3045_v31 = vadd.f32 %v3044_v6, %v930_v60 }
 0x20c   : > { %v3124_v49 = vpop.f32.mrf.mxu1  ;;  %v3083_v39 = vpop.f32.mrf.mxu0 }
 0x20d   : > { %v8963_v63 = vadd.f32 %v3124_v49, %v3082_v61  ;;  %v3084_v18 = vadd.f32 %v3083_v39, %v3041_v8 }
 0x20e   : > { %v3126_v40 = vpop.f32.mrf.mxu1  ;;  %v3085_v42 = vpop.f32.mrf.mxu0 }
 0x20f   : > { %v3086_v26 = vadd.f32 %v3085_v42, %v3043_v12  ;;  %v3392_v49 = vadd.f32 %v3391_v25, %v8963_v63  ;;  %v8977_v39 = vadd.f32 %v3126_v40, %v3084_v18 }
 0x210   : > { %v3128_v43 = vpop.f32.mrf.mxu1  ;;  %v3087_v4 = vpop.f32.mrf.mxu0 }
 0x211   : > { %v8982_v42 = vadd.f32 %v3128_v43, %v3086_v26  ;;  %v3088_v45 = vadd.f32 %v3087_v4, %v3045_v31 }
 0x212   : > { %v8933_v46 = vpop.f32.mrf.mxu1 }
 0x213   : > { %v3401_v43 = vadd.f32 %v3400_v44, %v8982_v42  ;;  %v8995_v4 = vadd.f32 %v8933_v46, %v3088_v45  ;;  %v7676_v45 = vld [vmem:[#allocation7 + $0xe0] ss:$16 sps:$4 sm:$0xff]   ;;  %v7681_v44 = vld [vmem:[#allocation7 + $0x2e4] ss:$16 sps:$4 sm:$0xff]  }
 0x214   : > { %5206 = vmatprep.subr.bf16.mxu1 %v7681_v44 }
 0x215   : > { %v3402_v53 = vadd.f32 %v3401_v43, %v8995_v4  ;;  %v7693_v43 = vld [vmem:[#allocation7 + $0x2a4] ss:$16 sps:$4 sm:$0xff]  }
 0x24a   : > { %v3167_v47 = vpop.f32.mrf.mxu0  ;;  %v3210_v48 = vpop.f32.mrf.mxu1 }
 0x24b   : > { %v3168_v7 = vadd.f32 %v3167_v47, %v934_v62  ;;  %v942_v47 = vrot.slane %v8935_v58, %v8972_v36 }
 0x24c   : > { %v3169_v14 = vpop.f32.mrf.mxu0  ;;  %v3212_v15 = vpop.f32.mrf.mxu1 }
 0x24d   : > { %v3211_v30 = vadd.f32 %v3210_v48, %v3168_v7  ;;  %v3170_v41 = vadd.f32 %v3169_v14, %v938_v27  ;;  %v3393_v48 = vadd.f32 %v3392_v49, %v8977_v39 }
 0x24e   : > { %v3171_v52 = vpop.f32.mrf.mxu0  ;;  %v3214_v56 = vpop.f32.mrf.mxu1 }
 0x24f   : > { %v3172_v35 = vadd.f32 %v3171_v52, %v934_v62  ;;  %v3213_v5 = vadd.f32 %v3212_v15, %v3170_v41 }
 0x250   : > { %v3173_v3 = vpop.f32.mrf.mxu0  ;;  %v3216_v23 = vpop.f32.mrf.mxu1 }
 0x251   : > { %v3215_v14 = vadd.f32 %v3214_v56, %v3172_v35  ;;  %v3174_v50 = vadd.f32 %v3173_v3, %v938_v27  ;;  %v7678_v35 = vld [vmem:[#allocation7 + $0xe4] ss:$16 sps:$4 sm:$0xff]  }
 0x252   : > { %5163 = vmatprep.subr.bf16.mxu0 %v7678_v35 }
 0x253   : > { %v3217_v58 = vadd.f32 %v3216_v23, %v3174_v50  ;;  %5164 = vmatpush1.bf16.msra.mxu0 %v7676_v45  ;;  %v7691_v50 = vld [vmem:[#allocation7 + $0x2a0] ss:$16 sps:$4 sm:$0xff]  }
 0x28a   : > { %v3253_v9 = vpop.f32.mrf.mxu0  ;;  %v3296_v13 = vpop.f32.mrf.mxu1 }
 0x28b   : > { %v8984_v54 = vadd.f32 %v3253_v9, %v3211_v30  ;;  %v3297_v55 = vadd.f32 %v3296_v13, %v942_v47 }
 0x28c   : > { %v3255_v32 = vpop.f32.mrf.mxu0  ;;  %v3298_v38 = vpop.f32.mrf.mxu1 }
 0x28d   : > { %v3394_v20 = vadd.f32 %v3393_v48, %v8984_v54  ;;  %v8998_v21 = vadd.f32 %v3255_v32, %v3213_v5  ;;  %v3299_v61 = vadd.f32 %v3298_v38, %v946_v37  ;;  %v7682_v48 = vld [vmem:[#allocation7 + $0xc0] ss:$16 sps:$4 sm:$0xff]  }
 0x28e   : > { %v3257_v6 = vpop.f32.mrf.mxu0  ;;  %v3300_v40 = vpop.f32.mrf.mxu1  ;;  %v7685_v5 = vld [vmem:[#allocation7 + $0x2c0] ss:$16 sps:$4 sm:$0xff]  }
 0x28f   : > { %v9000_v57 = vadd.f32 %v3257_v6, %v3215_v14  ;;  %v3395_v46 = vadd.f32 %v3394_v20, %v8998_v21  ;;  %v3301_v56 = vadd.f32 %v3300_v40, %v942_v47  ;;  %v7679_v6 = vld [vmem:[#allocation7 + $0x2e0] ss:$16 sps:$4 sm:$0xff]   ;;  %v7684_v47 = vld [vmem:[#allocation7 + $0xc4] ss:$16 sps:$4 sm:$0xff]  }
 0x290   : > { %v3259_v52 = vpop.f32.mrf.mxu0  ;;  %v3302_v60 = vpop.f32.mrf.mxu1  ;;  %v7687_v40 = vld [vmem:[#allocation7 + $0x2c4] ss:$16 sps:$4 sm:$0xff]   ;;  %5207 = vmatpush1.bf16.msra.mxu1 %v7679_v6  ;;  %5165 = vmatprep.subr.bf16.mxu0 %v7684_v47  ;;  %v7688_v14 = vld [vmem:[#allocation7 + $0xa0] ss:$16 sps:$4 sm:$0xff]  }
 0x291   : > { %v3403_v22 = vadd.f32 %v3402_v53, %v9000_v57  ;;  %v9005_v2 = vadd.f32 %v3259_v52, %v3217_v58  ;;  %v3303_v18 = vadd.f32 %v3302_v60, %v946_v37  ;;  %v7690_v37 = vld [vmem:[#allocation7 + $0xa4] ss:$16 sps:$4 sm:$0xff]   ;;  %5208 = vmatprep.subr.bf16.mxu1 %v7687_v40  ;;  %5166 = vmatpush1.bf16.msra.mxu0 %v7682_v48  ;;  %v7697_v60 = vld [vmem:[#allocation7 + $0x280] ss:$16 sps:$4 sm:$0xff]  }
 0x292   : > { %5167 = vmatprep.subr.bf16.mxu0 %v7690_v37  ;;  %v7696_v20 = vld [vmem:[#allocation7 + $0x84] ss:$16 sps:$4 sm:$0xff]   ;;  %v7700_v58 = vld [vmem:[#allocation7 + $0x60] ss:$16 sps:$4 sm:$0xff]  }
 0x293   : > { %v3404_v29 = vadd.f32 %v3403_v22, %v9005_v2  ;;  %v7699_v52 = vld [vmem:[#allocation7 + $0x284] ss:$16 sps:$4 sm:$0xff]  }
 0x294   : > { %5209 = vmatpush1.bf16.msra.mxu1 %v7685_v5  ;;  %v7705_v53 = vld [vmem:[#allocation7 + $0x264] ss:$16 sps:$4 sm:$0xff]  }
 0x295   : > { %5210 = vmatprep.subr.bf16.mxu1 %v7693_v43  ;;  %5168 = vmatpush1.bf16.msra.mxu0 %v7688_v14  ;;  %v7717_v22 = vld [vmem:[#allocation7 + $0x224] ss:$16 sps:$4 sm:$0xff]  }
 0x296   : > { %5169 = vmatprep.subr.bf16.mxu0 %v7696_v20 }
 0x298   : > { %5211 = vmatpush1.bf16.msra.mxu1 %v7691_v50 }
 0x299   : > { %5212 = vmatprep.subr.bf16.mxu1 %v7699_v52 }
 0x29c   : > { %5213 = vmatpush1.bf16.msra.mxu1 %v7697_v60 }
 0x29d   : > { %5214 = vmatprep.subr.bf16.mxu1 %v7705_v53 }
 0x2ca   : > { %v3339_v15 = vpop.f32.mrf.mxu0  ;;  %v3382_v28 = vpop.f32.mrf.mxu1 }
 0x2cb   : > { %v3340_v62 = vadd.f32 %v3339_v15, %v3297_v55  ;;  %v7694_v55 = vld [vmem:[#allocation7 + $0x80] ss:$16 sps:$4 sm:$0xff]   ;;  %v7702_v15 = vld [vmem:[#allocation7 + $0x64] ss:$16 sps:$4 sm:$0xff]  }
 0x2cc   : > { %v3341_v3 = vpop.f32.mrf.mxu0  ;;  %v3384_v12 = vpop.f32.mrf.mxu1  ;;  %5170 = vmatpush1.bf16.msra.mxu0 %v7694_v55 }
 0x2cd   : > { %v9007_v8 = vadd.f32 %v3382_v28, %v3340_v62  ;;  %v3342_v9 = vadd.f32 %v3341_v3, %v3299_v61  ;;  %5171 = vmatprep.subr.bf16.mxu0 %v7702_v15  ;;  %v7703_v61 = vld [vmem:[#allocation7 + $0x260] ss:$16 sps:$4 sm:$0xff]   ;;  %v7708_v62 = vld [vmem:[#allocation7 + $0x44] ss:$16 sps:$4 sm:$0xff]  }
 0x2ce   : > { %v3343_v13 = vpop.f32.mrf.mxu0  ;;  %v3386_v27 = vpop.f32.mrf.mxu1  ;;  %v7711_v28 = vld [vmem:[#allocation7 + $0x244] ss:$16 sps:$4 sm:$0xff]   ;;  %5215 = vmatpush1.bf16.msra.mxu1 %v7703_v61 }
 0x2cf   : > { %v9009_v7 = vadd.f32 %v3384_v12, %v3342_v9  ;;  %v3344_v23 = vadd.f32 %v3343_v13, %v3301_v56  ;;  %v3396_v24 = vadd.f32 %v3395_v46, %v9007_v8  ;;  %v7706_v46 = vld [vmem:[#allocation7 + $0x40] ss:$16 sps:$4 sm:$0xff]   ;;  %v7714_v3 = vld [vmem:[#allocation7 + $0x24] ss:$16 sps:$4 sm:$0xff]   ;;  %5216 = vmatprep.subr.bf16.mxu1 %v7711_v28 }
 0x2d0   : > { %v3345_v26 = vpop.f32.mrf.mxu0  ;;  %v3388_v38 = vpop.f32.mrf.mxu1  ;;  %5172 = vmatpush1.bf16.msra.mxu0 %v7700_v58  ;;  %v7709_v56 = vld [vmem:[#allocation7 + $0x240] ss:$16 sps:$4 sm:$0xff]   ;;  %v7720_v13 = vld [vmem:[#allocation7 + $0x4] ss:$16 sps:$4 sm:$0xff]  }
 0x2d1   : > { %v9013_v25 = vadd.f32 %v3386_v27, %v3344_v23  ;;  %v3346_v32 = vadd.f32 %v3345_v26, %v3303_v18  ;;  %v3397_v31 = vadd.f32 %v3396_v24, %v9009_v7  ;;  %5173 = vmatprep.subr.bf16.mxu0 %v7708_v62  ;;  %v7712_v9 = vld [vmem:[#allocation7 + $0x20] ss:$16 sps:$4 sm:$0xff]   ;;  %v7723_v18 = vld [vmem:[#allocation7 + $0x204] ss:$16 sps:$4 sm:$0xff]  }
 0x2d2   : > { %5217 = vmatpush1.bf16.msra.mxu1 %v7709_v56  ;;  %v7715_v12 = vld [vmem:[#allocation7 + $0x220] ss:$16 sps:$4 sm:$0xff]   ;;  %v7726_v24 = vld [vmem:[#allocation7 + $0x1e4] ss:$16 sps:$4 sm:$0xff]  }
 0x2d3   : > { %v3405_v49 = vadd.f32 %v3404_v29, %v9013_v25  ;;  %v9017_v30 = vadd.f32 %v3388_v38, %v3346_v32  ;;  %3398 = vadd.xlane.f32.xlu0 %v3397_v31  ;;  %5218 = vmatprep.subr.bf16.mxu1 %v7717_v22  ;;  %v7718_v23 = vld [vmem:[#allocation7] ss:$16 sps:$4 sm:$0xff]   ;;  %v7729_v26 = vld [vmem:[#allocation7 + $0x3e4] ss:$16 sps:$4 sm:$0xff]  }
 0x2d4   : > { %5174 = vmatpush1.bf16.msra.mxu0 %v7706_v46  ;;  %v7721_v27 = vld [vmem:[#allocation7 + $0x200] ss:$16 sps:$4 sm:$0xff]  }
 0x2d5   : > { %v3406_v41 = vadd.f32 %v3405_v49, %v9017_v30  ;;  %5175 = vmatprep.subr.bf16.mxu0 %v7714_v3  ;;  %v7724_v29 = vld [vmem:[#allocation7 + $0x1e0] ss:$16 sps:$4 sm:$0xff]  }
 0x2d6   : > { %5219 = vmatpush1.bf16.msra.mxu1 %v7715_v12  ;;  %v7727_v32 = vld [vmem:[#allocation7 + $0x3e0] ss:$16 sps:$4 sm:$0xff]  }
 0x2d7   : > { %3407 = vadd.xlane.f32.xlu0 %v3406_v41  ;;  %5220 = vmatprep.subr.bf16.mxu1 %v7723_v18 }
 0x2d8   : > { %5176 = vmatpush1.bf16.msra.mxu0 %v7712_v9 }
 0x2d9   : > { %5177 = vmatprep.subr.bf16.mxu0 %v7720_v13 }
 0x2da   : > { %5221 = vmatpush1.bf16.msra.mxu1 %v7721_v27  ;;  %v7732_v27 = vld [vmem:[#allocation7 + $0x1c4] ss:$16 sps:$4 sm:$0xff]  }
 0x2db   : > { %5222 = vmatprep.subr.bf16.mxu1 %v7729_v26  ;;  %v7733_v26 = vld [vmem:[#allocation7 + $0x3c0] ss:$16 sps:$4 sm:$0xff]  }
 0x2dc   : > { %5178 = vmatpush1.bf16.msra.mxu0 %v7718_v23 }
 0x2dd   : > { %5179 = vmatprep.subr.bf16.mxu0 %v7726_v24  ;;  %v7735_v24 = vld [vmem:[#allocation7 + $0x3c4] ss:$16 sps:$4 sm:$0xff]  }
 0x2de   : > { %5223 = vmatpush2.bf16.msra.mxu1 %v7727_v32  ;;  %v7741_v32 = vld [vmem:[#allocation7 + $0x3a4] ss:$16 sps:$4 sm:$0xff]  }
 0x2df   : > { %5224 = vmatprep.subr.bf16.mxu1 %v7735_v24 }
 0x2e0   : > { %5180 = vmatpush2.bf16.msra.mxu0 %v7724_v29  ;;  %v7738_v29 = vld [vmem:[#allocation7 + $0x1a4] ss:$16 sps:$4 sm:$0xff]  }
 0x2e1   : > { %5181 = vmatprep.subr.bf16.mxu0 %v7732_v27 }
 0x2e2   : > { %5225 = vmatpush2.bf16.msra.mxu1 %v7733_v26 }
 0x2e3   : > { %5226 = vmatprep.subr.bf16.mxu1 %v7741_v32 }
 0x35c   : > { %v3399_v31 = vpop.xlane.xlu0 %3398 }
 0x35d   : > { %v3410_v38 = vmul.f32 0.0009765625, %v3399_v31  ;;  %v7736_v31 = vld [vmem:[#allocation7 + $0x1a0] ss:$16 sps:$4 sm:$0xff]  }
 0x35f   : > { %v9021_v49 = vsub.f32 %v8961_v11, %v3410_v38  ;;  %v9024_v41 = vsub.f32 %v8959_v17, %v3410_v38  ;;  %v9027_v45 = vsub.f32 %v8963_v63, %v3410_v38  ;;  %v9030_v44 = vsub.f32 %v8977_v39, %v3410_v38 }
 0x360   : > { %v3408_v35 = vpop.xlane.xlu0 %3407  ;;  %v9037_v11 = vsub.f32 %v8984_v54, %v3410_v38  ;;  %v9051_v37 = vsub.f32 %v8998_v21, %v3410_v38 }
 0x361   : > { %v3411_v6 = vmul.f32 0.0009765625, %v3408_v35  ;;  %v3428_v47 = vmul.f32 %v9021_v49, %v9021_v49  ;;  %v3429_v40 = vmul.f32 %v9024_v41, %v9024_v41  ;;  %v3430_v17 = vmul.f32 %v9027_v45, %v9027_v45  ;;  %v7742_v35 = vld [vmem:[#allocation7 + $0x180] ss:$16 sps:$4 sm:$0xff]  }
 0x362   : > { %v3431_v54 = vmul.f32 %v9030_v44, %v9030_v44  ;;  %v3433_v60 = vmul.f32 %v9051_v37, %v9051_v37 }
 0x363   : > { %v3444_v48 = vadd.f32 %v3429_v40, %v3428_v47  ;;  %v9042_v63 = vsub.f32 %v8980_v19, %v3411_v6  ;;  %v9045_v5 = vsub.f32 %v8970_v33, %v3411_v6  ;;  %v9048_v39 = vsub.f32 %v8982_v42, %v3411_v6  ;;  %v7745_v47 = vld [vmem:[#allocation7 + $0x380] ss:$16 sps:$4 sm:$0xff]   ;;  %v7747_v40 = vld [vmem:[#allocation7 + $0x384] ss:$16 sps:$4 sm:$0xff]  }
 0x364   : > { %v9058_v50 = vsub.f32 %v8995_v4, %v3411_v6  ;;  %v9063_v19 = vsub.f32 %v9007_v8, %v3410_v38  ;;  %v3432_v42 = vmul.f32 %v9037_v11, %v9037_v11  ;;  %v9068_v20 = vsub.f32 %v9000_v57, %v3411_v6 }
 0x365   : > { %v3445_v43 = vadd.f32 %v3444_v48, %v3430_v17  ;;  %v3436_v14 = vmul.f32 %v9042_v63, %v9042_v63  ;;  %v3437_v33 = vmul.f32 %v9045_v5, %v9045_v5  ;;  %v3438_v52 = vmul.f32 %v9048_v39, %v9048_v39  ;;  %v7750_v17 = vld [vmem:[#allocation7 + $0x164] ss:$16 sps:$4 sm:$0xff]  }
 0x366   : > { %v9073_v4 = vsub.f32 %v9009_v7, %v3410_v38  ;;  %v9078_v8 = vsub.f32 %v9005_v2, %v3411_v6  ;;  %v3439_v53 = vmul.f32 %v9058_v50, %v9058_v50  ;;  %v3434_v57 = vmul.f32 %v9063_v19, %v9063_v19  ;;  %v7739_v38 = vld [vmem:[#allocation7 + $0x3a0] ss:$16 sps:$4 sm:$0xff]   ;;  %v7753_v48 = vld [vmem:[#allocation7 + $0x364] ss:$16 sps:$4 sm:$0xff]  }
 0x367   : > { %v3446_v21 = vadd.f32 %v3445_v43, %v3431_v54  ;;  %v3453_v55 = vadd.f32 %v3437_v33, %v3436_v14  ;;  %v9085_v62 = vsub.f32 %v9013_v25, %v3411_v6  ;;  %v3440_v7 = vmul.f32 %v9068_v20, %v9068_v20  ;;  %5227 = vmatpush2.bf16.msra.mxu1 %v7739_v38  ;;  %v7748_v54 = vld [vmem:[#allocation7 + $0x160] ss:$16 sps:$4 sm:$0xff]   ;;  %v7756_v14 = vld [vmem:[#allocation7 + $0x144] ss:$16 sps:$4 sm:$0xff]  }
 0x368   : > { %v3435_v46 = vmul.f32 %v9073_v4, %v9073_v4  ;;  %v9092_v56 = vsub.f32 %v9017_v30, %v3411_v6  ;;  %v3441_v3 = vmul.f32 %v9078_v8, %v9078_v8  ;;  %v7730_v30 = vld [vmem:[#allocation7 + $0x1c0] ss:$16 sps:$4 sm:$0xff]   ;;  %v7744_v6 = vld [vmem:[#allocation7 + $0x184] ss:$16 sps:$4 sm:$0xff]   ;;  %5228 = vmatprep.subr.bf16.mxu1 %v7747_v40 }
 0x369   : > { %v3447_v15 = vadd.f32 %v3446_v21, %v3432_v42  ;;  %v3454_v58 = vadd.f32 %v3453_v55, %v3438_v52  ;;  %v3442_v25 = vmul.f32 %v9085_v62, %v9085_v62  ;;  %5182 = vmatpush2.bf16.msra.mxu0 %v7730_v30  ;;  %v7751_v43 = vld [vmem:[#allocation7 + $0x360] ss:$16 sps:$4 sm:$0xff]   ;;  %v7759_v33 = vld [vmem:[#allocation7 + $0x344] ss:$16 sps:$4 sm:$0xff]  }
 0x36a   : > { %v3443_v13 = vmul.f32 %v9092_v56, %v9092_v56  ;;  %5183 = vmatprep.subr.bf16.mxu0 %v7738_v29  ;;  %v7754_v42 = vld [vmem:[#allocation7 + $0x140] ss:$16 sps:$4 sm:$0xff]   ;;  %v7762_v52 = vld [vmem:[#allocation7 + $0x124] ss:$16 sps:$4 sm:$0xff]  }
 0x36b   : > { %v3448_v61 = vadd.f32 %v3447_v15, %v3433_v60  ;;  %v3455_v28 = vadd.f32 %v3454_v58, %v3439_v53  ;;  %5229 = vmatpush2.bf16.msra.mxu1 %v7745_v47  ;;  %v7757_v21 = vld [vmem:[#allocation7 + $0x340] ss:$16 sps:$4 sm:$0xff]   ;;  %v7765_v55 = vld [vmem:[#allocation7 + $0x324] ss:$16 sps:$4 sm:$0xff]  }
 0x36c   : > { %5230 = vmatprep.subr.bf16.mxu1 %v7753_v48  ;;  %v7760_v60 = vld [vmem:[#allocation7 + $0x120] ss:$16 sps:$4 sm:$0xff]   ;;  %v7768_v53 = vld [vmem:[#allocation7 + $0x104] ss:$16 sps:$4 sm:$0xff]  }
 0x36d   : > { %v3449_v2 = vadd.f32 %v3448_v61, %v3434_v57  ;;  %v3456_v22 = vadd.f32 %v3455_v28, %v3440_v7  ;;  %5184 = vmatpush2.bf16.msra.mxu0 %v7736_v31  ;;  %v7763_v15 = vld [vmem:[#allocation7 + $0x320] ss:$16 sps:$4 sm:$0xff]   ;;  %v7771_v58 = vld [vmem:[#allocation7 + $0x304] ss:$16 sps:$4 sm:$0xff]  }
 0x36e   : > { %5185 = vmatprep.subr.bf16.mxu0 %v7744_v6  ;;  %v7766_v57 = vld [vmem:[#allocation7 + $0x100] ss:$16 sps:$4 sm:$0xff]   ;;  %v7774_v7 = vld [vmem:[#allocation7 + $0x4e4] ss:$16 sps:$4 sm:$0xff]  }
 0x36f   : > { %v3450_v9 = vadd.f32 %v3449_v2, %v3435_v46  ;;  %v3457_v12 = vadd.f32 %v3456_v22, %v3441_v3  ;;  %5231 = vmatpush2.bf16.msra.mxu1 %v7751_v43  ;;  %v7769_v61 = vld [vmem:[#allocation7 + $0x300] ss:$16 sps:$4 sm:$0xff]   ;;  %v7777_v28 = vld [vmem:[#allocation7 + $0x6e4] ss:$16 sps:$4 sm:$0xff]  }
 0x370   : > { %5232 = vmatprep.subr.bf16.mxu1 %v7759_v33 }
 0x371   : > { %3451 = vadd.xlane.f32.xlu1 %v3450_v9  ;;  %v3458_v18 = vadd.f32 %v3457_v12, %v3442_v25  ;;  %5186 = vmatpush2.bf16.msra.mxu0 %v7742_v35  ;;  %v511_v25 = vld [vmem:[#allocation8 + $0x1] ss:$8 sm:$0xf] }
 0x372   : > { %5187 = vmatprep.subr.bf16.mxu0 %v7750_v17  ;;  %v512_v12 = vld [vmem:[#allocation8 + $0x1] ss:$8 sm:$0xf0] }
 0x373   : > { %v3459_v23 = vadd.f32 %v3458_v18, %v3443_v13  ;;  %5233 = vmatpush2.bf16.msra.mxu1 %v7757_v21  ;;  %v515_v18 = vld [vmem:[#allocation8 + $0x2] ss:$8 sm:$0xf]  ;;  %v513_v27 = vor.u32 %v512_v12, %v511_v25 }
 0x374   : > { %5234 = vmatprep.subr.bf16.mxu1 %v7765_v55 }
 0x375   : > { %3460 = vadd.xlane.f32.xlu1 %v3459_v23  ;;  %5188 = vmatpush2.bf16.msra.mxu0 %v7748_v54  ;;  %v516_v23 = vld [vmem:[#allocation8 + $0x2] ss:$8 sm:$0xf0]  ;;  %v3504_v30 = vrot.slane %v513_v27, %v8951_v51  ;;  %v9102_v26 = vrot.slane %v513_v27, %v8972_v36  ;;  %v3492_v29 = vrot.slane %v513_v27, %v8937_v0 }
 0x376   : > { %5189 = vmatprep.subr.bf16.mxu0 %v7756_v14  ;;  %v517_v24 = vor.u32 %v516_v23, %v515_v18  ;;  %v3500_v32 = vrot.slane %v513_v27, %v8949_v16  ;;  %v3488_v31 = vrot.slane %v513_v27, %v8939_v59  ;;  %v3496_v38 = vrot.slane %v513_v27, %v8941_v10 }
 0x377   : > { %5235 = vmatpush2.bf16.msra.mxu1 %v7763_v15  ;;  %v3508_v35 = vrot.slane %v513_v27, %v8957_v1  ;;  %v3516_v17 = vrot.slane %v513_v27, %v8974_v34 }
 0x378   : > { %5236 = vmatprep.subr.bf16.mxu1 %v7771_v58  ;;  %v3549_v6 = vrot.slane %v517_v24, %v8937_v0  ;;  %v3557_v47 = vrot.slane %v517_v24, %v8949_v16  ;;  %v3545_v40 = vrot.slane %v517_v24, %v8939_v59  ;;  %v3553_v54 = vrot.slane %v517_v24, %v8941_v10 }
 0x379   : > { %5190 = vmatpush2.bf16.msra.mxu0 %v7754_v42  ;;  %v3565_v43 = vrot.slane %v517_v24, %v8957_v1  ;;  %v3573_v14 = vrot.slane %v517_v24, %v8974_v34  ;;  %v3561_v33 = vrot.slane %v517_v24, %v8951_v51 }
 0x37a   : > { %5191 = vmatprep.subr.bf16.mxu0 %v7762_v52 }
 0x37b   : > { %5237 = vmatpush2.bf16.msra.mxu1 %v7769_v61 }
 0x37c   : > { %5292 = vmatprep.subr.bf16.mxu1 %v7777_v28 }
 0x37d   : > { %5192 = vmatpush2.bf16.msra.mxu0 %v7760_v60 }
 0x37e   : > { %5193 = vmatprep.subr.bf16.mxu0 %v7768_v53 }
 0x381   : > { %5194 = vmatpush2.bf16.msra.mxu0 %v7766_v57 }
 0x382   : > { %5249 = vmatprep.subr.bf16.mxu0 %v7774_v7 }
 0x3fa   : > { %v3452_v46 = vpop.xlane.xlu1 %3451 }
 0x3fb   : > { %v3462_v2 = vmul.f32 0.0009765625, %v3452_v46 }
 0x3fd   : > { %v3464_v3 = vadd.f32 1e-05, %v3462_v2 }
 0x3fe   : > { %v3461_v22 = vpop.xlane.xlu1 %3460 }
 0x3ff   : > { %8252 = vrsqrt.f32 %v3464_v3  ;;  %v3463_v9 = vmul.f32 0.0009765625, %v3461_v22 }
 0x401   : > { %v3465_v13 = vadd.f32 1e-05, %v3463_v9 }
 0x403   : > { %8254 = vrsqrt.f32 %v3465_v13 }
 0x40c   : > { %v8253_v48 = vpop.eup %8252 }
 0x40d   : > { %v3469_v42 = vmul.f32 %v8253_v48, %v9024_v41  ;;  %v3471_v21 = vmul.f32 %v8253_v48, %v9030_v44  ;;  %v3468_v52 = vmul.f32 %v8253_v48, %v9021_v49  ;;  %v3470_v55 = vmul.f32 %v8253_v48, %v9027_v45 }
 0x40e   : > { %v3473_v60 = vmul.f32 %v8253_v48, %v9051_v37  ;;  %v3475_v15 = vmul.f32 %v8253_v48, %v9073_v4  ;;  %v3472_v53 = vmul.f32 %v8253_v48, %v9037_v11  ;;  %v3474_v1 = vmul.f32 %v8253_v48, %v9063_v19 }
 0x40f   : > { %v3526_v58 = vmul.f32 %v3492_v29, %v3469_v42  ;;  %v3528_v34 = vmul.f32 %v3500_v32, %v3471_v21  ;;  %v3525_v57 = vmul.f32 %v3488_v31, %v3468_v52  ;;  %v3527_v51 = vmul.f32 %v3496_v38, %v3470_v55 }
 0x410   : > { %v3530_v61 = vmul.f32 %v3508_v35, %v3473_v60  ;;  %v3532_v41 = vmul.f32 %v3516_v17, %v3475_v15  ;;  %v3529_v7 = vmul.f32 %v3504_v30, %v3472_v53  ;;  %v3569_v44 = vrot.slane %v517_v24, %v8972_v36  ;;  %v8255_v49 = vpop.eup %8254  ;;  %v7789_v60 = vld [vmem:[#allocation7 + $0x6a4] ss:$16 sps:$4 sm:$0xff]   ;;  %v7784_v53 = vld [vmem:[#allocation7 + $0x4a0] ss:$16 sps:$4 sm:$0xff]  }
 0x411   : > { %v3583_v28 = vadd.f32 %v3549_v6, %v3526_v58  ;;  %v3585_v45 = vadd.f32 %v3557_v47, %v3528_v34  ;;  %v3582_v46 = vadd.f32 %v3545_v40, %v3525_v57  ;;  %v3531_v37 = vmul.f32 %v9102_v26, %v3474_v1  ;;  %v7787_v1 = vld [vmem:[#allocation7 + $0x6a0] ss:$16 sps:$4 sm:$0xff]   ;;  %v7792_v58 = vld [vmem:[#allocation7 + $0x484] ss:$16 sps:$4 sm:$0xff]  }
 0x412   : > { %v3477_v4 = vmul.f32 %v8255_v49, %v9045_v5  ;;  %v3479_v11 = vmul.f32 %v8255_v49, %v9058_v50  ;;  %v3476_v19 = vmul.f32 %v8255_v49, %v9042_v63  ;;  %v3478_v2 = vmul.f32 %v8255_v49, %v9048_v39  ;;  %v7795_v34 = vld [vmem:[#allocation7 + $0x684] ss:$16 sps:$4 sm:$0xff]   ;;  %v7790_v57 = vld [vmem:[#allocation7 + $0x480] ss:$16 sps:$4 sm:$0xff]  }
 0x413   : > { %v3584_v3 = vadd.f32 %v3553_v54, %v3527_v51  ;;  %v3481_v22 = vmul.f32 %v8255_v49, %v9078_v8  ;;  %v3587_v9 = vadd.f32 %v3565_v43, %v3530_v61  ;;  %v3483_v36 = vmul.f32 %v8255_v49, %v9092_v56  ;;  %v7793_v51 = vld [vmem:[#allocation7 + $0x680] ss:$16 sps:$4 sm:$0xff]   ;;  %v7798_v61 = vld [vmem:[#allocation7 + $0x464] ss:$16 sps:$4 sm:$0xff]  }
 0x414   : > { %v3534_v25 = vmul.f32 %v3492_v29, %v3477_v4  ;;  %v3536_v12 = vmul.f32 %v3500_v32, %v3479_v11  ;;  %v3533_v13 = vmul.f32 %v3488_v31, %v3476_v19  ;;  %v3535_v18 = vmul.f32 %v3496_v38, %v3478_v2  ;;  %v7772_v29 = vld [vmem:[#allocation7 + $0x4e0] ss:$16 sps:$4 sm:$0xff]   ;;  %v7813_v4 = vld [vmem:[#allocation7 + $0x624] ss:$16 sps:$4 sm:$0xff]  }
 0x415   : > { %v3538_v23 = vmul.f32 %v3508_v35, %v3481_v22  ;;  %v3540_v27 = vmul.f32 %v3516_v17, %v3483_v36  ;;  %v3480_v5 = vmul.f32 %v8255_v49, %v9068_v20  ;;  %v3586_v24 = vadd.f32 %v3561_v33, %v3529_v7  ;;  %v7775_v32 = vld [vmem:[#allocation7 + $0x6e0] ss:$16 sps:$4 sm:$0xff]   ;;  %v7816_v2 = vld [vmem:[#allocation7 + $0x404] ss:$16 sps:$4 sm:$0xff]  }
 0x416   : > { %v3591_v50 = vadd.f32 %v3549_v6, %v3534_v25  ;;  %v3593_v48 = vadd.f32 %v3557_v47, %v3536_v12  ;;  %v3590_v63 = vadd.f32 %v3545_v40, %v3533_v13  ;;  %v3592_v42 = vadd.f32 %v3553_v54, %v3535_v18  ;;  %v7783_v47 = vld [vmem:[#allocation7 + $0x6c4] ss:$16 sps:$4 sm:$0xff]   ;;  %v7796_v7 = vld [vmem:[#allocation7 + $0x460] ss:$16 sps:$4 sm:$0xff]  }
 0x417   : > { %v3595_v39 = vadd.f32 %v3565_v43, %v3538_v23  ;;  %v3597_v21 = vadd.f32 %v3573_v14, %v3540_v27  ;;  %v3537_v52 = vmul.f32 %v3504_v30, %v3480_v5  ;;  %v3482_v8 = vmul.f32 %v8255_v49, %v9085_v62  ;;  %v7780_v62 = vld [vmem:[#allocation7 + $0x4c4] ss:$16 sps:$4 sm:$0xff]   ;;  %v7808_v11 = vld [vmem:[#allocation7 + $0x420] ss:$16 sps:$4 sm:$0xff]  }
 0x418   : > { %v9135_v55 = vpack.c.bf16 %v3591_v50, %v3583_v28  ;;  %v9137_v56 = vpack.c.bf16 %v3593_v48, %v3585_v45  ;;  %v9139_v31 = vpack.c.bf16 %v3590_v63, %v3582_v46  ;;  %v9141_v38 = vpack.c.bf16 %v3592_v42, %v3584_v3  ;;  %v7804_v49 = vld [vmem:[#allocation7 + $0x444] ss:$16 sps:$4 sm:$0xff]   ;;  %v7802_v45 = vld [vmem:[#allocation7 + $0x440] ss:$16 sps:$4 sm:$0xff]  }
 0x419   : > { %v3589_v20 = vadd.f32 %v3573_v14, %v3532_v41  ;;  %v3594_v35 = vadd.f32 %v3561_v33, %v3537_v52  ;;  %v3539_v6 = vmul.f32 %v9102_v26, %v3482_v8  ;;  %v9146_v30 = vpack.c.bf16 %v3595_v39, %v3587_v9  ;;  %v7778_v26 = vld [vmem:[#allocation7 + $0x4c0] ss:$16 sps:$4 sm:$0xff]   ;;  %v7786_v33 = vld [vmem:[#allocation7 + $0x4a4] ss:$16 sps:$4 sm:$0xff]  }
 0x41a   : > { %5195 = vmatprep.mubr.bf16.mxu0 %v9135_v55  ;;  %5238 = vmatprep.mubr.bf16.mxu1 %v9137_v56  ;;  %v3588_v40 = vadd.f32 %v3569_v44, %v3531_v37  ;;  %v7781_v14 = vld [vmem:[#allocation7 + $0x6c0] ss:$16 sps:$4 sm:$0xff]   ;;  %v7801_v41 = vld [vmem:[#allocation7 + $0x664] ss:$16 sps:$4 sm:$0xff]  }
 0x41b   : > { %5196 = vmatmul.mubr.bf16.vlgmr.msra.gmra.mxu0 %v9139_v31  ;;  %5239 = vmatmul.mubr.bf16.vlgmr.msra.gmra.mxu1 %v9141_v38  ;;  %v9150_v17 = vpack.c.bf16 %v3597_v21, %v3589_v20  ;;  %v9152_v54 = vpack.c.bf16 %v3594_v35, %v3586_v24  ;;  %v3596_v43 = vadd.f32 %v3569_v44, %v3539_v6  ;;  %v7799_v44 = vld [vmem:[#allocation7 + $0x660] ss:$16 sps:$4 sm:$0xff]   ;;  %v7807_v28 = vld [vmem:[#allocation7 + $0x644] ss:$16 sps:$4 sm:$0xff]  }
 0x41c   : > { %5250 = vmatpush1.bf16.msra.mxu0 %v7772_v29  ;;  %5293 = vmatpush1.bf16.msra.mxu1 %v7775_v32  ;;  %v7805_v46 = vld [vmem:[#allocation7 + $0x640] ss:$16 sps:$4 sm:$0xff]   ;;  %v7810_v37 = vld [vmem:[#allocation7 + $0x424] ss:$16 sps:$4 sm:$0xff]  }
 0x41d   : > { %5281 = vmatprep.mubr.bf16.mxu0 %v9146_v30  ;;  %5324 = vmatprep.mubr.bf16.mxu1 %v9150_v17  ;;  %v9156_v15 = vpack.c.bf16 %v3596_v43, %v3588_v40  ;;  %v7811_v19 = vld [vmem:[#allocation7 + $0x620] ss:$16 sps:$4 sm:$0xff]   ;;  %v7819_v3 = vld [vmem:[#allocation7 + $0x604] ss:$16 sps:$4 sm:$0xff]  }
 0x41e   : > { %5251 = vmatprep.subr.bf16.mxu0 %v7780_v62  ;;  %5294 = vmatprep.subr.bf16.mxu1 %v7783_v47  ;;  %v7814_v22 = vld [vmem:[#allocation7 + $0x400] ss:$16 sps:$4 sm:$0xff]   ;;  %v7822_v36 = vld [vmem:[#allocation7 + $0x5e4] ss:$16 sps:$4 sm:$0xff]  }
 0x41f   : > { %v7817_v9 = vld [vmem:[#allocation7 + $0x600] ss:$16 sps:$4 sm:$0xff]   ;;  %v7825_v25 = vld [vmem:[#allocation7 + $0x7e4] ss:$16 sps:$4 sm:$0xff]  }
 0x420   : > { %5252 = vmatpush1.bf16.msra.mxu0 %v7778_v26  ;;  %5295 = vmatpush1.bf16.msra.mxu1 %v7781_v14  ;;  %v7820_v12 = vld [vmem:[#allocation7 + $0x5e0] ss:$16 sps:$4 sm:$0xff]   ;;  %v7828_v18 = vld [vmem:[#allocation7 + $0x5c4] ss:$16 sps:$4 sm:$0xff]  }
 0x421   : > { %5253 = vmatprep.subr.bf16.mxu0 %v7786_v33  ;;  %5296 = vmatprep.subr.bf16.mxu1 %v7789_v60  ;;  %v7823_v13 = vld [vmem:[#allocation7 + $0x7e0] ss:$16 sps:$4 sm:$0xff]   ;;  %v7831_v23 = vld [vmem:[#allocation7 + $0x7c4] ss:$16 sps:$4 sm:$0xff]  }
 0x422   : > { %v7826_v27 = vld [vmem:[#allocation7 + $0x5c0] ss:$16 sps:$4 sm:$0xff]   ;;  %v7834_v24 = vld [vmem:[#allocation7 + $0x5a4] ss:$16 sps:$4 sm:$0xff]  }
 0x423   : > { %v7829_v5 = vld [vmem:[#allocation7 + $0x7c0] ss:$16 sps:$4 sm:$0xff]   ;;  %v7837_v50 = vld [vmem:[#allocation7 + $0x7a4] ss:$16 sps:$4 sm:$0xff]  }
 0x424   : > { %5254 = vmatpush1.bf16.msra.mxu0 %v7784_v53  ;;  %5297 = vmatpush1.bf16.msra.mxu1 %v7787_v1  ;;  %v7832_v48 = vld [vmem:[#allocation7 + $0x5a0] ss:$16 sps:$4 sm:$0xff]   ;;  %v7840_v42 = vld [vmem:[#allocation7 + $0x584] ss:$16 sps:$4 sm:$0xff]  }
 0x425   : > { %5255 = vmatprep.subr.bf16.mxu0 %v7792_v58  ;;  %5298 = vmatprep.subr.bf16.mxu1 %v7795_v34  ;;  %v7835_v63 = vld [vmem:[#allocation7 + $0x7a0] ss:$16 sps:$4 sm:$0xff]   ;;  %v7843_v39 = vld [vmem:[#allocation7 + $0x784] ss:$16 sps:$4 sm:$0xff]   ;;  %v7870_v58 = vld [vmem:[#allocation7 + $0xec] ss:$16 sps:$4 sm:$0xff]  }
 0x426   : > { %v7838_v21 = vld [vmem:[#allocation7 + $0x580] ss:$16 sps:$4 sm:$0xff]   ;;  %v7846_v8 = vld [vmem:[#allocation7 + $0x564] ss:$16 sps:$4 sm:$0xff]   ;;  %v7873_v34 = vld [vmem:[#allocation7 + $0x2ec] ss:$16 sps:$4 sm:$0xff]  }
 0x427   : > { %v7841_v52 = vld [vmem:[#allocation7 + $0x780] ss:$16 sps:$4 sm:$0xff]   ;;  %v7849_v29 = vld [vmem:[#allocation7 + $0x764] ss:$16 sps:$4 sm:$0xff]  }
 0x428   : > { %5256 = vmatpush1.bf16.msra.mxu0 %v7790_v57  ;;  %5299 = vmatpush1.bf16.msra.mxu1 %v7793_v51  ;;  %v7844_v32 = vld [vmem:[#allocation7 + $0x560] ss:$16 sps:$4 sm:$0xff]   ;;  %v7852_v35 = vld [vmem:[#allocation7 + $0x544] ss:$16 sps:$4 sm:$0xff]   ;;  %v7868_v57 = vld [vmem:[#allocation7 + $0xe8] ss:$16 sps:$4 sm:$0xff]  }
 0x429   : > { %5257 = vmatprep.subr.bf16.mxu0 %v7798_v61  ;;  %5300 = vmatprep.subr.bf16.mxu1 %v7801_v41  ;;  %v7847_v20 = vld [vmem:[#allocation7 + $0x760] ss:$16 sps:$4 sm:$0xff]   ;;  %v7855_v6 = vld [vmem:[#allocation7 + $0x744] ss:$16 sps:$4 sm:$0xff]   ;;  %v7871_v51 = vld [vmem:[#allocation7 + $0x2e8] ss:$16 sps:$4 sm:$0xff]  }
 0x42a   : > { %v7850_v62 = vld [vmem:[#allocation7 + $0x540] ss:$16 sps:$4 sm:$0xff]   ;;  %v7858_v40 = vld [vmem:[#allocation7 + $0x524] ss:$16 sps:$4 sm:$0xff]   ;;  %v7876_v61 = vld [vmem:[#allocation7 + $0xcc] ss:$16 sps:$4 sm:$0xff]  }
 0x42b   : > { %v7853_v47 = vld [vmem:[#allocation7 + $0x740] ss:$16 sps:$4 sm:$0xff]   ;;  %v7861_v43 = vld [vmem:[#allocation7 + $0x724] ss:$16 sps:$4 sm:$0xff]   ;;  %v7879_v41 = vld [vmem:[#allocation7 + $0x2cc] ss:$16 sps:$4 sm:$0xff]  }
 0x42c   : > { %5258 = vmatpush1.bf16.msra.mxu0 %v7796_v7  ;;  %5301 = vmatpush1.bf16.msra.mxu1 %v7799_v44  ;;  %v7856_v26 = vld [vmem:[#allocation7 + $0x520] ss:$16 sps:$4 sm:$0xff]   ;;  %v7864_v33 = vld [vmem:[#allocation7 + $0x504] ss:$16 sps:$4 sm:$0xff]   ;;  %v7874_v7 = vld [vmem:[#allocation7 + $0xc8] ss:$16 sps:$4 sm:$0xff]  }
 0x42d   : > { %5259 = vmatprep.subr.bf16.mxu0 %v7804_v49  ;;  %5302 = vmatprep.subr.bf16.mxu1 %v7807_v28  ;;  %v7859_v14 = vld [vmem:[#allocation7 + $0x720] ss:$16 sps:$4 sm:$0xff]   ;;  %v7867_v60 = vld [vmem:[#allocation7 + $0x704] ss:$16 sps:$4 sm:$0xff]   ;;  %v7877_v44 = vld [vmem:[#allocation7 + $0x2c8] ss:$16 sps:$4 sm:$0xff]  }
 0x42e   : > { %v7862_v53 = vld [vmem:[#allocation7 + $0x500] ss:$16 sps:$4 sm:$0xff]   ;;  %v7882_v49 = vld [vmem:[#allocation7 + $0xac] ss:$16 sps:$4 sm:$0xff]  }
 0x42f   : > { %v7865_v1 = vld [vmem:[#allocation7 + $0x700] ss:$16 sps:$4 sm:$0xff]   ;;  %v7885_v28 = vld [vmem:[#allocation7 + $0x2ac] ss:$16 sps:$4 sm:$0xff]  }
 0x430   : > { %5260 = vmatpush1.bf16.msra.mxu0 %v7802_v45  ;;  %5303 = vmatpush1.bf16.msra.mxu1 %v7805_v46  ;;  %v7880_v45 = vld [vmem:[#allocation7 + $0xa8] ss:$16 sps:$4 sm:$0xff]  }
 0x431   : > { %5261 = vmatprep.subr.bf16.mxu0 %v7810_v37  ;;  %5304 = vmatprep.subr.bf16.mxu1 %v7813_v4  ;;  %v7883_v46 = vld [vmem:[#allocation7 + $0x2a8] ss:$16 sps:$4 sm:$0xff]   ;;  %v7888_v37 = vld [vmem:[#allocation7 + $0x8c] ss:$16 sps:$4 sm:$0xff]  }
 0x432   : > { %v7891_v4 = vld [vmem:[#allocation7 + $0x28c] ss:$16 sps:$4 sm:$0xff]  }
 0x434   : > { %5262 = vmatpush1.bf16.msra.mxu0 %v7808_v11  ;;  %5305 = vmatpush1.bf16.msra.mxu1 %v7811_v19  ;;  %v7886_v11 = vld [vmem:[#allocation7 + $0x88] ss:$16 sps:$4 sm:$0xff]   ;;  %v7894_v19 = vld [vmem:[#allocation7 + $0x6c] ss:$16 sps:$4 sm:$0xff]  }
 0x435   : > { %5263 = vmatprep.subr.bf16.mxu0 %v7816_v2  ;;  %5306 = vmatprep.subr.bf16.mxu1 %v7819_v3  ;;  %v7892_v2 = vld [vmem:[#allocation7 + $0x68] ss:$16 sps:$4 sm:$0xff]  }
 0x436   : > { %v7895_v3 = vld [vmem:[#allocation7 + $0x268] ss:$16 sps:$4 sm:$0xff]  }
 0x438   : > { %5264 = vmatpush1.bf16.msra.mxu0 %v7814_v22  ;;  %5307 = vmatpush1.bf16.msra.mxu1 %v7817_v9  ;;  %v7900_v22 = vld [vmem:[#allocation7 + $0x4c] ss:$16 sps:$4 sm:$0xff]  }
 0x439   : > { %5265 = vmatprep.subr.bf16.mxu0 %v7822_v36  ;;  %5308 = vmatprep.subr.bf16.mxu1 %v7825_v25  ;;  %v7903_v9 = vld [vmem:[#allocation7 + $0x24c] ss:$16 sps:$4 sm:$0xff]   ;;  %v7898_v36 = vld [vmem:[#allocation7 + $0x48] ss:$16 sps:$4 sm:$0xff]  }
 0x43a   : > { %v7901_v25 = vld [vmem:[#allocation7 + $0x248] ss:$16 sps:$4 sm:$0xff]  }
 0x43c   : > { %5266 = vmatpush2.bf16.msra.mxu0 %v7820_v12  ;;  %5309 = vmatpush2.bf16.msra.mxu1 %v7823_v13  ;;  %v7906_v12 = vld [vmem:[#allocation7 + $0x2c] ss:$16 sps:$4 sm:$0xff]  }
 0x43d   : > { %5267 = vmatprep.subr.bf16.mxu0 %v7828_v18  ;;  %5310 = vmatprep.subr.bf16.mxu1 %v7831_v23  ;;  %v7909_v13 = vld [vmem:[#allocation7 + $0x22c] ss:$16 sps:$4 sm:$0xff]   ;;  %v7904_v18 = vld [vmem:[#allocation7 + $0x28] ss:$16 sps:$4 sm:$0xff]  }
 0x43e   : > { %v7907_v23 = vld [vmem:[#allocation7 + $0x228] ss:$16 sps:$4 sm:$0xff]  }
 0x440   : > { %5268 = vmatpush2.bf16.msra.mxu0 %v7826_v27  ;;  %5311 = vmatpush2.bf16.msra.mxu1 %v7829_v5  ;;  %v7912_v27 = vld [vmem:[#allocation7 + $0xc] ss:$16 sps:$4 sm:$0xff]  }
 0x441   : > { %5269 = vmatprep.subr.bf16.mxu0 %v7834_v24  ;;  %5312 = vmatprep.subr.bf16.mxu1 %v7837_v50  ;;  %v7915_v5 = vld [vmem:[#allocation7 + $0x20c] ss:$16 sps:$4 sm:$0xff]   ;;  %v7910_v24 = vld [vmem:[#allocation7 + $0x8] ss:$16 sps:$4 sm:$0xff]  }
 0x442   : > { %v7913_v50 = vld [vmem:[#allocation7 + $0x208] ss:$16 sps:$4 sm:$0xff]  }
 0x444   : > { %5270 = vmatpush2.bf16.msra.mxu0 %v7832_v48  ;;  %5313 = vmatpush2.bf16.msra.mxu1 %v7835_v63  ;;  %v7918_v48 = vld [vmem:[#allocation7 + $0x1ec] ss:$16 sps:$4 sm:$0xff]  }
 0x445   : > { %5271 = vmatprep.subr.bf16.mxu0 %v7840_v42  ;;  %5314 = vmatprep.subr.bf16.mxu1 %v7843_v39  ;;  %v7921_v63 = vld [vmem:[#allocation7 + $0x3ec] ss:$16 sps:$4 sm:$0xff]   ;;  %v7916_v42 = vld [vmem:[#allocation7 + $0x1e8] ss:$16 sps:$4 sm:$0xff]  }
 0x446   : > { %v7919_v39 = vld [vmem:[#allocation7 + $0x3e8] ss:$16 sps:$4 sm:$0xff]  }
 0x448   : > { %5272 = vmatpush2.bf16.msra.mxu0 %v7838_v21  ;;  %5315 = vmatpush2.bf16.msra.mxu1 %v7841_v52  ;;  %v7924_v21 = vld [vmem:[#allocation7 + $0x1cc] ss:$16 sps:$4 sm:$0xff]  }
 0x449   : > { %5273 = vmatprep.subr.bf16.mxu0 %v7846_v8  ;;  %5316 = vmatprep.subr.bf16.mxu1 %v7849_v29  ;;  %v7927_v52 = vld [vmem:[#allocation7 + $0x3cc] ss:$16 sps:$4 sm:$0xff]   ;;  %v7922_v8 = vld [vmem:[#allocation7 + $0x1c8] ss:$16 sps:$4 sm:$0xff]  }
 0x44a   : > { %v7925_v29 = vld [vmem:[#allocation7 + $0x3c8] ss:$16 sps:$4 sm:$0xff]  }
 0x44c   : > { %5274 = vmatpush2.bf16.msra.mxu0 %v7844_v32  ;;  %5317 = vmatpush2.bf16.msra.mxu1 %v7847_v20  ;;  %v7930_v32 = vld [vmem:[#allocation7 + $0x1ac] ss:$16 sps:$4 sm:$0xff]  }
 0x44d   : > { %5275 = vmatprep.subr.bf16.mxu0 %v7852_v35  ;;  %5318 = vmatprep.subr.bf16.mxu1 %v7855_v6  ;;  %v7933_v20 = vld [vmem:[#allocation7 + $0x3ac] ss:$16 sps:$4 sm:$0xff]   ;;  %v7928_v35 = vld [vmem:[#allocation7 + $0x1a8] ss:$16 sps:$4 sm:$0xff]  }
 0x44e   : > { %v7931_v6 = vld [vmem:[#allocation7 + $0x3a8] ss:$16 sps:$4 sm:$0xff]  }
 0x450   : > { %5276 = vmatpush2.bf16.msra.mxu0 %v7850_v62  ;;  %5319 = vmatpush2.bf16.msra.mxu1 %v7853_v47  ;;  %v7936_v62 = vld [vmem:[#allocation7 + $0x18c] ss:$16 sps:$4 sm:$0xff]  }
 0x451   : > { %5277 = vmatprep.subr.bf16.mxu0 %v7858_v40  ;;  %5320 = vmatprep.subr.bf16.mxu1 %v7861_v43  ;;  %v7939_v47 = vld [vmem:[#allocation7 + $0x38c] ss:$16 sps:$4 sm:$0xff]   ;;  %v7934_v40 = vld [vmem:[#allocation7 + $0x188] ss:$16 sps:$4 sm:$0xff]  }
 0x452   : > { %v7937_v43 = vld [vmem:[#allocation7 + $0x388] ss:$16 sps:$4 sm:$0xff]  }
 0x454   : > { %5278 = vmatpush2.bf16.msra.mxu0 %v7856_v26  ;;  %5321 = vmatpush2.bf16.msra.mxu1 %v7859_v14  ;;  %v7942_v26 = vld [vmem:[#allocation7 + $0x16c] ss:$16 sps:$4 sm:$0xff]  }
 0x455   : > { %5279 = vmatprep.subr.bf16.mxu0 %v7864_v33  ;;  %5322 = vmatprep.subr.bf16.mxu1 %v7867_v60  ;;  %v7945_v14 = vld [vmem:[#allocation7 + $0x36c] ss:$16 sps:$4 sm:$0xff]   ;;  %v7940_v33 = vld [vmem:[#allocation7 + $0x168] ss:$16 sps:$4 sm:$0xff]  }
 0x456   : > { %v7943_v60 = vld [vmem:[#allocation7 + $0x368] ss:$16 sps:$4 sm:$0xff]  }
 0x458   : > { %5280 = vmatpush2.bf16.msra.mxu0 %v7862_v53  ;;  %5323 = vmatpush2.bf16.msra.mxu1 %v7865_v1  ;;  %v7948_v53 = vld [vmem:[#allocation7 + $0x14c] ss:$16 sps:$4 sm:$0xff]  }
 0x459   : > { %5335 = vmatprep.subr.bf16.mxu0 %v7870_v58  ;;  %5378 = vmatprep.subr.bf16.mxu1 %v7873_v34  ;;  %v7951_v1 = vld [vmem:[#allocation7 + $0x34c] ss:$16 sps:$4 sm:$0xff]   ;;  %v7946_v58 = vld [vmem:[#allocation7 + $0x148] ss:$16 sps:$4 sm:$0xff]  }
 0x45a   : > { %v7949_v34 = vld [vmem:[#allocation7 + $0x348] ss:$16 sps:$4 sm:$0xff]  }
 0x45b   : > { %5282 = vmatmul.mubr.bf16.vlgmr.msra.gmra.mxu0 %v9152_v54  ;;  %5325 = vmatmul.mubr.bf16.vlgmr.msra.gmra.mxu1 %v9156_v15 }
 0x45c   : > { %5336 = vmatpush1.bf16.msra.mxu0 %v7868_v57  ;;  %5367 = vmatprep.mubr.bf16.mxu0 %v9135_v55  ;;  %v7889_v55 = vld [vmem:[#allocation7 + $0x288] ss:$16 sps:$4 sm:$0xff]   ;;  %v7954_v57 = vld [vmem:[#allocation7 + $0x12c] ss:$16 sps:$4 sm:$0xff]  }
 0x45d   : > { %5379 = vmatpush1.bf16.msra.mxu1 %v7871_v51  ;;  %5410 = vmatprep.mubr.bf16.mxu1 %v9137_v56  ;;  %v7897_v56 = vld [vmem:[#allocation7 + $0x26c] ss:$16 sps:$4 sm:$0xff]  }
 0x45e   : > { %5337 = vmatprep.subr.bf16.mxu0 %v7876_v61  ;;  %5380 = vmatprep.subr.bf16.mxu1 %v7879_v41  ;;  %v7957_v51 = vld [vmem:[#allocation7 + $0x32c] ss:$16 sps:$4 sm:$0xff]   ;;  %v7952_v61 = vld [vmem:[#allocation7 + $0x128] ss:$16 sps:$4 sm:$0xff]  }
 0x45f   : > { %v7955_v41 = vld [vmem:[#allocation7 + $0x328] ss:$16 sps:$4 sm:$0xff]  }
 0x460   : > { %5338 = vmatpush1.bf16.msra.mxu0 %v7874_v7  ;;  %v7960_v7 = vld [vmem:[#allocation7 + $0x10c] ss:$16 sps:$4 sm:$0xff]  }
 0x461   : > { %5381 = vmatpush1.bf16.msra.mxu1 %v7877_v44  ;;  %5339 = vmatprep.subr.bf16.mxu0 %v7882_v49  ;;  %v7963_v44 = vld [vmem:[#allocation7 + $0x30c] ss:$16 sps:$4 sm:$0xff]   ;;  %v7958_v49 = vld [vmem:[#allocation7 + $0x108] ss:$16 sps:$4 sm:$0xff]  }
 0x462   : > { %5382 = vmatprep.subr.bf16.mxu1 %v7885_v28  ;;  %v7961_v28 = vld [vmem:[#allocation7 + $0x308] ss:$16 sps:$4 sm:$0xff]  }
 0x464   : > { %5340 = vmatpush1.bf16.msra.mxu0 %v7880_v45  ;;  %v7966_v45 = vld [vmem:[#allocation7 + $0x4ec] ss:$16 sps:$4 sm:$0xff]  }
 0x465   : > { %5383 = vmatpush1.bf16.msra.mxu1 %v7883_v46  ;;  %5341 = vmatprep.subr.bf16.mxu0 %v7888_v37  ;;  %v7969_v46 = vld [vmem:[#allocation7 + $0x6ec] ss:$16 sps:$4 sm:$0xff]   ;;  %v7964_v37 = vld [vmem:[#allocation7 + $0x4e8] ss:$16 sps:$4 sm:$0xff]  }
 0x466   : > { %5384 = vmatprep.subr.bf16.mxu1 %v7891_v4  ;;  %v7967_v4 = vld [vmem:[#allocation7 + $0x6e8] ss:$16 sps:$4 sm:$0xff]  }
 0x468   : > { %5342 = vmatpush1.bf16.msra.mxu0 %v7886_v11  ;;  %v7972_v11 = vld [vmem:[#allocation7 + $0x4cc] ss:$16 sps:$4 sm:$0xff]  }
 0x469   : > { %5385 = vmatpush1.bf16.msra.mxu1 %v7889_v55  ;;  %5343 = vmatprep.subr.bf16.mxu0 %v7894_v19  ;;  %v7975_v55 = vld [vmem:[#allocation7 + $0x6cc] ss:$16 sps:$4 sm:$0xff]   ;;  %v7970_v19 = vld [vmem:[#allocation7 + $0x4c8] ss:$16 sps:$4 sm:$0xff]  }
 0x46a   : > { %5386 = vmatprep.subr.bf16.mxu1 %v7897_v56  ;;  %v7973_v56 = vld [vmem:[#allocation7 + $0x6c8] ss:$16 sps:$4 sm:$0xff]  }
 0x46c   : > { %5344 = vmatpush1.bf16.msra.mxu0 %v7892_v2  ;;  %v7978_v2 = vld [vmem:[#allocation7 + $0x4ac] ss:$16 sps:$4 sm:$0xff]  }
 0x46d   : > { %5387 = vmatpush1.bf16.msra.mxu1 %v7895_v3  ;;  %5345 = vmatprep.subr.bf16.mxu0 %v7900_v22  ;;  %v7981_v3 = vld [vmem:[#allocation7 + $0x6ac] ss:$16 sps:$4 sm:$0xff]   ;;  %v7976_v22 = vld [vmem:[#allocation7 + $0x4a8] ss:$16 sps:$4 sm:$0xff]  }
 0x46e   : > { %5388 = vmatprep.subr.bf16.mxu1 %v7903_v9  ;;  %v7984_v9 = vld [vmem:[#allocation7 + $0x48c] ss:$16 sps:$4 sm:$0xff]  }
 0x470   : > { %5346 = vmatpush1.bf16.msra.mxu0 %v7898_v36  ;;  %v7982_v36 = vld [vmem:[#allocation7 + $0x488] ss:$16 sps:$4 sm:$0xff]  }
 0x471   : > { %5389 = vmatpush1.bf16.msra.mxu1 %v7901_v25  ;;  %5347 = vmatprep.subr.bf16.mxu0 %v7906_v12  ;;  %v7990_v25 = vld [vmem:[#allocation7 + $0x46c] ss:$16 sps:$4 sm:$0xff]  }
 0x472   : > { %5390 = vmatprep.subr.bf16.mxu1 %v7909_v13  ;;  %v7993_v12 = vld [vmem:[#allocation7 + $0x66c] ss:$16 sps:$4 sm:$0xff]   ;;  %v7991_v13 = vld [vmem:[#allocation7 + $0x668] ss:$16 sps:$4 sm:$0xff]  }
 0x474   : > { %5348 = vmatpush1.bf16.msra.mxu0 %v7904_v18  ;;  %v7996_v18 = vld [vmem:[#allocation7 + $0x44c] ss:$16 sps:$4 sm:$0xff]  }
 0x475   : > { %5391 = vmatpush1.bf16.msra.mxu1 %v7907_v23  ;;  %5349 = vmatprep.subr.bf16.mxu0 %v7912_v27  ;;  %v7999_v23 = vld [vmem:[#allocation7 + $0x64c] ss:$16 sps:$4 sm:$0xff]   ;;  %v7994_v27 = vld [vmem:[#allocation7 + $0x448] ss:$16 sps:$4 sm:$0xff]  }
 0x476   : > { %5392 = vmatprep.subr.bf16.mxu1 %v7915_v5  ;;  %v7997_v5 = vld [vmem:[#allocation7 + $0x648] ss:$16 sps:$4 sm:$0xff]  }
 0x478   : > { %5350 = vmatpush1.bf16.msra.mxu0 %v7910_v24  ;;  %v8002_v24 = vld [vmem:[#allocation7 + $0x42c] ss:$16 sps:$4 sm:$0xff]  }
 0x479   : > { %5393 = vmatpush1.bf16.msra.mxu1 %v7913_v50  ;;  %5351 = vmatprep.subr.bf16.mxu0 %v7918_v48  ;;  %v8005_v50 = vld [vmem:[#allocation7 + $0x62c] ss:$16 sps:$4 sm:$0xff]   ;;  %v8000_v48 = vld [vmem:[#allocation7 + $0x428] ss:$16 sps:$4 sm:$0xff]  }
 0x47a   : > { %5394 = vmatprep.subr.bf16.mxu1 %v7921_v63  ;;  %v8003_v63 = vld [vmem:[#allocation7 + $0x628] ss:$16 sps:$4 sm:$0xff]  }
 0x47c   : > { %5352 = vmatpush2.bf16.msra.mxu0 %v7916_v42  ;;  %v8008_v42 = vld [vmem:[#allocation7 + $0x40c] ss:$16 sps:$4 sm:$0xff]  }
 0x47d   : > { %5395 = vmatpush2.bf16.msra.mxu1 %v7919_v39  ;;  %5353 = vmatprep.subr.bf16.mxu0 %v7924_v21  ;;  %v8011_v39 = vld [vmem:[#allocation7 + $0x60c] ss:$16 sps:$4 sm:$0xff]   ;;  %v8006_v21 = vld [vmem:[#allocation7 + $0x408] ss:$16 sps:$4 sm:$0xff]  }
 0x47e   : > { %5396 = vmatprep.subr.bf16.mxu1 %v7927_v52  ;;  %v8009_v52 = vld [vmem:[#allocation7 + $0x608] ss:$16 sps:$4 sm:$0xff]  }
 0x480   : > { %5354 = vmatpush2.bf16.msra.mxu0 %v7922_v8  ;;  %v8014_v8 = vld [vmem:[#allocation7 + $0x5ec] ss:$16 sps:$4 sm:$0xff]  }
 0x481   : > { %5397 = vmatpush2.bf16.msra.mxu1 %v7925_v29  ;;  %5355 = vmatprep.subr.bf16.mxu0 %v7930_v32  ;;  %v8017_v29 = vld [vmem:[#allocation7 + $0x7ec] ss:$16 sps:$4 sm:$0xff]   ;;  %v8012_v32 = vld [vmem:[#allocation7 + $0x5e8] ss:$16 sps:$4 sm:$0xff]  }
 0x482   : > { %5398 = vmatprep.subr.bf16.mxu1 %v7933_v20  ;;  %v8015_v20 = vld [vmem:[#allocation7 + $0x7e8] ss:$16 sps:$4 sm:$0xff]  }
 0x484   : > { %5356 = vmatpush2.bf16.msra.mxu0 %v7928_v35  ;;  %v8020_v35 = vld [vmem:[#allocation7 + $0x5cc] ss:$16 sps:$4 sm:$0xff]  }
 0x485   : > { %5399 = vmatpush2.bf16.msra.mxu1 %v7931_v6  ;;  %5357 = vmatprep.subr.bf16.mxu0 %v7936_v62  ;;  %v8023_v6 = vld [vmem:[#allocation7 + $0x7cc] ss:$16 sps:$4 sm:$0xff]   ;;  %v8018_v62 = vld [vmem:[#allocation7 + $0x5c8] ss:$16 sps:$4 sm:$0xff]  }
 0x486   : > { %5400 = vmatprep.subr.bf16.mxu1 %v7939_v47  ;;  %v8021_v47 = vld [vmem:[#allocation7 + $0x7c8] ss:$16 sps:$4 sm:$0xff]  }
 0x488   : > { %5358 = vmatpush2.bf16.msra.mxu0 %v7934_v40  ;;  %v8026_v40 = vld [vmem:[#allocation7 + $0x5ac] ss:$16 sps:$4 sm:$0xff]  }
 0x489   : > { %5401 = vmatpush2.bf16.msra.mxu1 %v7937_v43  ;;  %5359 = vmatprep.subr.bf16.mxu0 %v7942_v26  ;;  %v8029_v43 = vld [vmem:[#allocation7 + $0x7ac] ss:$16 sps:$4 sm:$0xff]   ;;  %v8024_v26 = vld [vmem:[#allocation7 + $0x5a8] ss:$16 sps:$4 sm:$0xff]  }
 0x48a   : > { %5402 = vmatprep.subr.bf16.mxu1 %v7945_v14  ;;  %v8027_v14 = vld [vmem:[#allocation7 + $0x7a8] ss:$16 sps:$4 sm:$0xff]  }
 0x48c   : > { %5360 = vmatpush2.bf16.msra.mxu0 %v7940_v33  ;;  %v8032_v33 = vld [vmem:[#allocation7 + $0x58c] ss:$16 sps:$4 sm:$0xff]  }
 0x48d   : > { %5403 = vmatpush2.bf16.msra.mxu1 %v7943_v60  ;;  %5361 = vmatprep.subr.bf16.mxu0 %v7948_v53  ;;  %v8035_v60 = vld [vmem:[#allocation7 + $0x78c] ss:$16 sps:$4 sm:$0xff]   ;;  %v8030_v53 = vld [vmem:[#allocation7 + $0x588] ss:$16 sps:$4 sm:$0xff]  }
 0x48e   : > { %5404 = vmatprep.subr.bf16.mxu1 %v7951_v1  ;;  %v8033_v1 = vld [vmem:[#allocation7 + $0x788] ss:$16 sps:$4 sm:$0xff]  }
 0x490   : > { %5362 = vmatpush2.bf16.msra.mxu0 %v7946_v58  ;;  %v8038_v58 = vld [vmem:[#allocation7 + $0x56c] ss:$16 sps:$4 sm:$0xff]  }
 0x491   : > { %5405 = vmatpush2.bf16.msra.mxu1 %v7949_v34  ;;  %5363 = vmatprep.subr.bf16.mxu0 %v7954_v57  ;;  %v8041_v34 = vld [vmem:[#allocation7 + $0x76c] ss:$16 sps:$4 sm:$0xff]   ;;  %v8036_v57 = vld [vmem:[#allocation7 + $0x568] ss:$16 sps:$4 sm:$0xff]  }
 0x492   : > { %5406 = vmatprep.subr.bf16.mxu1 %v7957_v51  ;;  %v8039_v51 = vld [vmem:[#allocation7 + $0x768] ss:$16 sps:$4 sm:$0xff]  }
 0x494   : > { %5364 = vmatpush2.bf16.msra.mxu0 %v7952_v61  ;;  %v8044_v61 = vld [vmem:[#allocation7 + $0x54c] ss:$16 sps:$4 sm:$0xff]  }
 0x495   : > { %5407 = vmatpush2.bf16.msra.mxu1 %v7955_v41  ;;  %5365 = vmatprep.subr.bf16.mxu0 %v7960_v7  ;;  %v8047_v41 = vld [vmem:[#allocation7 + $0x74c] ss:$16 sps:$4 sm:$0xff]   ;;  %v8042_v7 = vld [vmem:[#allocation7 + $0x548] ss:$16 sps:$4 sm:$0xff]  }
 0x496   : > { %5408 = vmatprep.subr.bf16.mxu1 %v7963_v44  ;;  %v8045_v44 = vld [vmem:[#allocation7 + $0x748] ss:$16 sps:$4 sm:$0xff]  }
 0x498   : > { %5366 = vmatpush2.bf16.msra.mxu0 %v7958_v49  ;;  %v8050_v49 = vld [vmem:[#allocation7 + $0x52c] ss:$16 sps:$4 sm:$0xff]  }
 0x499   : > { %5409 = vmatpush2.bf16.msra.mxu1 %v7961_v28  ;;  %5421 = vmatprep.subr.bf16.mxu0 %v7966_v45  ;;  %v8053_v28 = vld [vmem:[#allocation7 + $0x72c] ss:$16 sps:$4 sm:$0xff]   ;;  %v8048_v45 = vld [vmem:[#allocation7 + $0x528] ss:$16 sps:$4 sm:$0xff]  }
 0x49a   : > { %5464 = vmatprep.subr.bf16.mxu1 %v7969_v46  ;;  %v8051_v46 = vld [vmem:[#allocation7 + $0x728] ss:$16 sps:$4 sm:$0xff]  }
 0x49b   : > { %5368 = vmatmul.mubr.bf16.vlgmr.msra.gmra.mxu0 %v9139_v31  ;;  %v7979_v31 = vld [vmem:[#allocation7 + $0x6a8] ss:$16 sps:$4 sm:$0xff]  }
 0x49c   : > { %5411 = vmatmul.mubr.bf16.vlgmr.msra.gmra.mxu1 %v9141_v38  ;;  %5422 = vmatpush1.bf16.msra.mxu0 %v7964_v37  ;;  %v7987_v38 = vld [vmem:[#allocation7 + $0x68c] ss:$16 sps:$4 sm:$0xff]  }
 0x49d   : > { %5453 = vmatprep.mubr.bf16.mxu0 %v9146_v30  ;;  %5465 = vmatpush1.bf16.msra.mxu1 %v7967_v4  ;;  %v7985_v30 = vld [vmem:[#allocation7 + $0x688] ss:$16 sps:$4 sm:$0xff]   ;;  %v8056_v37 = vld [vmem:[#allocation7 + $0x50c] ss:$16 sps:$4 sm:$0xff]  }
 0x49e   : > { %5496 = vmatprep.mubr.bf16.mxu1 %v9150_v17  ;;  %5423 = vmatprep.subr.bf16.mxu0 %v7972_v11  ;;  %v7988_v17 = vld [vmem:[#allocation7 + $0x468] ss:$16 sps:$4 sm:$0xff]   ;;  %v8059_v4 = vld [vmem:[#allocation7 + $0x70c] ss:$16 sps:$4 sm:$0xff]  }
 0x49f   : > { %5466 = vmatprep.subr.bf16.mxu1 %v7975_v55  ;;  %v8054_v11 = vld [vmem:[#allocation7 + $0x508] ss:$16 sps:$4 sm:$0xff]  }
 0x4a0   : > { %5424 = vmatpush1.bf16.msra.mxu0 %v7970_v19  ;;  %v8057_v55 = vld [vmem:[#allocation7 + $0x708] ss:$16 sps:$4 sm:$0xff]  }
 0x4a1   : > { %5467 = vmatpush1.bf16.msra.mxu1 %v7973_v56  ;;  %5425 = vmatprep.subr.bf16.mxu0 %v7978_v2 }
 0x4a2   : > { %5468 = vmatprep.subr.bf16.mxu1 %v7981_v3 }
 0x4a4   : > { %5426 = vmatpush1.bf16.msra.mxu0 %v7976_v22 }
 0x4a5   : > { %5469 = vmatpush1.bf16.msra.mxu1 %v7979_v31  ;;  %5427 = vmatprep.subr.bf16.mxu0 %v7984_v9 }
 0x4a6   : > { %5470 = vmatprep.subr.bf16.mxu1 %v7987_v38 }
 0x4a8   : > { %5428 = vmatpush1.bf16.msra.mxu0 %v7982_v36 }
 0x4a9   : > { %5471 = vmatpush1.bf16.msra.mxu1 %v7985_v30  ;;  %5429 = vmatprep.subr.bf16.mxu0 %v7990_v25 }
 0x4aa   : > { %5472 = vmatprep.subr.bf16.mxu1 %v7993_v12 }
 0x4ac   : > { %5430 = vmatpush1.bf16.msra.mxu0 %v7988_v17 }
 0x4ad   : > { %5473 = vmatpush1.bf16.msra.mxu1 %v7991_v13  ;;  %5431 = vmatprep.subr.bf16.mxu0 %v7996_v18  ;;  %v519_v18 = vld [vmem:[#allocation8 + $0x3] ss:$8 sm:$0xf] }
 0x4ae   : > { %5474 = vmatprep.subr.bf16.mxu1 %v7999_v23  ;;  %v3870_v23 = vrot.slane %v519_v18, %v8937_v0 }
 0x4b0   : > { %5432 = vmatpush1.bf16.msra.mxu0 %v7994_v27 }
 0x4b1   : > { %5475 = vmatpush1.bf16.msra.mxu1 %v7997_v5  ;;  %5433 = vmatprep.subr.bf16.mxu0 %v8002_v24 }
 0x4b2   : > { %5476 = vmatprep.subr.bf16.mxu1 %v8005_v50 }
 0x4b4   : > { %5434 = vmatpush1.bf16.msra.mxu0 %v8000_v48 }
 0x4b5   : > { %5477 = vmatpush1.bf16.msra.mxu1 %v8003_v63  ;;  %5435 = vmatprep.subr.bf16.mxu0 %v8008_v42  ;;  %v3874_v42 = vrot.slane %v519_v18, %v8941_v10 }
 0x4b6   : > { %5478 = vmatprep.subr.bf16.mxu1 %v8011_v39 }
 0x4b8   : > { %5436 = vmatpush1.bf16.msra.mxu0 %v8006_v21 }
 0x4b9   : > { %5479 = vmatpush1.bf16.msra.mxu1 %v8009_v52  ;;  %5437 = vmatprep.subr.bf16.mxu0 %v8014_v8  ;;  %v3878_v8 = vrot.slane %v519_v18, %v8949_v16 }
 0x4ba   : > { %5480 = vmatprep.subr.bf16.mxu1 %v8017_v29 }
 0x4bc   : > { %5438 = vmatpush2.bf16.msra.mxu0 %v8012_v32 }
 0x4bd   : > { %5481 = vmatpush2.bf16.msra.mxu1 %v8015_v20  ;;  %5439 = vmatprep.subr.bf16.mxu0 %v8020_v35 }
 0x4be   : > { %5482 = vmatprep.subr.bf16.mxu1 %v8023_v6 }
 0x4c0   : > { %5440 = vmatpush2.bf16.msra.mxu0 %v8018_v62 }
 0x4c1   : > { %5483 = vmatpush2.bf16.msra.mxu1 %v8021_v47  ;;  %5441 = vmatprep.subr.bf16.mxu0 %v8026_v40 }
 0x4c2   : > { %5484 = vmatprep.subr.bf16.mxu1 %v8029_v43 }
 0x4c4   : > { %5442 = vmatpush2.bf16.msra.mxu0 %v8024_v26 }
 0x4c5   : > { %5485 = vmatpush2.bf16.msra.mxu1 %v8027_v14  ;;  %5443 = vmatprep.subr.bf16.mxu0 %v8032_v33 }
 0x4c6   : > { %5486 = vmatprep.subr.bf16.mxu1 %v8035_v60 }
 0x4c8   : > { %5444 = vmatpush2.bf16.msra.mxu0 %v8030_v53 }
 0x4c9   : > { %5487 = vmatpush2.bf16.msra.mxu1 %v8033_v1  ;;  %5445 = vmatprep.subr.bf16.mxu0 %v8038_v58 }
 0x4ca   : > { %5488 = vmatprep.subr.bf16.mxu1 %v8041_v34 }
 0x4cc   : > { %5446 = vmatpush2.bf16.msra.mxu0 %v8036_v57 }
 0x4cd   : > { %5489 = vmatpush2.bf16.msra.mxu1 %v8039_v51  ;;  %5447 = vmatprep.subr.bf16.mxu0 %v8044_v61 }
 0x4ce   : > { %5490 = vmatprep.subr.bf16.mxu1 %v8047_v41 }
 0x4d0   : > { %5448 = vmatpush2.bf16.msra.mxu0 %v8042_v7 }
 0x4d1   : > { %5491 = vmatpush2.bf16.msra.mxu1 %v8045_v44  ;;  %5449 = vmatprep.subr.bf16.mxu0 %v8050_v49 }
 0x4d2   : > { %5492 = vmatprep.subr.bf16.mxu1 %v8053_v28 }
 0x4d4   : > { %5450 = vmatpush2.bf16.msra.mxu0 %v8048_v45 }
 0x4d5   : > { %5493 = vmatpush2.bf16.msra.mxu1 %v8051_v46  ;;  %5451 = vmatprep.subr.bf16.mxu0 %v8056_v37 }
 0x4d6   : > { %5494 = vmatprep.subr.bf16.mxu1 %v8059_v4 }
 0x4d8   : > { %5452 = vmatpush2.bf16.msra.mxu0 %v8054_v11 }
 0x4d9   : > { %5495 = vmatpush2.bf16.msra.mxu1 %v8057_v55 }
 0x4db   : > { %5454 = vmatmul.mubr.bf16.vlgmr.msra.gmra.mxu0 %v9152_v54  ;;  %v5197_v19 = vpop.f32.mrf.mxu0  ;;  %v5240_v56 = vpop.f32.mrf.mxu1 }
 0x4dc   : > { %5497 = vmatmul.mubr.bf16.vlgmr.msra.gmra.mxu1 %v9156_v15  ;;  %v3866_v15 = vrot.slane %v519_v18, %v8939_v59 }
 0x4dd   : > { %v5199_v2 = vpop.f32.mrf.mxu0  ;;  %v5242_v3 = vpop.f32.mrf.mxu1 }
 0x4de   : > { %v5200_v50 = vadd.f32 %v5199_v2, %v3870_v23  ;;  %v5198_v48 = vadd.f32 %v5197_v19, %v3866_v15 }
 0x4df   : > { %v5201_v22 = vpop.f32.mrf.mxu0  ;;  %v5244_v31 = vpop.f32.mrf.mxu1 }
 0x4e0   : > { %v5243_v21 = vadd.f32 %v5242_v3, %v5200_v50  ;;  %v5241_v29 = vadd.f32 %v5240_v56, %v5198_v48  ;;  %v5202_v32 = vadd.f32 %v5201_v22, %v3866_v15  ;;  %v8065_v15 = vld [vmem:[%s8743_s15 + $0x2e4] ss:$16 sps:$4 sm:$0xff]   ;;  %v8066_v50 = vld [vmem:[%s8743_s15 + $0xc0] ss:$16 sps:$4 sm:$0xff]  }
 0x4e1   : > { %v5203_v9 = vpop.f32.mrf.mxu0  ;;  %v5246_v38 = vpop.f32.mrf.mxu1  ;;  %6463 = vmatprep.subr.bf16.mxu1 %v8065_v15  ;;  %v8069_v48 = vld [vmem:[%s8743_s15 + $0x2c0] ss:$16 sps:$4 sm:$0xff]   ;;  %v8116_v15 = vld [vmem:[%s8743_s15 + $0x1c4] ss:$16 sps:$4 sm:$0xff]  }
 0x4e2   : > { %v5204_v52 = vadd.f32 %v5203_v9, %v3870_v23  ;;  %v5245_v26 = vadd.f32 %v5244_v31, %v5202_v32  ;;  %v8060_v23 = vld [vmem:[%s8743_s15 + $0xe0] ss:$16 sps:$4 sm:$0xff]  }
 0x4e3   : > { %v8081_v32 = vld [vmem:[%s8743_s15 + $0x280] ss:$16 sps:$4 sm:$0xff]  }
 0x4e4   : > { %v5247_v40 = vadd.f32 %v5246_v38, %v5204_v52  ;;  %v8080_v52 = vld [vmem:[%s8743_s15 + $0x84] ss:$16 sps:$4 sm:$0xff]  }
 0x51b   : > { %v5283_v36 = vpop.f32.mrf.mxu0  ;;  %v5326_v30 = vpop.f32.mrf.mxu1 }
 0x51c   : > { %v5284_v47 = vadd.f32 %v5283_v36, %v5241_v29  ;;  %v8078_v29 = vld [vmem:[%s8743_s15 + $0x80] ss:$16 sps:$4 sm:$0xff]  }
 0x51d   : > { %v5285_v25 = vpop.f32.mrf.mxu0  ;;  %v5328_v12 = vpop.f32.mrf.mxu1 }
 0x51e   : > { %v5286_v20 = vadd.f32 %v5285_v25, %v5243_v21  ;;  %v9174_v34 = vadd.f32 %v5326_v30, %v5284_v47  ;;  %v8075_v21 = vld [vmem:[%s8743_s15 + $0x2a0] ss:$16 sps:$4 sm:$0xff]   ;;  %v8092_v47 = vld [vmem:[%s8743_s15 + $0x44] ss:$16 sps:$4 sm:$0xff]  }
 0x51f   : > { %v5287_v17 = vpop.f32.mrf.mxu0  ;;  %v5330_v13 = vpop.f32.mrf.mxu1 }
 0x520   : > { %v9172_v14 = vadd.f32 %v5328_v12, %v5286_v20  ;;  %v5288_v57 = vadd.f32 %v5287_v17, %v5245_v26  ;;  %v8086_v20 = vld [vmem:[%s8743_s15 + $0x64] ss:$16 sps:$4 sm:$0xff]   ;;  %v8093_v26 = vld [vmem:[%s8743_s15 + $0x240] ss:$16 sps:$4 sm:$0xff]  }
 0x521   : > { %v5289_v54 = vpop.f32.mrf.mxu0  ;;  %v5332_v27 = vpop.f32.mrf.mxu1 }
 0x522   : > { %v5290_v60 = vadd.f32 %v5289_v54, %v5247_v40  ;;  %v5507_v49 = vadd.f32 %v9172_v14, %v9174_v34  ;;  %v9182_v55 = vadd.f32 %v5330_v13, %v5288_v57  ;;  %v8062_v54 = vld [vmem:[%s8743_s15 + $0xe4] ss:$16 sps:$4 sm:$0xff]  }
 0x523   : > { %6420 = vmatprep.subr.bf16.mxu0 %v8062_v54  ;;  %v8095_v40 = vld [vmem:[%s8743_s15 + $0x244] ss:$16 sps:$4 sm:$0xff]  }
 0x524   : > { %v9178_v45 = vadd.f32 %v5332_v27, %v5290_v60  ;;  %v8063_v27 = vld [vmem:[%s8743_s15 + $0x2e0] ss:$16 sps:$4 sm:$0xff]   ;;  %6421 = vmatpush1.bf16.msra.mxu0 %v8060_v23  ;;  %v8101_v60 = vld [vmem:[%s8743_s15 + $0x224] ss:$16 sps:$4 sm:$0xff]  }
 0x525   : > { %6464 = vmatpush1.bf16.msra.mxu1 %v8063_v27  ;;  %v8107_v57 = vld [vmem:[%s8743_s15 + $0x204] ss:$16 sps:$4 sm:$0xff]   ;;  %v8111_v23 = vld [vmem:[%s8743_s15 + $0x3e0] ss:$16 sps:$4 sm:$0xff]  }
 0x526   : > { %v5512_v38 = vadd.f32 %v9178_v45, %v9182_v55  ;;  %v8113_v54 = vld [vmem:[%s8743_s15 + $0x3e4] ss:$16 sps:$4 sm:$0xff]   ;;  %v8114_v27 = vld [vmem:[%s8743_s15 + $0x1c0] ss:$16 sps:$4 sm:$0xff]  }
 0x55b   : > { %v5369_v5 = vpop.f32.mrf.mxu0 }
 0x55c   : > { %v5412_v24 = vpop.f32.mrf.mxu1  ;;  %v5370_v6 = vadd.f32 %v5369_v5, %v3874_v42  ;;  %v8068_v5 = vld [vmem:[%s8743_s15 + $0xc4] ss:$16 sps:$4 sm:$0xff]  }
 0x55d   : > { %v5371_v63 = vpop.f32.mrf.mxu0  ;;  %6422 = vmatprep.subr.bf16.mxu0 %v8068_v5  ;;  %v8117_v5 = vld [vmem:[%s8743_s15 + $0x3c0] ss:$16 sps:$4 sm:$0xff]  }
 0x55e   : > { %v5414_v39 = vpop.f32.mrf.mxu1  ;;  %v5372_v43 = vadd.f32 %v5371_v63, %v3878_v8  ;;  %v5413_v53 = vadd.f32 %v5412_v24, %v5370_v6  ;;  %v8071_v24 = vld [vmem:[%s8743_s15 + $0x2c4] ss:$16 sps:$4 sm:$0xff]   ;;  %6423 = vmatpush1.bf16.msra.mxu0 %v8066_v50  ;;  %v8084_v6 = vld [vmem:[%s8743_s15 + $0x60] ss:$16 sps:$4 sm:$0xff]  }
 0x55f   : > { %v5373_v35 = vpop.f32.mrf.mxu0  ;;  %v8074_v63 = vld [vmem:[%s8743_s15 + $0xa4] ss:$16 sps:$4 sm:$0xff]   ;;  %6465 = vmatprep.subr.bf16.mxu1 %v8071_v24 }
 0x560   : > { %v5416_v62 = vpop.f32.mrf.mxu1  ;;  %v5374_v1 = vadd.f32 %v5373_v35, %v3874_v42  ;;  %v5415_v61 = vadd.f32 %v5414_v39, %v5372_v43  ;;  %v8077_v42 = vld [vmem:[%s8743_s15 + $0x2a4] ss:$16 sps:$4 sm:$0xff]   ;;  %v8072_v39 = vld [vmem:[%s8743_s15 + $0xa0] ss:$16 sps:$4 sm:$0xff]   ;;  %6466 = vmatpush1.bf16.msra.mxu1 %v8069_v48  ;;  %6424 = vmatprep.subr.bf16.mxu0 %v8074_v63 }
 0x561   : > { %v5375_v33 = vpop.f32.mrf.mxu0  ;;  %6467 = vmatprep.subr.bf16.mxu1 %v8077_v42  ;;  %v8089_v35 = vld [vmem:[%s8743_s15 + $0x264] ss:$16 sps:$4 sm:$0xff]   ;;  %v8090_v43 = vld [vmem:[%s8743_s15 + $0x40] ss:$16 sps:$4 sm:$0xff]  }
 0x562   : > { %v5418_v58 = vpop.f32.mrf.mxu1  ;;  %v5376_v41 = vadd.f32 %v5375_v33, %v3878_v8  ;;  %v5417_v46 = vadd.f32 %v5416_v62, %v5374_v1  ;;  %v8083_v8 = vld [vmem:[%s8743_s15 + $0x284] ss:$16 sps:$4 sm:$0xff]   ;;  %6425 = vmatpush1.bf16.msra.mxu0 %v8072_v39  ;;  %v8087_v62 = vld [vmem:[%s8743_s15 + $0x260] ss:$16 sps:$4 sm:$0xff]  }
 0x563   : > { %6426 = vmatprep.subr.bf16.mxu0 %v8080_v52  ;;  %v8098_v33 = vld [vmem:[%s8743_s15 + $0x24] ss:$16 sps:$4 sm:$0xff]   ;;  %v8099_v1 = vld [vmem:[%s8743_s15 + $0x220] ss:$16 sps:$4 sm:$0xff]  }
 0x564   : > { %v5419_v56 = vadd.f32 %v5418_v58, %v5376_v41  ;;  %6468 = vmatpush1.bf16.msra.mxu1 %v8075_v21  ;;  %v8104_v58 = vld [vmem:[%s8743_s15 + $0x4] ss:$16 sps:$4 sm:$0xff]   ;;  %v8120_v63 = vld [vmem:[%s8743_s15 + $0x1a0] ss:$16 sps:$4 sm:$0xff]  }
 0x565   : > { %6469 = vmatprep.subr.bf16.mxu1 %v8083_v8  ;;  %v8119_v24 = vld [vmem:[%s8743_s15 + $0x3c4] ss:$16 sps:$4 sm:$0xff]   ;;  %v8123_v42 = vld [vmem:[%s8743_s15 + $0x3a0] ss:$16 sps:$4 sm:$0xff]  }
 0x566   : > { %6427 = vmatpush1.bf16.msra.mxu0 %v8078_v29  ;;  %v8122_v50 = vld [vmem:[%s8743_s15 + $0x1a4] ss:$16 sps:$4 sm:$0xff]   ;;  %v8126_v52 = vld [vmem:[%s8743_s15 + $0x180] ss:$16 sps:$4 sm:$0xff]  }
 0x567   : > { %6428 = vmatprep.subr.bf16.mxu0 %v8086_v20  ;;  %v8125_v48 = vld [vmem:[%s8743_s15 + $0x3a4] ss:$16 sps:$4 sm:$0xff]   ;;  %v8129_v8 = vld [vmem:[%s8743_s15 + $0x380] ss:$16 sps:$4 sm:$0xff]  }
 0x568   : > { %6470 = vmatpush1.bf16.msra.mxu1 %v8081_v32  ;;  %v8128_v39 = vld [vmem:[%s8743_s15 + $0x184] ss:$16 sps:$4 sm:$0xff]   ;;  %v8132_v20 = vld [vmem:[%s8743_s15 + $0x160] ss:$16 sps:$4 sm:$0xff]  }
 0x569   : > { %6471 = vmatprep.subr.bf16.mxu1 %v8089_v35  ;;  %v8131_v21 = vld [vmem:[%s8743_s15 + $0x384] ss:$16 sps:$4 sm:$0xff]   ;;  %v8135_v35 = vld [vmem:[%s8743_s15 + $0x360] ss:$16 sps:$4 sm:$0xff]  }
 0x56a   : > { %6429 = vmatpush1.bf16.msra.mxu0 %v8084_v6  ;;  %v8134_v29 = vld [vmem:[%s8743_s15 + $0x164] ss:$16 sps:$4 sm:$0xff]  }
 0x56b   : > { %6430 = vmatprep.subr.bf16.mxu0 %v8092_v47  ;;  %v8137_v32 = vld [vmem:[%s8743_s15 + $0x364] ss:$16 sps:$4 sm:$0xff]   ;;  %v8138_v47 = vld [vmem:[%s8743_s15 + $0x140] ss:$16 sps:$4 sm:$0xff]  }
 0x56c   : > { %6472 = vmatpush1.bf16.msra.mxu1 %v8087_v62  ;;  %v8140_v6 = vld [vmem:[%s8743_s15 + $0x144] ss:$16 sps:$4 sm:$0xff]  }
 0x56d   : > { %6473 = vmatprep.subr.bf16.mxu1 %v8095_v40  ;;  %v8143_v62 = vld [vmem:[%s8743_s15 + $0x344] ss:$16 sps:$4 sm:$0xff]   ;;  %v8141_v40 = vld [vmem:[%s8743_s15 + $0x340] ss:$16 sps:$4 sm:$0xff]  }
 0x56e   : > { %6431 = vmatpush1.bf16.msra.mxu0 %v8090_v43  ;;  %v8146_v43 = vld [vmem:[%s8743_s15 + $0x124] ss:$16 sps:$4 sm:$0xff]  }
 0x56f   : > { %6432 = vmatprep.subr.bf16.mxu0 %v8098_v33  ;;  %v8144_v33 = vld [vmem:[%s8743_s15 + $0x120] ss:$16 sps:$4 sm:$0xff]  }
 0x570   : > { %6474 = vmatpush1.bf16.msra.mxu1 %v8093_v26  ;;  %v8149_v26 = vld [vmem:[%s8743_s15 + $0x324] ss:$16 sps:$4 sm:$0xff]  }
 0x571   : > { %6475 = vmatprep.subr.bf16.mxu1 %v8101_v60  ;;  %v8147_v60 = vld [vmem:[%s8743_s15 + $0x320] ss:$16 sps:$4 sm:$0xff]  }
 0x574   : > { %6476 = vmatpush1.bf16.msra.mxu1 %v8099_v1  ;;  %v8155_v1 = vld [vmem:[%s8743_s15 + $0x304] ss:$16 sps:$4 sm:$0xff]  }
 0x575   : > { %6477 = vmatprep.subr.bf16.mxu1 %v8107_v57  ;;  %v8153_v57 = vld [vmem:[%s8743_s15 + $0x300] ss:$16 sps:$4 sm:$0xff]  }
 0x59b   : > { %v5455_v51 = vpop.f32.mrf.mxu0 }
 0x59c   : > { %v5456_v7 = vadd.f32 %v5455_v51, %v5413_v53  ;;  %v5498_v44 = vpop.f32.mrf.mxu1  ;;  %v8096_v53 = vld [vmem:[%s8743_s15 + $0x20] ss:$16 sps:$4 sm:$0xff]  }
 0x59d   : > { %v5457_v28 = vpop.f32.mrf.mxu0  ;;  %6433 = vmatpush1.bf16.msra.mxu0 %v8096_v53  ;;  %v8102_v51 = vld [vmem:[%s8743_s15] ss:$16 sps:$4 sm:$0xff]   ;;  %v8152_v53 = vld [vmem:[%s8743_s15 + $0x104] ss:$16 sps:$4 sm:$0xff]  }
 0x59e   : > { %v9180_v37 = vadd.f32 %v5498_v44, %v5456_v7  ;;  %v5458_v4 = vadd.f32 %v5457_v28, %v5415_v61  ;;  %v5500_v11 = vpop.f32.mrf.mxu1  ;;  %6434 = vmatprep.subr.bf16.mxu0 %v8104_v58  ;;  %v8105_v61 = vld [vmem:[%s8743_s15 + $0x200] ss:$16 sps:$4 sm:$0xff]  }
 0x59f   : > { %v5459_v19 = vpop.f32.mrf.mxu0  ;;  %6478 = vmatpush1.bf16.msra.mxu1 %v8105_v61  ;;  %v8150_v58 = vld [vmem:[%s8743_s15 + $0x100] ss:$16 sps:$4 sm:$0xff]   ;;  %v8161_v61 = vld [vmem:[%s8743_s15 + $0x2ec] ss:$16 sps:$4 sm:$0xff]  }
 0x5a0   : > { %v5508_v2 = vadd.f32 %v5507_v49, %v9180_v37  ;;  %v9185_v3 = vadd.f32 %v5500_v11, %v5458_v4  ;;  %v5460_v22 = vadd.f32 %v5459_v19, %v5417_v46  ;;  %v5502_v31 = vpop.f32.mrf.mxu1  ;;  %6479 = vmatprep.subr.bf16.mxu1 %v8113_v54 }
 0x5a1   : > { %v5461_v9 = vpop.f32.mrf.mxu0  ;;  %6435 = vmatpush1.bf16.msra.mxu0 %v8102_v51  ;;  %v8158_v51 = vld [vmem:[%s8743_s15 + $0xec] ss:$16 sps:$4 sm:$0xff]  }
 0x5a2   : > { %v9189_v36 = vadd.f32 %v5502_v31, %v5460_v22  ;;  %v5462_v30 = vadd.f32 %v5461_v9, %v5419_v56  ;;  %v5509_v25 = vadd.f32 %v5508_v2, %v9185_v3  ;;  %v5504_v12 = vpop.f32.mrf.mxu1 }
 0x5a3   : > { %6480 = vmatpush2.bf16.msra.mxu1 %v8111_v23 }
 0x5a4   : > { %v5513_v17 = vadd.f32 %v5512_v38, %v9189_v36  ;;  %v9193_v13 = vadd.f32 %v5504_v12, %v5462_v30  ;;  %5510 = vadd.xlane.f32.xlu0 %v5509_v25  ;;  %6481 = vmatprep.subr.bf16.mxu1 %v8119_v24 }
 0x5a6   : > { %v5514_v18 = vadd.f32 %v5513_v17, %v9193_v13 }
 0x5a7   : > { %6482 = vmatpush2.bf16.msra.mxu1 %v8117_v5 }
 0x5a8   : > { %5515 = vadd.xlane.f32.xlu1 %v5514_v18  ;;  %v8110_v18 = vld [vmem:[%s8743_s15 + $0x1e4] ss:$16 sps:$4 sm:$0xff]   ;;  %6483 = vmatprep.subr.bf16.mxu1 %v8125_v48 }
 0x5a9   : > { %6436 = vmatprep.subr.bf16.mxu0 %v8110_v18 }
 0x5ab   : > { %6484 = vmatpush2.bf16.msra.mxu1 %v8123_v42 }
 0x5ac   : > { %6485 = vmatprep.subr.bf16.mxu1 %v8131_v21 }
 0x5af   : > { %6486 = vmatpush2.bf16.msra.mxu1 %v8129_v8 }
 0x5b0   : > { %6487 = vmatprep.subr.bf16.mxu1 %v8137_v32 }
 0x5b3   : > { %6488 = vmatpush2.bf16.msra.mxu1 %v8135_v35 }
 0x5b4   : > { %6489 = vmatprep.subr.bf16.mxu1 %v8143_v62 }
 0x5b7   : > { %6490 = vmatpush2.bf16.msra.mxu1 %v8141_v40 }
 0x5b8   : > { %6491 = vmatprep.subr.bf16.mxu1 %v8149_v26 }
 0x5bb   : > { %6492 = vmatpush2.bf16.msra.mxu1 %v8147_v60  ;;  %v8159_v60 = vld [vmem:[%s8743_s15 + $0x2e8] ss:$16 sps:$4 sm:$0xff]  }
 0x5bc   : > { %6493 = vmatprep.subr.bf16.mxu1 %v8155_v1 }
 0x5bf   : > { %6494 = vmatpush2.bf16.msra.mxu1 %v8153_v57  ;;  %v8167_v57 = vld [vmem:[%s8743_s15 + $0x2cc] ss:$16 sps:$4 sm:$0xff]  }
 0x5c0   : > { %6549 = vmatprep.subr.bf16.mxu1 %v8161_v61  ;;  %v8165_v61 = vld [vmem:[%s8743_s15 + $0x2c8] ss:$16 sps:$4 sm:$0xff]  }
 0x62d   : > { %v5511_v41 = vpop.xlane.xlu0 %5510 }
 0x62e   : > { %v5518_v7 = vmul.f32 0.001953125, %v5511_v41 }
 0x630   : > { %v9229_v44 = vsub.f32 %v9174_v34, %v5518_v7  ;;  %v9232_v49 = vsub.f32 %v9172_v14, %v5518_v7  ;;  %v9235_v28 = vsub.f32 %v9180_v37, %v5518_v7  ;;  %v9238_v4 = vsub.f32 %v9185_v3, %v5518_v7 }
 0x631   : > { %v5516_v46 = vpop.xlane.xlu1 %5515 }
 0x632   : > { %v5519_v11 = vmul.f32 0.001953125, %v5516_v46  ;;  %v5528_v19 = vmul.f32 %v9229_v44, %v9229_v44  ;;  %v5529_v56 = vmul.f32 %v9232_v49, %v9232_v49  ;;  %v5530_v34 = vmul.f32 %v9235_v28, %v9235_v28 }
 0x633   : > { %v5531_v22 = vmul.f32 %v9238_v4, %v9238_v4 }
 0x634   : > { %v9247_v14 = vsub.f32 %v9182_v55, %v5519_v11  ;;  %v9250_v37 = vsub.f32 %v9178_v45, %v5519_v11  ;;  %v5536_v2 = vadd.f32 %v5529_v56, %v5528_v19  ;;  %v9253_v3 = vsub.f32 %v9189_v36, %v5519_v11 }
 0x635   : > { %v9258_v9 = vsub.f32 %v9193_v13, %v5519_v11  ;;  %v8108_v13 = vld [vmem:[%s8743_s15 + $0x1e0] ss:$16 sps:$4 sm:$0xff]  }
 0x636   : > { %v5537_v31 = vadd.f32 %v5536_v2, %v5530_v34  ;;  %v5532_v55 = vmul.f32 %v9247_v14, %v9247_v14  ;;  %v5533_v45 = vmul.f32 %v9250_v37, %v9250_v37  ;;  %v5534_v36 = vmul.f32 %v9253_v3, %v9253_v3  ;;  %6437 = vmatpush2.bf16.msra.mxu0 %v8108_v13  ;;  %v521_v34 = vld [vmem:[#allocation8 + $0x4] ss:$8 sm:$0xf] }
 0x637   : > { %v5535_v25 = vmul.f32 %v9258_v9, %v9258_v9  ;;  %6438 = vmatprep.subr.bf16.mxu0 %v8116_v15  ;;  %v5568_v2 = vrot.slane %v521_v34, %v8937_v0 }
 0x638   : > { %v5538_v38 = vadd.f32 %v5537_v31, %v5531_v22  ;;  %v5541_v30 = vadd.f32 %v5533_v45, %v5532_v55  ;;  %v5576_v22 = vrot.slane %v521_v34, %v8949_v16  ;;  %v523_v55 = vld [vmem:[#allocation8 + $0x5] ss:$8 sm:$0xf]  ;;  %v5564_v45 = vrot.slane %v521_v34, %v8939_v59 }
 0x639   : > { %v5597_v13 = vrot.slane %v523_v55, %v8937_v0  ;;  %v5605_v23 = vrot.slane %v523_v55, %v8949_v16  ;;  %v5593_v15 = vrot.slane %v523_v55, %v8939_v59  ;;  %v5601_v24 = vrot.slane %v523_v55, %v8941_v10  ;;  %v8180_v55 = vld [vmem:[%s8743_s15 + $0x68] ss:$16 sps:$4 sm:$0xff]  }
 0x63a   : > { %5539 = vadd.xlane.f32.xlu0 %v5538_v38  ;;  %v5542_v12 = vadd.f32 %v5541_v30, %v5534_v36  ;;  %6439 = vmatpush2.bf16.msra.mxu0 %v8114_v27  ;;  %v5572_v38 = vrot.slane %v521_v34, %v8941_v10  ;;  %v8174_v34 = vld [vmem:[%s8743_s15 + $0x88] ss:$16 sps:$4 sm:$0xff]  }
 0x63b   : > { %6440 = vmatprep.subr.bf16.mxu0 %v8122_v50 }
 0x63c   : > { %v5543_v17 = vadd.f32 %v5542_v12, %v5535_v25 }
 0x63e   : > { %5544 = vadd.xlane.f32.xlu1 %v5543_v17  ;;  %6441 = vmatpush2.bf16.msra.mxu0 %v8120_v63 }
 0x63f   : > { %6442 = vmatprep.subr.bf16.mxu0 %v8128_v39 }
 0x642   : > { %6443 = vmatpush2.bf16.msra.mxu0 %v8126_v52 }
 0x643   : > { %6444 = vmatprep.subr.bf16.mxu0 %v8134_v29 }
 0x646   : > { %6445 = vmatpush2.bf16.msra.mxu0 %v8132_v20 }
 0x647   : > { %6446 = vmatprep.subr.bf16.mxu0 %v8140_v6 }
 0x64a   : > { %6447 = vmatpush2.bf16.msra.mxu0 %v8138_v47 }
 0x64b   : > { %6448 = vmatprep.subr.bf16.mxu0 %v8146_v43 }
 0x64e   : > { %6449 = vmatpush2.bf16.msra.mxu0 %v8144_v33  ;;  %v8156_v33 = vld [vmem:[%s8743_s15 + $0xe8] ss:$16 sps:$4 sm:$0xff]  }
 0x64f   : > { %6450 = vmatprep.subr.bf16.mxu0 %v8152_v53 }
 0x652   : > { %6451 = vmatpush2.bf16.msra.mxu0 %v8150_v58  ;;  %v8164_v58 = vld [vmem:[%s8743_s15 + $0xcc] ss:$16 sps:$4 sm:$0xff]  }
 0x653   : > { %6506 = vmatprep.subr.bf16.mxu0 %v8158_v51  ;;  %v8162_v51 = vld [vmem:[%s8743_s15 + $0xc8] ss:$16 sps:$4 sm:$0xff]  }
 0x6c3   : > { %v5540_v41 = vpop.xlane.xlu0 %5539 }
 0x6c4   : > { %v5546_v7 = vmul.f32 0.001953125, %v5540_v41  ;;  %v8170_v41 = vld [vmem:[%s8743_s15 + $0xac] ss:$16 sps:$4 sm:$0xff]  }
 0x6c6   : > { %v5548_v46 = vadd.f32 1e-05, %v5546_v7  ;;  %v8173_v7 = vld [vmem:[%s8743_s15 + $0x2ac] ss:$16 sps:$4 sm:$0xff]  }
 0x6c7   : > { %v5545_v11 = vpop.xlane.xlu1 %5544 }
 0x6c8   : > { %8256 = vrsqrt.f32 %v5548_v46  ;;  %v5547_v19 = vmul.f32 0.001953125, %v5545_v11  ;;  %v8168_v46 = vld [vmem:[%s8743_s15 + $0xa8] ss:$16 sps:$4 sm:$0xff]  }
 0x6c9   : > { %v8171_v11 = vld [vmem:[%s8743_s15 + $0x2a8] ss:$16 sps:$4 sm:$0xff]  }
 0x6ca   : > { %v5549_v56 = vadd.f32 1e-05, %v5547_v19  ;;  %v8176_v19 = vld [vmem:[%s8743_s15 + $0x8c] ss:$16 sps:$4 sm:$0xff]  }
 0x6cc   : > { %8258 = vrsqrt.f32 %v5549_v56  ;;  %v8179_v56 = vld [vmem:[%s8743_s15 + $0x28c] ss:$16 sps:$4 sm:$0xff]  }
 0x6d5   : > { %v8257_v31 = vpop.eup %8256 }
 0x6d6   : > { %v5553_v36 = vmul.f32 %v8257_v31, %v9232_v49  ;;  %v5555_v30 = vmul.f32 %v8257_v31, %v9238_v4  ;;  %v5552_v25 = vmul.f32 %v8257_v31, %v9229_v44  ;;  %v5554_v12 = vmul.f32 %v8257_v31, %v9235_v28  ;;  %v8185_v31 = vld [vmem:[%s8743_s15 + $0x26c] ss:$16 sps:$4 sm:$0xff]  }
 0x6d8   : > { %v5582_v17 = vmul.f32 %v5568_v2, %v5553_v36  ;;  %v5584_v18 = vmul.f32 %v5576_v22, %v5555_v30  ;;  %v5581_v27 = vmul.f32 %v5564_v45, %v5552_v25  ;;  %v5583_v5 = vmul.f32 %v5572_v38, %v5554_v12  ;;  %v8191_v36 = vld [vmem:[%s8743_s15 + $0x24c] ss:$16 sps:$4 sm:$0xff]   ;;  %v8186_v30 = vld [vmem:[%s8743_s15 + $0x48] ss:$16 sps:$4 sm:$0xff]  }
 0x6d9   : > { %v8259_v54 = vpop.eup %8258  ;;  %v8189_v25 = vld [vmem:[%s8743_s15 + $0x248] ss:$16 sps:$4 sm:$0xff]   ;;  %v8194_v12 = vld [vmem:[%s8743_s15 + $0x2c] ss:$16 sps:$4 sm:$0xff]  }
 0x6da   : > { %v5557_v49 = vmul.f32 %v8259_v54, %v9250_v37  ;;  %v5559_v4 = vmul.f32 %v8259_v54, %v9258_v9  ;;  %v5556_v44 = vmul.f32 %v8259_v54, %v9247_v14  ;;  %v5558_v28 = vmul.f32 %v8259_v54, %v9253_v3  ;;  %v8203_v54 = vld [vmem:[%s8743_s15 + $0x20c] ss:$16 sps:$4 sm:$0xff]  }
 0x6db   : > { %v5611_v48 = vadd.f32 %v5597_v13, %v5582_v17  ;;  %v5613_v42 = vadd.f32 %v5605_v23, %v5584_v18  ;;  %v5610_v21 = vadd.f32 %v5593_v15, %v5581_v27  ;;  %v5612_v8 = vadd.f32 %v5601_v24, %v5583_v5  ;;  %v8197_v17 = vld [vmem:[%s8743_s15 + $0x22c] ss:$16 sps:$4 sm:$0xff]   ;;  %v8195_v18 = vld [vmem:[%s8743_s15 + $0x228] ss:$16 sps:$4 sm:$0xff]  }
 0x6dc   : > { %v5586_v50 = vmul.f32 %v5568_v2, %v5557_v49  ;;  %v5588_v63 = vmul.f32 %v5576_v22, %v5559_v4  ;;  %v5585_v39 = vmul.f32 %v5564_v45, %v5556_v44  ;;  %v5587_v52 = vmul.f32 %v5572_v38, %v5558_v28  ;;  %v8177_v2 = vld [vmem:[%s8743_s15 + $0x288] ss:$16 sps:$4 sm:$0xff]   ;;  %v8182_v22 = vld [vmem:[%s8743_s15 + $0x6c] ss:$16 sps:$4 sm:$0xff]  }
 0x6dd   : > { %v5619_v35 = vmax.f32 %v5611_v48, 0.0  ;;  %v5621_v14 = vmax.f32 %v5613_v42, 0.0  ;;  %v5618_v6 = vmax.f32 %v5610_v21, 0.0  ;;  %v5620_v47 = vmax.f32 %v5612_v8, 0.0  ;;  %v8183_v45 = vld [vmem:[%s8743_s15 + $0x268] ss:$16 sps:$4 sm:$0xff]  }
 0x6de   : > { %v5615_v29 = vadd.f32 %v5597_v13, %v5586_v50  ;;  %v5617_v32 = vadd.f32 %v5605_v23, %v5588_v63  ;;  %v5614_v20 = vadd.f32 %v5593_v15, %v5585_v39  ;;  %v5616_v37 = vadd.f32 %v5601_v24, %v5587_v52  ;;  %v8188_v38 = vld [vmem:[%s8743_s15 + $0x4c] ss:$16 sps:$4 sm:$0xff]   ;;  %v8192_v13 = vld [vmem:[%s8743_s15 + $0x28] ss:$16 sps:$4 sm:$0xff]  }
 0x6df   : > { %v8200_v23 = vld [vmem:[%s8743_s15 + $0xc] ss:$16 sps:$4 sm:$0xff]   ;;  %v8198_v27 = vld [vmem:[%s8743_s15 + $0x8] ss:$16 sps:$4 sm:$0xff]  }
 0x6e0   : > { %v5623_v9 = vmax.f32 %v5615_v29, 0.0  ;;  %v5625_v3 = vmax.f32 %v5617_v32, 0.0  ;;  %v5622_v62 = vmax.f32 %v5614_v20, 0.0  ;;  %v5624_v40 = vmax.f32 %v5616_v37, 0.0  ;;  %v8201_v15 = vld [vmem:[%s8743_s15 + $0x208] ss:$16 sps:$4 sm:$0xff]  }
 0x6e1   : > { %v8206_v5 = vld [vmem:[%s8743_s15 + $0x1ec] ss:$16 sps:$4 sm:$0xff]   ;;  %v8204_v49 = vld [vmem:[%s8743_s15 + $0x1e8] ss:$16 sps:$4 sm:$0xff]  }
 0x6e2   : > { %v5627_v43 = vpack.c.bf16 %v5623_v9, %v5619_v35  ;;  %v5629_v26 = vpack.c.bf16 %v5625_v3, %v5621_v14  ;;  %v9320_v53 = vpack.c.bf16 %v5622_v62, %v5618_v6  ;;  %v9322_v1 = vpack.c.bf16 %v5624_v40, %v5620_v47  ;;  %v8209_v24 = vld [vmem:[%s8743_s15 + $0x3ec] ss:$16 sps:$4 sm:$0xff]   ;;  %v8207_v4 = vld [vmem:[%s8743_s15 + $0x3e8] ss:$16 sps:$4 sm:$0xff]  }
 0x6e3   : > { %v8212_v44 = vld [vmem:[%s8743_s15 + $0x1cc] ss:$16 sps:$4 sm:$0xff]   ;;  %v8210_v50 = vld [vmem:[%s8743_s15 + $0x1c8] ss:$16 sps:$4 sm:$0xff]  }
 0x6e4   : > { %6452 = vmatprep.mubr.bf16.mxu0 %v5627_v43  ;;  %6495 = vmatprep.mubr.bf16.mxu1 %v5629_v26  ;;  %v8215_v28 = vld [vmem:[%s8743_s15 + $0x3cc] ss:$16 sps:$4 sm:$0xff]   ;;  %v8213_v48 = vld [vmem:[%s8743_s15 + $0x3c8] ss:$16 sps:$4 sm:$0xff]  }
 0x6e5   : > { %6453 = vmatmul.mubr.bf16.vlgmr.msra.gmra.mxu0 %v9320_v53  ;;  %6496 = vmatmul.mubr.bf16.vlgmr.msra.gmra.mxu1 %v9322_v1  ;;  %v8218_v63 = vld [vmem:[%s8743_s15 + $0x1ac] ss:$16 sps:$4 sm:$0xff]   ;;  %v8216_v39 = vld [vmem:[%s8743_s15 + $0x1a8] ss:$16 sps:$4 sm:$0xff]  }
 0x6e6   : > { %6507 = vmatpush1.bf16.msra.mxu0 %v8156_v33  ;;  %6550 = vmatpush1.bf16.msra.mxu1 %v8159_v60  ;;  %v8221_v42 = vld [vmem:[%s8743_s15 + $0x3ac] ss:$16 sps:$4 sm:$0xff]   ;;  %v8219_v21 = vld [vmem:[%s8743_s15 + $0x3a8] ss:$16 sps:$4 sm:$0xff]  }
 0x6e7   : > { %6538 = vmatprep.mubr.bf16.mxu0 %v5627_v43  ;;  %6581 = vmatprep.mubr.bf16.mxu1 %v5629_v26  ;;  %v8224_v52 = vld [vmem:[%s8743_s15 + $0x18c] ss:$16 sps:$4 sm:$0xff]   ;;  %v8222_v29 = vld [vmem:[%s8743_s15 + $0x188] ss:$16 sps:$4 sm:$0xff]  }
 0x6e8   : > { %6508 = vmatprep.subr.bf16.mxu0 %v8164_v58  ;;  %6551 = vmatprep.subr.bf16.mxu1 %v8167_v57  ;;  %v8227_v8 = vld [vmem:[%s8743_s15 + $0x38c] ss:$16 sps:$4 sm:$0xff]   ;;  %v8225_v32 = vld [vmem:[%s8743_s15 + $0x388] ss:$16 sps:$4 sm:$0xff]  }
 0x6e9   : > { %v8230_v20 = vld [vmem:[%s8743_s15 + $0x16c] ss:$16 sps:$4 sm:$0xff]   ;;  %v8228_v35 = vld [vmem:[%s8743_s15 + $0x168] ss:$16 sps:$4 sm:$0xff]  }
 0x6ea   : > { %6509 = vmatpush1.bf16.msra.mxu0 %v8162_v51  ;;  %6552 = vmatpush1.bf16.msra.mxu1 %v8165_v61  ;;  %v8233_v37 = vld [vmem:[%s8743_s15 + $0x36c] ss:$16 sps:$4 sm:$0xff]   ;;  %v8231_v9 = vld [vmem:[%s8743_s15 + $0x368] ss:$16 sps:$4 sm:$0xff]   ;;  %v5758_v51 = vld [vmem:[%s348_s7] sm:$0xf] }
 0x6eb   : > { %6510 = vmatprep.subr.bf16.mxu0 %v8170_v41  ;;  %6553 = vmatprep.subr.bf16.mxu1 %v8173_v7  ;;  %v8236_v14 = vld [vmem:[%s8743_s15 + $0x14c] ss:$16 sps:$4 sm:$0xff]   ;;  %v8234_v6 = vld [vmem:[%s8743_s15 + $0x148] ss:$16 sps:$4 sm:$0xff]   ;;  %v5763_v61 = vrot.slane %v5758_v51, %v8939_v59  ;;  %v5767_v41 = vrot.slane %v5758_v51, %v8937_v0 }
 0x6ec   : > { %v8239_v3 = vld [vmem:[%s8743_s15 + $0x34c] ss:$16 sps:$4 sm:$0xff]   ;;  %v8237_v62 = vld [vmem:[%s8743_s15 + $0x348] ss:$16 sps:$4 sm:$0xff]  }
 0x6ed   : > { %v8242_v47 = vld [vmem:[%s8743_s15 + $0x12c] ss:$16 sps:$4 sm:$0xff]   ;;  %v8240_v43 = vld [vmem:[%s8743_s15 + $0x128] ss:$16 sps:$4 sm:$0xff]  }
 0x6ee   : > { %6511 = vmatpush1.bf16.msra.mxu0 %v8168_v46  ;;  %6554 = vmatpush1.bf16.msra.mxu1 %v8171_v11  ;;  %v8245_v40 = vld [vmem:[%s8743_s15 + $0x32c] ss:$16 sps:$4 sm:$0xff]   ;;  %v8243_v26 = vld [vmem:[%s8743_s15 + $0x328] ss:$16 sps:$4 sm:$0xff]  }
 0x6ef   : > { %6512 = vmatprep.subr.bf16.mxu0 %v8176_v19  ;;  %6555 = vmatprep.subr.bf16.mxu1 %v8179_v56  ;;  %v8248_v33 = vld [vmem:[%s8743_s15 + $0x10c] ss:$16 sps:$4 sm:$0xff]   ;;  %v8246_v58 = vld [vmem:[%s8743_s15 + $0x108] ss:$16 sps:$4 sm:$0xff]  }
 0x6f0   : > { %v8251_v60 = vld [vmem:[%s8743_s15 + $0x30c] ss:$16 sps:$4 sm:$0xff]   ;;  %v8249_v57 = vld [vmem:[%s8743_s15 + $0x308] ss:$16 sps:$4 sm:$0xff]  }
 0x6f2   : > { %6513 = vmatpush1.bf16.msra.mxu0 %v8174_v34  ;;  %6556 = vmatpush1.bf16.msra.mxu1 %v8177_v2 }
 0x6f3   : > { %6514 = vmatprep.subr.bf16.mxu0 %v8182_v22  ;;  %6557 = vmatprep.subr.bf16.mxu1 %v8185_v31 }
 0x6f6   : > { %6515 = vmatpush1.bf16.msra.mxu0 %v8180_v55  ;;  %6558 = vmatpush1.bf16.msra.mxu1 %v8183_v45 }
 0x6f7   : > { %6516 = vmatprep.subr.bf16.mxu0 %v8188_v38  ;;  %6559 = vmatprep.subr.bf16.mxu1 %v8191_v36  ;;  %v5771_v36 = vrot.slane %v5758_v51, %v8941_v10 }
 0x6fa   : > { %6517 = vmatpush1.bf16.msra.mxu0 %v8186_v30  ;;  %6560 = vmatpush1.bf16.msra.mxu1 %v8189_v25  ;;  %v5775_v30 = vrot.slane %v5758_v51, %v8949_v16 }
 0x6fb   : > { %6518 = vmatprep.subr.bf16.mxu0 %v8194_v12  ;;  %6561 = vmatprep.subr.bf16.mxu1 %v8197_v17 }
 0x6fe   : > { %6519 = vmatpush1.bf16.msra.mxu0 %v8192_v13  ;;  %6562 = vmatpush1.bf16.msra.mxu1 %v8195_v18 }
 0x6ff   : > { %6520 = vmatprep.subr.bf16.mxu0 %v8200_v23  ;;  %6563 = vmatprep.subr.bf16.mxu1 %v8203_v54 }
 0x702   : > { %6521 = vmatpush1.bf16.msra.mxu0 %v8198_v27  ;;  %6564 = vmatpush1.bf16.msra.mxu1 %v8201_v15 }
 0x703   : > { %6522 = vmatprep.subr.bf16.mxu0 %v8206_v5  ;;  %6565 = vmatprep.subr.bf16.mxu1 %v8209_v24 }
 0x706   : > { %6523 = vmatpush2.bf16.msra.mxu0 %v8204_v49  ;;  %6566 = vmatpush2.bf16.msra.mxu1 %v8207_v4 }
 0x707   : > { %6524 = vmatprep.subr.bf16.mxu0 %v8212_v44  ;;  %6567 = vmatprep.subr.bf16.mxu1 %v8215_v28 }
 0x70a   : > { %6525 = vmatpush2.bf16.msra.mxu0 %v8210_v50  ;;  %6568 = vmatpush2.bf16.msra.mxu1 %v8213_v48 }
 0x70b   : > { %6526 = vmatprep.subr.bf16.mxu0 %v8218_v63  ;;  %6569 = vmatprep.subr.bf16.mxu1 %v8221_v42 }
 0x70e   : > { %6527 = vmatpush2.bf16.msra.mxu0 %v8216_v39  ;;  %6570 = vmatpush2.bf16.msra.mxu1 %v8219_v21 }
 0x70f   : > { %6528 = vmatprep.subr.bf16.mxu0 %v8224_v52  ;;  %6571 = vmatprep.subr.bf16.mxu1 %v8227_v8 }
 0x712   : > { %6529 = vmatpush2.bf16.msra.mxu0 %v8222_v29  ;;  %6572 = vmatpush2.bf16.msra.mxu1 %v8225_v32 }
 0x713   : > { %6530 = vmatprep.subr.bf16.mxu0 %v8230_v20  ;;  %6573 = vmatprep.subr.bf16.mxu1 %v8233_v37 }
 0x716   : > { %6531 = vmatpush2.bf16.msra.mxu0 %v8228_v35  ;;  %6574 = vmatpush2.bf16.msra.mxu1 %v8231_v9 }
 0x717   : > { %6532 = vmatprep.subr.bf16.mxu0 %v8236_v14  ;;  %6575 = vmatprep.subr.bf16.mxu1 %v8239_v3 }
 0x71a   : > { %6533 = vmatpush2.bf16.msra.mxu0 %v8234_v6  ;;  %6576 = vmatpush2.bf16.msra.mxu1 %v8237_v62 }
 0x71b   : > { %6534 = vmatprep.subr.bf16.mxu0 %v8242_v47  ;;  %6577 = vmatprep.subr.bf16.mxu1 %v8245_v40 }
 0x71e   : > { %6535 = vmatpush2.bf16.msra.mxu0 %v8240_v43  ;;  %6578 = vmatpush2.bf16.msra.mxu1 %v8243_v26 }
 0x71f   : > { %6536 = vmatprep.subr.bf16.mxu0 %v8248_v33  ;;  %6579 = vmatprep.subr.bf16.mxu1 %v8251_v60 }
 0x722   : > { %6537 = vmatpush2.bf16.msra.mxu0 %v8246_v58  ;;  %6580 = vmatpush2.bf16.msra.mxu1 %v8249_v57 }
 0x725   : > { %6539 = vmatmul.mubr.bf16.vlgmr.msra.gmra.mxu0 %v9320_v53  ;;  %6582 = vmatmul.mubr.bf16.vlgmr.msra.gmra.mxu1 %v9322_v1 }
 0x7a5   : > { %v6454_v7 = vpop.f32.mrf.mxu0  ;;  %v6497_v46 = vpop.f32.mrf.mxu1 }
 0x7a6   : > { %v6455_v11 = vadd.f32 %v6454_v7, %v5763_v61 }
 0x7a7   : > { %v6456_v19 = vpop.f32.mrf.mxu0  ;;  %v6499_v56 = vpop.f32.mrf.mxu1 }
 0x7a8   : > { %v6498_v34 = vadd.f32 %v6497_v46, %v6455_v11  ;;  %v6457_v2 = vadd.f32 %v6456_v19, %v5767_v41 }
 0x7a9   : > { %v6458_v22 = vpop.f32.mrf.mxu0  ;;  %v6501_v31 = vpop.f32.mrf.mxu1 }
 0x7aa   : > { %6592 = vst [vmem:[%s9392_s21] sm:$0xff] %v6498_v34  ;;  %v6500_v59 = vadd.f32 %v6499_v56, %v6457_v2  ;;  %v6459_v53 = vadd.f32 %v6458_v22, %v5763_v61 }
 0x7ab   : > { %v6460_v1 = vpop.f32.mrf.mxu0  ;;  %v6503_v45 = vpop.f32.mrf.mxu1 }
 0x7ac   : > { %6593 = vst [vmem:[%s9392_s21 + $0x8] sm:$0xff] %v6500_v59  ;;  %v6502_v0 = vadd.f32 %v6501_v31, %v6459_v53  ;;  %v6461_v55 = vadd.f32 %v6460_v1, %v5767_v41 }
 0x7ae   : > { %6596 = vst [vmem:[%s9392_s21 + $0x20] sm:$0xff] %v6502_v0  ;;  %v6504_v38 = vadd.f32 %v6503_v45, %v6461_v55 }
 0x7b0   : > { %6597 = vst [vmem:[%s9392_s21 + $0x28] sm:$0xff] %v6504_v38 }
 0x7e5   : > { %v6540_v25 = vpop.f32.mrf.mxu0  ;;  %v6583_v12 = vpop.f32.mrf.mxu1 }
 0x7e6   : > { %v6541_v17 = vadd.f32 %v6540_v25, %v5771_v36 }
 0x7e7   : > { %v6542_v13 = vpop.f32.mrf.mxu0  ;;  %v6585_v18 = vpop.f32.mrf.mxu1 }
 0x7e8   : > { %v6584_v23 = vadd.f32 %v6583_v12, %v6541_v17  ;;  %v6543_v54 = vadd.f32 %v6542_v13, %v5775_v30 }
 0x7e9   : > { %v6544_v27 = vpop.f32.mrf.mxu0  ;;  %v6587_v15 = vpop.f32.mrf.mxu1 }
 0x7ea   : > { %6594 = vst [vmem:[%s9392_s21 + $0x10] sm:$0xff] %v6584_v23  ;;  %v6586_v5 = vadd.f32 %v6585_v18, %v6543_v54  ;;  %v6545_v10 = vadd.f32 %v6544_v27, %v5771_v36 }
 0x7eb   : > { %v6546_v16 = vpop.f32.mrf.mxu0  ;;  %v6589_v4 = vpop.f32.mrf.mxu1 }
 0x7ec   : > { %6595 = vst [vmem:[%s9392_s21 + $0x18] sm:$0xff] %v6586_v5  ;;  %v6588_v24 = vadd.f32 %v6587_v15, %v6545_v10  ;;  %v6547_v49 = vadd.f32 %v6546_v16, %v5775_v30 }
 0x7ee   : > { %6598 = vst [vmem:[%s9392_s21 + $0x30] sm:$0xff] %v6588_v24  ;;  %v6590_v44 = vadd.f32 %v6589_v4, %v6547_v49 }
 0x7f0   : > { %6599 = vst [vmem:[%s9392_s21 + $0x38] sm:$0xff] %v6590_v44 }
 0x7f1   : > { %8433 = shalt.err (!%p8430_p8)
}
 0x7f2   : > { %s8434_s29 = scalar_lea.hbm %s9409_s12, 1024  ;;  %s8438_s0 = scalar_lea.hbm %s9465_s6, 2048 }
 0x7f3   : > { %p8435_p0 = scmp.ne.s32.totalorder %s9409_s12, %s8434_s29  ;;  %p8439_p1 = scmp.lt.s32.totalorder %s9409_s12, %s9465_s6 }
 0x7f4   : > { %p8440_p2 = scmp.lt.s32.totalorder %s8438_s0, %s8434_s29 }
 0x7f5   : > { %p8436_p13 = pnand %p8435_p0, %p9498_p10 }
 0x7f6   : > { %p8441_p12 = por %p8440_p2, %p8439_p1 }
 0x7f7   : > { %p8437_p5 = pneg %p8436_p13 }
 0x7f9   : > { %p8442_p6 = pnand %p8441_p12, %p8437_p5 }
 0x7fb   : > { %8445 = shalt.err (!%p8442_p6)
}
 0x7fc   : > { %s8527_s7 = smov 512   ;;  %s8528_s4 = smov 1024  }
 0x7fd   : > { %s8529_s21 = smov 32  }
 0x7fe   : > { %7579 = dma.vmem_to_hbm [thread:$0]  (%p9498_p10), %s9403_s28, 1024, %s9409_s12, %s6601_s1, %s8527_s7, %s8528_s4, %s8529_s21  }
 0x7ff PF: > { %s9499_s19 = sld [smem:[#allocation18_spill]]  ;;  %p9502_p3 = scmp.ge.s32.totalorder %s8512_s26, 2 }
 0x800   : > { %s9500_s30 = sld [smem:[#allocation19_spill]] }
 0x805   : > { %s6632_s14 = sand.u32 1, %s9499_s19  }
 0x806   : > { %p9501_p11 = scmp.ne.s32.totalorder %s9500_s30, 0  ;;  %s6633_s24 = scalar_lea.sflag [#allocation4], %s6632_s14 }
 0x808   : > { %p7602_p4 = pnand %p9502_p3, %p9501_p11 }
 0x80a   : > { %p7603_p9 = pneg %p7602_p4 }
 0x80c   : > { %8487 = dma.done.wait (%p7603_p9), %s6633_s24, 1024  }
 0x80d   : > { %8489 = vsyncadd (%p7603_p9), %s6633_s24, 4294966272  ;;  %s22_s26 = sadd.s32 1, %s8512_s26   ;;  %s9503_s21 = smov %s8496_s22 }
 0x80e   : > { %p19_p7 = scmp.ge.s32.totalorder %s22_s26, 4   ;;  %s9504_s22 = smov %s8500_s23 }
 0x80f   : > { %s9505_s23 = smov %s8683_s17  ;;  %s9506_s24 = smov %s8508_s25 }
 0x810   : > { %s9507_s25 = smov %s9509_s18  ;;  %21 = sbr.rel (!%p19_p7) target bundleno = 11 (0xb), region = 121 }
 0x815   :  { %6638 = vsyncpa [#allocation3], 1 }
 0x816   :  { %6640 = vsyncpa [#allocation3 + $0x1], 1 }
 0x817   :  { %6641 = vsyncpa [#allocation6], 1 }
 0x818   :  { %6642 = vsyncpa [#allocation9], 1 }
 0x819   :  { %6643 = vsyncpa [#allocation4], 1 }
 0x81a   :  { %6645 = vsyncpa [#allocation4 + $0x1], 1 }

</bundles_post_ra>
